<compile_context>
chip_gen: v6e
topology: v6e:2x2x1
jax: 0.10.0
libtpu: 0.0.40
codegen_flags: <defaults>
</compile_context>

<pallas_src>
import functools

import jax
import jax.numpy as jnp
from jax.experimental import pallas as pl
from jax.experimental.pallas import tpu as pltpu

CONV_CH = 64   # both conv layers output 64 channels (per the PyTorch module)
K = 5          # conv kernel size
DIL2 = 2       # dilation of second conv


# ---------------------------------------------------------------------------
# Fused kernel builder (closes over static sizes).
# ---------------------------------------------------------------------------
def _make_kernel(*, B, T, H, num_layers):
    TB = T * B
    pad2 = DIL2 * (K - 1) // 2         # 'same' pad (timesteps) per side, conv2
    n_in = 5 + 3 * num_layers + 2      # convs + per-layer LSTM params + fc

    def kernel(*refs):
        in_refs = refs[:n_in]
        o_ref = refs[n_in]

        slab1_ref, w1_ref, b1_ref, w2_ref, b2_ref = in_refs[:5]
        lstm_refs = in_refs[5:5 + 3 * num_layers]
        fcw_ref, fcb_ref = in_refs[5 + 3 * num_layers:]

        # ---- Conv1 (dil=1) + ReLU: im2col slab prebuilt in wrapper ----
        h = jnp.maximum(
            jnp.dot(slab1_ref[...], w1_ref[...],
                    preferred_element_type=jnp.float32) + b1_ref[...],
            0.0)                                              # (TB, 64)

        # ---- Conv2 (dil=2) + ReLU: tap-wise accumulation (5 matmuls) ----
        zpad = jnp.zeros((pad2 * B, CONV_CH), jnp.float32)
        hp = jnp.concatenate([zpad, h, zpad], axis=0)         # ((T+2*pad2)*B, 64)
        acc = jnp.zeros((TB, CONV_CH), jnp.float32)
        for k in range(K):
            off = DIL2 * k * B
            acc = acc + jnp.dot(hp[off:off + TB, :], w2_ref[k],
                                preferred_element_type=jnp.float32)
        h = jnp.maximum(acc + b2_ref[...], 0.0)               # (TB, 64)

        # TODO(synk): nn.Dropout is identity in eval mode; training-mode
        # random masking is not implemented here.

        # ---- LSTM stack: wavefront-interleaved, fused 4-gate recurrence ----
        L = num_layers
        wih, whh, bias = [], [], []
        for l in range(L):
            wih_ref, whh_ref, b_ref = lstm_refs[3 * l:3 * l + 3]
            wih.append(wih_ref[...])       # (D_l, 4H)   D_0 = 64, else H
            whh.append(whh_ref[...])       # (H, 4H)  kept whole: one matmul/step
            bias.append(b_ref[...])        # (1, 4H)

        # Layer 0's input projection is independent of the recurrence: hoist it
        # out of the time loop as one batched matmul (biases folded in).
        gx0 = jnp.dot(h, wih[0], preferred_element_type=jnp.float32) + bias[0]

        # PyTorch gate order (i, f, g, o): only the cell gate g, lanes
        # [2H, 3H), gets tanh; everything else sigmoid.  Mask built once.
        col = jax.lax.broadcasted_iota(jnp.int32, (B, 4 * H), 1)
        tanh_lane = (col >= 2 * H) & (col < 3 * H)

        h_st = [jnp.zeros((B, H), jnp.float32) for _ in range(L)]
        c_st = [jnp.zeros((B, H), jnp.float32) for _ in range(L)]
        outs = []
        # Wavefront: at iteration s, layer l processes timestep t = s - l.
        # Layer l's input at step t is layer (l-1)'s h at step t, which was
        # produced in the previous wavefront iteration (snapshot prev_h).
        for s in range(T + L - 1):
            prev_h = list(h_st)
            for l in range(L):
                t = s - l
                if not (0 <= t < T):
                    continue
                if l == 0:
                    g = gx0[t * B:(t + 1) * B, :]
                else:
                    g = (jnp.dot(prev_h[l - 1], wih[l],
                                 preferred_element_type=jnp.float32) + bias[l])
                # Single fused 128-lane recurrent matmul (all 4 gates at once).
                g = g + jnp.dot(prev_h[l], whh[l],
                                preferred_element_type=jnp.float32)
                # Two full-width EUP pushes (sigmoid + tanh) + lane select.
                act = jnp.where(tanh_lane, jnp.tanh(g), jax.nn.sigmoid(g))
                ig = act[:, 0:H]
                fg = act[:, H:2 * H]
                gg = act[:, 2 * H:3 * H]
                og = act[:, 3 * H:4 * H]
                c_new = fg * c_st[l] + ig * gg
                h_new = og * jnp.tanh(c_new)
                c_st[l] = c_new
                h_st[l] = h_new
                if l == L - 1:
                    outs.append(h_new)     # kept in vregs; no masked stores

        # One dense assembly of the last layer's outputs (time-major t*B+b).
        hseq = jnp.concatenate(outs, axis=0)                  # (TB, H)

        # ---- Linear on every timestep; lane-dense 128-wide single store ----
        out = (jnp.dot(hseq, fcw_ref[...], preferred_element_type=jnp.float32)
               + fcb_ref[...])                                # (TB, C_pad)
        o_ref[...] = out.astype(o_ref.dtype)

    return kernel


# ---------------------------------------------------------------------------
# Full model forward (use_cnn == 'yes' path), one fused pallas_call.
# ---------------------------------------------------------------------------
def lstm_model_forward(x, params, *, hidden_size, num_layers, num_classes):
    B, C_in, T = x.shape
    H = hidden_size
    TB = T * B
    pad1 = (K - 1) // 2

    # Conv1 im2col slab built in the wrapper (plain XLA): time-major rows
    # (t*B + b) with shared time padding so tap shifts never cross batches.
    x_p = jnp.pad(x.astype(jnp.float32), ((0, 0), (0, 0), (pad1, pad1)))
    x2 = jnp.transpose(x_p, (2, 0, 1)).reshape((T + 2 * pad1) * B, C_in)
    slab1 = jnp.concatenate([x2[k * B:k * B + TB, :] for k in range(K)], axis=1)

    # Conv weights: conv1 as (K*C_in, 64) matching the slab's tap ordering;
    # conv2 as per-tap (K, 64, 64) for tap-wise accumulation in the kernel.
    w1r = jnp.transpose(params["conv1_w"], (2, 1, 0)).reshape(K * C_in, CONV_CH)
    b1r = params["conv1_b"].reshape(1, CONV_CH)
    w2taps = jnp.transpose(params["conv2_w"], (2, 1, 0))      # (K, 64, 64)
    b2r = params["conv2_b"].reshape(1, CONV_CH)

    inputs = [slab1, w1r, b1r, w2taps, b2r]
    for l in range(num_layers):
        inputs.append(jnp.transpose(params[f"lstm{l}_wih"]))   # (D, 4H)
        inputs.append(jnp.transpose(params[f"lstm{l}_whh"]))   # (H, 4H), whole
        inputs.append((params[f"lstm{l}_bih"]
                       + params[f"lstm{l}_bhh"]).reshape(1, 4 * H))

    # Zero-pad the classifier to a full 128-lane width so the single output
    # store is lane-dense; padding is sliced off in the wrapper.
    C_pad = ((num_classes + 127) // 128) * 128
    fcw_pad = jnp.zeros((H, C_pad), jnp.float32).at[:, :num_classes].set(
        jnp.transpose(params["fc_w"]))
    fcb_pad = jnp.zeros((1, C_pad), jnp.float32).at[:, :num_classes].set(
        params["fc_b"].reshape(1, num_classes))
    inputs += [fcw_pad, fcb_pad]

    kernel = _make_kernel(B=B, T=T, H=H, num_layers=num_layers)

    out = pl.pallas_call(
        kernel,
        out_shape=jax.ShapeDtypeStruct((TB, C_pad), jnp.float32),
        in_specs=[pl.BlockSpec(memory_space=pltpu.MemorySpace.VMEM)] * len(inputs),
        out_specs=pl.BlockSpec(memory_space=pltpu.MemorySpace.VMEM),
    )(*inputs)

    # Rows are ordered (t*B + b); drop lane padding and return (B, T, C).
    return jnp.transpose(out[:, :num_classes].reshape(T, B, num_classes),
                         (1, 0, 2))


# ---------------------------------------------------------------------------
# Pure-JAX reference for correctness checking.
# ---------------------------------------------------------------------------
def ref_forward(x, params, *, hidden_size, num_layers):
    H = hidden_size

    def conv(x, w, b, d):
        pad = d * (w.shape[2] - 1) // 2
        y = jax.lax.conv_general_dilated(
            x, w, window_strides=(1,), padding=[(pad, pad)],
            rhs_dilation=(d,), dimension_numbers=("NCH", "OIH", "NCH"))
        return jnp.maximum(y + b[None, :, None], 0.0)

    out = conv(x, params["conv1_w"], params["conv1_b"], 1)
    out = conv(out, params["conv2_w"], params["conv2_b"], 2)
    out = jnp.transpose(out, (0, 2, 1))
    for l in range(num_layers):
        wih = params[f"lstm{l}_wih"]
        whh = params[f"lstm{l}_whh"]
        b = params[f"lstm{l}_bih"] + params[f"lstm{l}_bhh"]
        B, T, _ = out.shape
        h = jnp.zeros((B, H), jnp.float32)
        c = jnp.zeros((B, H), jnp.float32)
        ys = []
        for t in range(T):
            g = out[:, t, :] @ wih.T + h @ whh.T + b
            i = jax.nn.sigmoid(g[:, :H])
            f = jax.nn.sigmoid(g[:, H:2 * H])
            gg = jnp.tanh(g[:, 2 * H:3 * H])
            o = jax.nn.sigmoid(g[:, 3 * H:4 * H])
            c = f * c + i * gg
            h = o * jnp.tanh(c)
            ys.append(h)
        out = jnp.stack(ys, axis=1)
    return out @ params["fc_w"].T + params["fc_b"]


def init_params(key, input_size, hidden_size, num_layers, num_classes):
    H = hidden_size
    keys = jax.random.split(key, 32)
    ki = iter(keys)

    def u(shape):
        return jax.random.uniform(next(ki), shape, jnp.float32, -0.1, 0.1)

    params = {
        "conv1_w": u((64, input_size, 5)), "conv1_b": u((64,)),
        "conv2_w": u((64, 64, 5)),         "conv2_b": u((64,)),
        "fc_w": u((num_classes, H)),       "fc_b": u((num_classes,)),
    }
    in_dim = 64
    for l in range(num_layers):
        params[f"lstm{l}_wih"] = u((4 * H, in_dim))
        params[f"lstm{l}_whh"] = u((4 * H, H))
        params[f"lstm{l}_bih"] = u((4 * H,))
        params[f"lstm{l}_bhh"] = u((4 * H,))
        in_dim = H
    return params


if __name__ == "__main__":
    input_size, hidden_size, num_layers, num_classes = 4, 32, 2, 3
    B, T = 2, 16

    key = jax.random.PRNGKey(0)
    kx, kp = jax.random.split(key)
    x = jax.random.normal(kx, (B, input_size, T), jnp.float32)  # NCW layout
    params = init_params(kp, input_size, hidden_size, num_layers, num_classes)

    fwd = jax.jit(functools.partial(lstm_model_forward,
                                    hidden_size=hidden_size,
                                    num_layers=num_layers,
                                    num_classes=num_classes))
    out = fwd(x, params)
    jax.block_until_ready(out)

    ref = ref_forward(x, params, hidden_size=hidden_size,
                      num_layers=num_layers)
    assert out.shape == (B, T, num_classes)
    assert jnp.allclose(out, ref, atol=1e-4, rtol=1e-4), "mismatch vs reference"
    print("KERNEL_OK")
</pallas_src>

<mosaic_0001>
module attributes {stable_mosaic.version = 11 : i64} {
  func.func @kernel(%arg0: memref<32x20xf32, #tpu.memory_space<vmem>>, %arg1: memref<20x64xf32, #tpu.memory_space<vmem>>, %arg2: memref<1x64xf32, #tpu.memory_space<vmem>>, %arg3: memref<5x64x64xf32, #tpu.memory_space<vmem>>, %arg4: memref<1x64xf32, #tpu.memory_space<vmem>>, %arg5: memref<64x128xf32, #tpu.memory_space<vmem>>, %arg6: memref<32x128xf32, #tpu.memory_space<vmem>>, %arg7: memref<1x128xf32, #tpu.memory_space<vmem>>, %arg8: memref<32x128xf32, #tpu.memory_space<vmem>>, %arg9: memref<32x128xf32, #tpu.memory_space<vmem>>, %arg10: memref<1x128xf32, #tpu.memory_space<vmem>>, %arg11: memref<32x128xf32, #tpu.memory_space<vmem>>, %arg12: memref<1x128xf32, #tpu.memory_space<vmem>>, %arg13: memref<32x128xf32, #tpu.memory_space<vmem>>) attributes {dimension_semantics = [], scalar_prefetch = 0 : i64, scratch_operands = 0 : i64, tpu.core_type = #tpu.core_type<tc>} {
    %c0 = arith.constant 0 : index
    %c0_0 = arith.constant 0 : index
    %0 = vector.load %arg0[%c0, %c0_0] : memref<32x20xf32, #tpu.memory_space<vmem>>, vector<32x20xf32>
    %c0_1 = arith.constant 0 : index
    %c0_2 = arith.constant 0 : index
    %1 = vector.load %arg1[%c0_1, %c0_2] : memref<20x64xf32, #tpu.memory_space<vmem>>, vector<20x64xf32>
    %cst = arith.constant dense<0.000000e+00> : vector<32x64xf32>
    %2 = tpu.matmul %0, %1, %cst {dimension_numbers = #tpu.dot_dimension_numbers<[1], [0], [0], [1], [0, 0, 1, 1], [], []>} : vector<32x20xf32>, vector<20x64xf32>, vector<32x64xf32> -> vector<32x64xf32>
    %c0_3 = arith.constant 0 : index
    %c0_4 = arith.constant 0 : index
    %3 = vector.load %arg2[%c0_3, %c0_4] : memref<1x64xf32, #tpu.memory_space<vmem>>, vector<1x64xf32>
    %4 = vector.broadcast %3 : vector<1x64xf32> to vector<32x64xf32>
    %5 = arith.addf %2, %4 : vector<32x64xf32>
    %cst_5 = arith.constant 0.000000e+00 : f32
    %6 = vector.broadcast %cst_5 : f32 to vector<32x64xf32>
    %7 = arith.maximumf %5, %6 : vector<32x64xf32>
    %cst_6 = arith.constant 0.000000e+00 : f32
    %8 = vector.broadcast %cst_6 : f32 to vector<8x64xf32>
    %9 = tpu.concatenate %8, %7, %8 in 0 : vector<8x64xf32>, vector<32x64xf32>, vector<8x64xf32> -> vector<48x64xf32>
    %cst_7 = arith.constant 0.000000e+00 : f32
    %10 = vector.broadcast %cst_7 : f32 to vector<32x64xf32>
    %11 = vector.extract_strided_slice %9 {offsets = [0, 0], sizes = [32, 64], strides = [1, 1]} : vector<48x64xf32> to vector<32x64xf32>
    %c0_8 = arith.constant 0 : index
    %c0_9 = arith.constant 0 : index
    %c0_10 = arith.constant 0 : index
    %12 = vector.load %arg3[%c0_8, %c0_9, %c0_10] : memref<5x64x64xf32, #tpu.memory_space<vmem>>, vector<1x64x64xf32>
    %13 = vector.shape_cast %12 : vector<1x64x64xf32> to vector<64x64xf32>
    %cst_11 = arith.constant dense<0.000000e+00> : vector<32x64xf32>
    %14 = tpu.matmul %11, %13, %cst_11 {dimension_numbers = #tpu.dot_dimension_numbers<[1], [0], [0], [1], [0, 0, 1, 1], [], []>} : vector<32x64xf32>, vector<64x64xf32>, vector<32x64xf32> -> vector<32x64xf32>
    %15 = arith.addf %10, %14 : vector<32x64xf32>
    %16 = vector.extract_strided_slice %9 {offsets = [4, 0], sizes = [32, 64], strides = [1, 1]} : vector<48x64xf32> to vector<32x64xf32>
    %c1 = arith.constant 1 : index
    %c0_12 = arith.constant 0 : index
    %c0_13 = arith.constant 0 : index
    %17 = vector.load %arg3[%c1, %c0_12, %c0_13] : memref<5x64x64xf32, #tpu.memory_space<vmem>>, vector<1x64x64xf32>
    %18 = vector.shape_cast %17 : vector<1x64x64xf32> to vector<64x64xf32>
    %cst_14 = arith.constant dense<0.000000e+00> : vector<32x64xf32>
    %19 = tpu.matmul %16, %18, %cst_14 {dimension_numbers = #tpu.dot_dimension_numbers<[1], [0], [0], [1], [0, 0, 1, 1], [], []>} : vector<32x64xf32>, vector<64x64xf32>, vector<32x64xf32> -> vector<32x64xf32>
    %20 = arith.addf %15, %19 : vector<32x64xf32>
    %21 = vector.extract_strided_slice %9 {offsets = [8, 0], sizes = [32, 64], strides = [1, 1]} : vector<48x64xf32> to vector<32x64xf32>
    %c2 = arith.constant 2 : index
    %c0_15 = arith.constant 0 : index
    %c0_16 = arith.constant 0 : index
    %22 = vector.load %arg3[%c2, %c0_15, %c0_16] : memref<5x64x64xf32, #tpu.memory_space<vmem>>, vector<1x64x64xf32>
    %23 = vector.shape_cast %22 : vector<1x64x64xf32> to vector<64x64xf32>
    %cst_17 = arith.constant dense<0.000000e+00> : vector<32x64xf32>
    %24 = tpu.matmul %21, %23, %cst_17 {dimension_numbers = #tpu.dot_dimension_numbers<[1], [0], [0], [1], [0, 0, 1, 1], [], []>} : vector<32x64xf32>, vector<64x64xf32>, vector<32x64xf32> -> vector<32x64xf32>
    %25 = arith.addf %20, %24 : vector<32x64xf32>
    %26 = vector.extract_strided_slice %9 {offsets = [12, 0], sizes = [32, 64], strides = [1, 1]} : vector<48x64xf32> to vector<32x64xf32>
    %c3 = arith.constant 3 : index
    %c0_18 = arith.constant 0 : index
    %c0_19 = arith.constant 0 : index
    %27 = vector.load %arg3[%c3, %c0_18, %c0_19] : memref<5x64x64xf32, #tpu.memory_space<vmem>>, vector<1x64x64xf32>
    %28 = vector.shape_cast %27 : vector<1x64x64xf32> to vector<64x64xf32>
    %cst_20 = arith.constant dense<0.000000e+00> : vector<32x64xf32>
    %29 = tpu.matmul %26, %28, %cst_20 {dimension_numbers = #tpu.dot_dimension_numbers<[1], [0], [0], [1], [0, 0, 1, 1], [], []>} : vector<32x64xf32>, vector<64x64xf32>, vector<32x64xf32> -> vector<32x64xf32>
    %30 = arith.addf %25, %29 : vector<32x64xf32>
    %31 = vector.extract_strided_slice %9 {offsets = [16, 0], sizes = [32, 64], strides = [1, 1]} : vector<48x64xf32> to vector<32x64xf32>
    %c4 = arith.constant 4 : index
    %c0_21 = arith.constant 0 : index
    %c0_22 = arith.constant 0 : index
    %32 = vector.load %arg3[%c4, %c0_21, %c0_22] : memref<5x64x64xf32, #tpu.memory_space<vmem>>, vector<1x64x64xf32>
    %33 = vector.shape_cast %32 : vector<1x64x64xf32> to vector<64x64xf32>
    %cst_23 = arith.constant dense<0.000000e+00> : vector<32x64xf32>
    %34 = tpu.matmul %31, %33, %cst_23 {dimension_numbers = #tpu.dot_dimension_numbers<[1], [0], [0], [1], [0, 0, 1, 1], [], []>} : vector<32x64xf32>, vector<64x64xf32>, vector<32x64xf32> -> vector<32x64xf32>
    %35 = arith.addf %30, %34 : vector<32x64xf32>
    %c0_24 = arith.constant 0 : index
    %c0_25 = arith.constant 0 : index
    %36 = vector.load %arg4[%c0_24, %c0_25] : memref<1x64xf32, #tpu.memory_space<vmem>>, vector<1x64xf32>
    %37 = vector.broadcast %36 : vector<1x64xf32> to vector<32x64xf32>
    %38 = arith.addf %35, %37 : vector<32x64xf32>
    %cst_26 = arith.constant 0.000000e+00 : f32
    %39 = vector.broadcast %cst_26 : f32 to vector<32x64xf32>
    %40 = arith.maximumf %38, %39 : vector<32x64xf32>
    %c0_27 = arith.constant 0 : index
    %c0_28 = arith.constant 0 : index
    %41 = vector.load %arg5[%c0_27, %c0_28] : memref<64x128xf32, #tpu.memory_space<vmem>>, vector<64x128xf32>
    %c0_29 = arith.constant 0 : index
    %c0_30 = arith.constant 0 : index
    %42 = vector.load %arg6[%c0_29, %c0_30] : memref<32x128xf32, #tpu.memory_space<vmem>>, vector<32x128xf32>
    %c0_31 = arith.constant 0 : index
    %c0_32 = arith.constant 0 : index
    %43 = vector.load %arg7[%c0_31, %c0_32] : memref<1x128xf32, #tpu.memory_space<vmem>>, vector<1x128xf32>
    %c0_33 = arith.constant 0 : index
    %c0_34 = arith.constant 0 : index
    %44 = vector.load %arg8[%c0_33, %c0_34] : memref<32x128xf32, #tpu.memory_space<vmem>>, vector<32x128xf32>
    %c0_35 = arith.constant 0 : index
    %c0_36 = arith.constant 0 : index
    %45 = vector.load %arg9[%c0_35, %c0_36] : memref<32x128xf32, #tpu.memory_space<vmem>>, vector<32x128xf32>
    %c0_37 = arith.constant 0 : index
    %c0_38 = arith.constant 0 : index
    %46 = vector.load %arg10[%c0_37, %c0_38] : memref<1x128xf32, #tpu.memory_space<vmem>>, vector<1x128xf32>
    %cst_39 = arith.constant dense<0.000000e+00> : vector<32x128xf32>
    %47 = tpu.matmul %40, %41, %cst_39 {dimension_numbers = #tpu.dot_dimension_numbers<[1], [0], [0], [1], [0, 0, 1, 1], [], []>} : vector<32x64xf32>, vector<64x128xf32>, vector<32x128xf32> -> vector<32x128xf32>
    %48 = vector.broadcast %43 : vector<1x128xf32> to vector<32x128xf32>
    %49 = arith.addf %47, %48 : vector<32x128xf32>
    %50 = tpu.iota {dimensions = array<i32: 1>} : vector<2x128xi32>
    %c64_i32 = arith.constant 64 : i32
    %51 = vector.broadcast %c64_i32 : i32 to vector<2x128xi32>
    %52 = arith.cmpi sge, %50, %51 : vector<2x128xi32>
    %c96_i32 = arith.constant 96 : i32
    %53 = vector.broadcast %c96_i32 : i32 to vector<2x128xi32>
    %54 = arith.cmpi slt, %50, %53 : vector<2x128xi32>
    %55 = arith.andi %52, %54 : vector<2x128xi1>
    %cst_40 = arith.constant 0.000000e+00 : f32
    %56 = vector.broadcast %cst_40 : f32 to vector<2x32xf32>
    %cst_41 = arith.constant 0.000000e+00 : f32
    %57 = vector.broadcast %cst_41 : f32 to vector<2x32xf32>
    %cst_42 = arith.constant 0.000000e+00 : f32
    %58 = vector.broadcast %cst_42 : f32 to vector<2x32xf32>
    %cst_43 = arith.constant 0.000000e+00 : f32
    %59 = vector.broadcast %cst_43 : f32 to vector<2x32xf32>
    %60 = vector.extract_strided_slice %49 {offsets = [0, 0], sizes = [2, 128], strides = [1, 1]} : vector<32x128xf32> to vector<2x128xf32>
    %cst_44 = arith.constant dense<0.000000e+00> : vector<2x128xf32>
    %61 = tpu.matmul %56, %42, %cst_44 {dimension_numbers = #tpu.dot_dimension_numbers<[1], [0], [0], [1], [0, 0, 1, 1], [], []>} : vector<2x32xf32>, vector<32x128xf32>, vector<2x128xf32> -> vector<2x128xf32>
    %62 = arith.addf %60, %61 : vector<2x128xf32>
    %63 = math.tanh %62 : vector<2x128xf32>
    %64 = arith.negf %62 : vector<2x128xf32>
    %65 = math.exp %64 : vector<2x128xf32>
    %cst_45 = arith.constant 1.000000e+00 : f32
    %66 = vector.broadcast %cst_45 : f32 to vector<2x128xf32>
    %67 = arith.addf %66, %65 : vector<2x128xf32>
    %68 = arith.divf %66, %67 : vector<2x128xf32>
    %69 = arith.select %55, %63, %68 : vector<2x128xi1>, vector<2x128xf32>
    %70 = vector.extract_strided_slice %69 {offsets = [0, 0], sizes = [2, 32], strides = [1, 1]} : vector<2x128xf32> to vector<2x32xf32>
    %71 = vector.extract_strided_slice %69 {offsets = [0, 32], sizes = [2, 32], strides = [1, 1]} : vector<2x128xf32> to vector<2x32xf32>
    %72 = vector.extract_strided_slice %69 {offsets = [0, 64], sizes = [2, 32], strides = [1, 1]} : vector<2x128xf32> to vector<2x32xf32>
    %73 = vector.extract_strided_slice %69 {offsets = [0, 96], sizes = [2, 32], strides = [1, 1]} : vector<2x128xf32> to vector<2x32xf32>
    %74 = arith.mulf %71, %58 : vector<2x32xf32>
    %75 = arith.mulf %70, %72 : vector<2x32xf32>
    %76 = arith.addf %74, %75 : vector<2x32xf32>
    %77 = math.tanh %76 : vector<2x32xf32>
    %78 = arith.mulf %73, %77 : vector<2x32xf32>
    %79 = vector.extract_strided_slice %49 {offsets = [2, 0], sizes = [2, 128], strides = [1, 1]} : vector<32x128xf32> to vector<2x128xf32>
    %cst_46 = arith.constant dense<0.000000e+00> : vector<2x128xf32>
    %80 = tpu.matmul %78, %42, %cst_46 {dimension_numbers = #tpu.dot_dimension_numbers<[1], [0], [0], [1], [0, 0, 1, 1], [], []>} : vector<2x32xf32>, vector<32x128xf32>, vector<2x128xf32> -> vector<2x128xf32>
    %81 = arith.addf %79, %80 : vector<2x128xf32>
    %82 = math.tanh %81 : vector<2x128xf32>
    %83 = arith.negf %81 : vector<2x128xf32>
    %84 = math.exp %83 : vector<2x128xf32>
    %cst_47 = arith.constant 1.000000e+00 : f32
    %85 = vector.broadcast %cst_47 : f32 to vector<2x128xf32>
    %86 = arith.addf %85, %84 : vector<2x128xf32>
    %87 = arith.divf %85, %86 : vector<2x128xf32>
    %88 = arith.select %55, %82, %87 : vector<2x128xi1>, vector<2x128xf32>
    %89 = vector.extract_strided_slice %88 {offsets = [0, 0], sizes = [2, 32], strides = [1, 1]} : vector<2x128xf32> to vector<2x32xf32>
    %90 = vector.extract_strided_slice %88 {offsets = [0, 32], sizes = [2, 32], strides = [1, 1]} : vector<2x128xf32> to vector<2x32xf32>
    %91 = vector.extract_strided_slice %88 {offsets = [0, 64], sizes = [2, 32], strides = [1, 1]} : vector<2x128xf32> to vector<2x32xf32>
    %92 = vector.extract_strided_slice %88 {offsets = [0, 96], sizes = [2, 32], strides = [1, 1]} : vector<2x128xf32> to vector<2x32xf32>
    %93 = arith.mulf %90, %76 : vector<2x32xf32>
    %94 = arith.mulf %89, %91 : vector<2x32xf32>
    %95 = arith.addf %93, %94 : vector<2x32xf32>
    %96 = math.tanh %95 : vector<2x32xf32>
    %97 = arith.mulf %92, %96 : vector<2x32xf32>
    %cst_48 = arith.constant dense<0.000000e+00> : vector<2x128xf32>
    %98 = tpu.matmul %78, %44, %cst_48 {dimension_numbers = #tpu.dot_dimension_numbers<[1], [0], [0], [1], [0, 0, 1, 1], [], []>} : vector<2x32xf32>, vector<32x128xf32>, vector<2x128xf32> -> vector<2x128xf32>
    %99 = vector.broadcast %46 : vector<1x128xf32> to vector<2x128xf32>
    %100 = arith.addf %98, %99 : vector<2x128xf32>
    %cst_49 = arith.constant dense<0.000000e+00> : vector<2x128xf32>
    %101 = tpu.matmul %57, %45, %cst_49 {dimension_numbers = #tpu.dot_dimension_numbers<[1], [0], [0], [1], [0, 0, 1, 1], [], []>} : vector<2x32xf32>, vector<32x128xf32>, vector<2x128xf32> -> vector<2x128xf32>
    %102 = arith.addf %100, %101 : vector<2x128xf32>
    %103 = math.tanh %102 : vector<2x128xf32>
    %104 = arith.negf %102 : vector<2x128xf32>
    %105 = math.exp %104 : vector<2x128xf32>
    %cst_50 = arith.constant 1.000000e+00 : f32
    %106 = vector.broadcast %cst_50 : f32 to vector<2x128xf32>
    %107 = arith.addf %106, %105 : vector<2x128xf32>
    %108 = arith.divf %106, %107 : vector<2x128xf32>
    %109 = arith.select %55, %103, %108 : vector<2x128xi1>, vector<2x128xf32>
    %110 = vector.extract_strided_slice %109 {offsets = [0, 0], sizes = [2, 32], strides = [1, 1]} : vector<2x128xf32> to vector<2x32xf32>
    %111 = vector.extract_strided_slice %109 {offsets = [0, 32], sizes = [2, 32], strides = [1, 1]} : vector<2x128xf32> to vector<2x32xf32>
    %112 = vector.extract_strided_slice %109 {offsets = [0, 64], sizes = [2, 32], strides = [1, 1]} : vector<2x128xf32> to vector<2x32xf32>
    %113 = vector.extract_strided_slice %109 {offsets = [0, 96], sizes = [2, 32], strides = [1, 1]} : vector<2x128xf32> to vector<2x32xf32>
    %114 = arith.mulf %111, %59 : vector<2x32xf32>
    %115 = arith.mulf %110, %112 : vector<2x32xf32>
    %116 = arith.addf %114, %115 : vector<2x32xf32>
    %117 = math.tanh %116 : vector<2x32xf32>
    %118 = arith.mulf %113, %117 : vector<2x32xf32>
    %119 = vector.extract_strided_slice %49 {offsets = [4, 0], sizes = [2, 128], strides = [1, 1]} : vector<32x128xf32> to vector<2x128xf32>
    %cst_51 = arith.constant dense<0.000000e+00> : vector<2x128xf32>
    %120 = tpu.matmul %97, %42, %cst_51 {dimension_numbers = #tpu.dot_dimension_numbers<[1], [0], [0], [1], [0, 0, 1, 1], [], []>} : vector<2x32xf32>, vector<32x128xf32>, vector<2x128xf32> -> vector<2x128xf32>
    %121 = arith.addf %119, %120 : vector<2x128xf32>
    %122 = math.tanh %121 : vector<2x128xf32>
    %123 = arith.negf %121 : vector<2x128xf32>
    %124 = math.exp %123 : vector<2x128xf32>
    %cst_52 = arith.constant 1.000000e+00 : f32
    %125 = vector.broadcast %cst_52 : f32 to vector<2x128xf32>
    %126 = arith.addf %125, %124 : vector<2x128xf32>
    %127 = arith.divf %125, %126 : vector<2x128xf32>
    %128 = arith.select %55, %122, %127 : vector<2x128xi1>, vector<2x128xf32>
    %129 = vector.extract_strided_slice %128 {offsets = [0, 0], sizes = [2, 32], strides = [1, 1]} : vector<2x128xf32> to vector<2x32xf32>
    %130 = vector.extract_strided_slice %128 {offsets = [0, 32], sizes = [2, 32], strides = [1, 1]} : vector<2x128xf32> to vector<2x32xf32>
    %131 = vector.extract_strided_slice %128 {offsets = [0, 64], sizes = [2, 32], strides = [1, 1]} : vector<2x128xf32> to vector<2x32xf32>
    %132 = vector.extract_strided_slice %128 {offsets = [0, 96], sizes = [2, 32], strides = [1, 1]} : vector<2x128xf32> to vector<2x32xf32>
    %133 = arith.mulf %130, %95 : vector<2x32xf32>
    %134 = arith.mulf %129, %131 : vector<2x32xf32>
    %135 = arith.addf %133, %134 : vector<2x32xf32>
    %136 = math.tanh %135 : vector<2x32xf32>
    %137 = arith.mulf %132, %136 : vector<2x32xf32>
    %cst_53 = arith.constant dense<0.000000e+00> : vector<2x128xf32>
    %138 = tpu.matmul %97, %44, %cst_53 {dimension_numbers = #tpu.dot_dimension_numbers<[1], [0], [0], [1], [0, 0, 1, 1], [], []>} : vector<2x32xf32>, vector<32x128xf32>, vector<2x128xf32> -> vector<2x128xf32>
    %139 = vector.broadcast %46 : vector<1x128xf32> to vector<2x128xf32>
    %140 = arith.addf %138, %139 : vector<2x128xf32>
    %cst_54 = arith.constant dense<0.000000e+00> : vector<2x128xf32>
    %141 = tpu.matmul %118, %45, %cst_54 {dimension_numbers = #tpu.dot_dimension_numbers<[1], [0], [0], [1], [0, 0, 1, 1], [], []>} : vector<2x32xf32>, vector<32x128xf32>, vector<2x128xf32> -> vector<2x128xf32>
    %142 = arith.addf %140, %141 : vector<2x128xf32>
    %143 = math.tanh %142 : vector<2x128xf32>
    %144 = arith.negf %142 : vector<2x128xf32>
    %145 = math.exp %144 : vector<2x128xf32>
    %cst_55 = arith.constant 1.000000e+00 : f32
    %146 = vector.broadcast %cst_55 : f32 to vector<2x128xf32>
    %147 = arith.addf %146, %145 : vector<2x128xf32>
    %148 = arith.divf %146, %147 : vector<2x128xf32>
    %149 = arith.select %55, %143, %148 : vector<2x128xi1>, vector<2x128xf32>
    %150 = vector.extract_strided_slice %149 {offsets = [0, 0], sizes = [2, 32], strides = [1, 1]} : vector<2x128xf32> to vector<2x32xf32>
    %151 = vector.extract_strided_slice %149 {offsets = [0, 32], sizes = [2, 32], strides = [1, 1]} : vector<2x128xf32> to vector<2x32xf32>
    %152 = vector.extract_strided_slice %149 {offsets = [0, 64], sizes = [2, 32], strides = [1, 1]} : vector<2x128xf32> to vector<2x32xf32>
    %153 = vector.extract_strided_slice %149 {offsets = [0, 96], sizes = [2, 32], strides = [1, 1]} : vector<2x128xf32> to vector<2x32xf32>
    %154 = arith.mulf %151, %116 : vector<2x32xf32>
    %155 = arith.mulf %150, %152 : vector<2x32xf32>
    %156 = arith.addf %154, %155 : vector<2x32xf32>
    %157 = math.tanh %156 : vector<2x32xf32>
    %158 = arith.mulf %153, %157 : vector<2x32xf32>
    %159 = vector.extract_strided_slice %49 {offsets = [6, 0], sizes = [2, 128], strides = [1, 1]} : vector<32x128xf32> to vector<2x128xf32>
    %cst_56 = arith.constant dense<0.000000e+00> : vector<2x128xf32>
    %160 = tpu.matmul %137, %42, %cst_56 {dimension_numbers = #tpu.dot_dimension_numbers<[1], [0], [0], [1], [0, 0, 1, 1], [], []>} : vector<2x32xf32>, vector<32x128xf32>, vector<2x128xf32> -> vector<2x128xf32>
    %161 = arith.addf %159, %160 : vector<2x128xf32>
    %162 = math.tanh %161 : vector<2x128xf32>
    %163 = arith.negf %161 : vector<2x128xf32>
    %164 = math.exp %163 : vector<2x128xf32>
    %cst_57 = arith.constant 1.000000e+00 : f32
    %165 = vector.broadcast %cst_57 : f32 to vector<2x128xf32>
    %166 = arith.addf %165, %164 : vector<2x128xf32>
    %167 = arith.divf %165, %166 : vector<2x128xf32>
    %168 = arith.select %55, %162, %167 : vector<2x128xi1>, vector<2x128xf32>
    %169 = vector.extract_strided_slice %168 {offsets = [0, 0], sizes = [2, 32], strides = [1, 1]} : vector<2x128xf32> to vector<2x32xf32>
    %170 = vector.extract_strided_slice %168 {offsets = [0, 32], sizes = [2, 32], strides = [1, 1]} : vector<2x128xf32> to vector<2x32xf32>
    %171 = vector.extract_strided_slice %168 {offsets = [0, 64], sizes = [2, 32], strides = [1, 1]} : vector<2x128xf32> to vector<2x32xf32>
    %172 = vector.extract_strided_slice %168 {offsets = [0, 96], sizes = [2, 32], strides = [1, 1]} : vector<2x128xf32> to vector<2x32xf32>
    %173 = arith.mulf %170, %135 : vector<2x32xf32>
    %174 = arith.mulf %169, %171 : vector<2x32xf32>
    %175 = arith.addf %173, %174 : vector<2x32xf32>
    %176 = math.tanh %175 : vector<2x32xf32>
    %177 = arith.mulf %172, %176 : vector<2x32xf32>
    %cst_58 = arith.constant dense<0.000000e+00> : vector<2x128xf32>
    %178 = tpu.matmul %137, %44, %cst_58 {dimension_numbers = #tpu.dot_dimension_numbers<[1], [0], [0], [1], [0, 0, 1, 1], [], []>} : vector<2x32xf32>, vector<32x128xf32>, vector<2x128xf32> -> vector<2x128xf32>
    %179 = vector.broadcast %46 : vector<1x128xf32> to vector<2x128xf32>
    %180 = arith.addf %178, %179 : vector<2x128xf32>
    %cst_59 = arith.constant dense<0.000000e+00> : vector<2x128xf32>
    %181 = tpu.matmul %158, %45, %cst_59 {dimension_numbers = #tpu.dot_dimension_numbers<[1], [0], [0], [1], [0, 0, 1, 1], [], []>} : vector<2x32xf32>, vector<32x128xf32>, vector<2x128xf32> -> vector<2x128xf32>
    %182 = arith.addf %180, %181 : vector<2x128xf32>
    %183 = math.tanh %182 : vector<2x128xf32>
    %184 = arith.negf %182 : vector<2x128xf32>
    %185 = math.exp %184 : vector<2x128xf32>
    %cst_60 = arith.constant 1.000000e+00 : f32
    %186 = vector.broadcast %cst_60 : f32 to vector<2x128xf32>
    %187 = arith.addf %186, %185 : vector<2x128xf32>
    %188 = arith.divf %186, %187 : vector<2x128xf32>
    %189 = arith.select %55, %183, %188 : vector<2x128xi1>, vector<2x128xf32>
    %190 = vector.extract_strided_slice %189 {offsets = [0, 0], sizes = [2, 32], strides = [1, 1]} : vector<2x128xf32> to vector<2x32xf32>
    %191 = vector.extract_strided_slice %189 {offsets = [0, 32], sizes = [2, 32], strides = [1, 1]} : vector<2x128xf32> to vector<2x32xf32>
    %192 = vector.extract_strided_slice %189 {offsets = [0, 64], sizes = [2, 32], strides = [1, 1]} : vector<2x128xf32> to vector<2x32xf32>
    %193 = vector.extract_strided_slice %189 {offsets = [0, 96], sizes = [2, 32], strides = [1, 1]} : vector<2x128xf32> to vector<2x32xf32>
    %194 = arith.mulf %191, %156 : vector<2x32xf32>
    %195 = arith.mulf %190, %192 : vector<2x32xf32>
    %196 = arith.addf %194, %195 : vector<2x32xf32>
    %197 = math.tanh %196 : vector<2x32xf32>
    %198 = arith.mulf %193, %197 : vector<2x32xf32>
    %199 = vector.extract_strided_slice %49 {offsets = [8, 0], sizes = [2, 128], strides = [1, 1]} : vector<32x128xf32> to vector<2x128xf32>
    %cst_61 = arith.constant dense<0.000000e+00> : vector<2x128xf32>
    %200 = tpu.matmul %177, %42, %cst_61 {dimension_numbers = #tpu.dot_dimension_numbers<[1], [0], [0], [1], [0, 0, 1, 1], [], []>} : vector<2x32xf32>, vector<32x128xf32>, vector<2x128xf32> -> vector<2x128xf32>
    %201 = arith.addf %199, %200 : vector<2x128xf32>
    %202 = math.tanh %201 : vector<2x128xf32>
    %203 = arith.negf %201 : vector<2x128xf32>
    %204 = math.exp %203 : vector<2x128xf32>
    %cst_62 = arith.constant 1.000000e+00 : f32
    %205 = vector.broadcast %cst_62 : f32 to vector<2x128xf32>
    %206 = arith.addf %205, %204 : vector<2x128xf32>
    %207 = arith.divf %205, %206 : vector<2x128xf32>
    %208 = arith.select %55, %202, %207 : vector<2x128xi1>, vector<2x128xf32>
    %209 = vector.extract_strided_slice %208 {offsets = [0, 0], sizes = [2, 32], strides = [1, 1]} : vector<2x128xf32> to vector<2x32xf32>
    %210 = vector.extract_strided_slice %208 {offsets = [0, 32], sizes = [2, 32], strides = [1, 1]} : vector<2x128xf32> to vector<2x32xf32>
    %211 = vector.extract_strided_slice %208 {offsets = [0, 64], sizes = [2, 32], strides = [1, 1]} : vector<2x128xf32> to vector<2x32xf32>
    %212 = vector.extract_strided_slice %208 {offsets = [0, 96], sizes = [2, 32], strides = [1, 1]} : vector<2x128xf32> to vector<2x32xf32>
    %213 = arith.mulf %210, %175 : vector<2x32xf32>
    %214 = arith.mulf %209, %211 : vector<2x32xf32>
    %215 = arith.addf %213, %214 : vector<2x32xf32>
    %216 = math.tanh %215 : vector<2x32xf32>
    %217 = arith.mulf %212, %216 : vector<2x32xf32>
    %cst_63 = arith.constant dense<0.000000e+00> : vector<2x128xf32>
    %218 = tpu.matmul %177, %44, %cst_63 {dimension_numbers = #tpu.dot_dimension_numbers<[1], [0], [0], [1], [0, 0, 1, 1], [], []>} : vector<2x32xf32>, vector<32x128xf32>, vector<2x128xf32> -> vector<2x128xf32>
    %219 = vector.broadcast %46 : vector<1x128xf32> to vector<2x128xf32>
    %220 = arith.addf %218, %219 : vector<2x128xf32>
    %cst_64 = arith.constant dense<0.000000e+00> : vector<2x128xf32>
    %221 = tpu.matmul %198, %45, %cst_64 {dimension_numbers = #tpu.dot_dimension_numbers<[1], [0], [0], [1], [0, 0, 1, 1], [], []>} : vector<2x32xf32>, vector<32x128xf32>, vector<2x128xf32> -> vector<2x128xf32>
    %222 = arith.addf %220, %221 : vector<2x128xf32>
    %223 = math.tanh %222 : vector<2x128xf32>
    %224 = arith.negf %222 : vector<2x128xf32>
    %225 = math.exp %224 : vector<2x128xf32>
    %cst_65 = arith.constant 1.000000e+00 : f32
    %226 = vector.broadcast %cst_65 : f32 to vector<2x128xf32>
    %227 = arith.addf %226, %225 : vector<2x128xf32>
    %228 = arith.divf %226, %227 : vector<2x128xf32>
    %229 = arith.select %55, %223, %228 : vector<2x128xi1>, vector<2x128xf32>
    %230 = vector.extract_strided_slice %229 {offsets = [0, 0], sizes = [2, 32], strides = [1, 1]} : vector<2x128xf32> to vector<2x32xf32>
    %231 = vector.extract_strided_slice %229 {offsets = [0, 32], sizes = [2, 32], strides = [1, 1]} : vector<2x128xf32> to vector<2x32xf32>
    %232 = vector.extract_strided_slice %229 {offsets = [0, 64], sizes = [2, 32], strides = [1, 1]} : vector<2x128xf32> to vector<2x32xf32>
    %233 = vector.extract_strided_slice %229 {offsets = [0, 96], sizes = [2, 32], strides = [1, 1]} : vector<2x128xf32> to vector<2x32xf32>
    %234 = arith.mulf %231, %196 : vector<2x32xf32>
    %235 = arith.mulf %230, %232 : vector<2x32xf32>
    %236 = arith.addf %234, %235 : vector<2x32xf32>
    %237 = math.tanh %236 : vector<2x32xf32>
    %238 = arith.mulf %233, %237 : vector<2x32xf32>
    %239 = vector.extract_strided_slice %49 {offsets = [10, 0], sizes = [2, 128], strides = [1, 1]} : vector<32x128xf32> to vector<2x128xf32>
    %cst_66 = arith.constant dense<0.000000e+00> : vector<2x128xf32>
    %240 = tpu.matmul %217, %42, %cst_66 {dimension_numbers = #tpu.dot_dimension_numbers<[1], [0], [0], [1], [0, 0, 1, 1], [], []>} : vector<2x32xf32>, vector<32x128xf32>, vector<2x128xf32> -> vector<2x128xf32>
    %241 = arith.addf %239, %240 : vector<2x128xf32>
    %242 = math.tanh %241 : vector<2x128xf32>
    %243 = arith.negf %241 : vector<2x128xf32>
    %244 = math.exp %243 : vector<2x128xf32>
    %cst_67 = arith.constant 1.000000e+00 : f32
    %245 = vector.broadcast %cst_67 : f32 to vector<2x128xf32>
    %246 = arith.addf %245, %244 : vector<2x128xf32>
    %247 = arith.divf %245, %246 : vector<2x128xf32>
    %248 = arith.select %55, %242, %247 : vector<2x128xi1>, vector<2x128xf32>
    %249 = vector.extract_strided_slice %248 {offsets = [0, 0], sizes = [2, 32], strides = [1, 1]} : vector<2x128xf32> to vector<2x32xf32>
    %250 = vector.extract_strided_slice %248 {offsets = [0, 32], sizes = [2, 32], strides = [1, 1]} : vector<2x128xf32> to vector<2x32xf32>
    %251 = vector.extract_strided_slice %248 {offsets = [0, 64], sizes = [2, 32], strides = [1, 1]} : vector<2x128xf32> to vector<2x32xf32>
    %252 = vector.extract_strided_slice %248 {offsets = [0, 96], sizes = [2, 32], strides = [1, 1]} : vector<2x128xf32> to vector<2x32xf32>
    %253 = arith.mulf %250, %215 : vector<2x32xf32>
    %254 = arith.mulf %249, %251 : vector<2x32xf32>
    %255 = arith.addf %253, %254 : vector<2x32xf32>
    %256 = math.tanh %255 : vector<2x32xf32>
    %257 = arith.mulf %252, %256 : vector<2x32xf32>
    %cst_68 = arith.constant dense<0.000000e+00> : vector<2x128xf32>
    %258 = tpu.matmul %217, %44, %cst_68 {dimension_numbers = #tpu.dot_dimension_numbers<[1], [0], [0], [1], [0, 0, 1, 1], [], []>} : vector<2x32xf32>, vector<32x128xf32>, vector<2x128xf32> -> vector<2x128xf32>
    %259 = vector.broadcast %46 : vector<1x128xf32> to vector<2x128xf32>
    %260 = arith.addf %258, %259 : vector<2x128xf32>
    %cst_69 = arith.constant dense<0.000000e+00> : vector<2x128xf32>
    %261 = tpu.matmul %238, %45, %cst_69 {dimension_numbers = #tpu.dot_dimension_numbers<[1], [0], [0], [1], [0, 0, 1, 1], [], []>} : vector<2x32xf32>, vector<32x128xf32>, vector<2x128xf32> -> vector<2x128xf32>
    %262 = arith.addf %260, %261 : vector<2x128xf32>
    %263 = math.tanh %262 : vector<2x128xf32>
    %264 = arith.negf %262 : vector<2x128xf32>
    %265 = math.exp %264 : vector<2x128xf32>
    %cst_70 = arith.constant 1.000000e+00 : f32
    %266 = vector.broadcast %cst_70 : f32 to vector<2x128xf32>
    %267 = arith.addf %266, %265 : vector<2x128xf32>
    %268 = arith.divf %266, %267 : vector<2x128xf32>
    %269 = arith.select %55, %263, %268 : vector<2x128xi1>, vector<2x128xf32>
    %270 = vector.extract_strided_slice %269 {offsets = [0, 0], sizes = [2, 32], strides = [1, 1]} : vector<2x128xf32> to vector<2x32xf32>
    %271 = vector.extract_strided_slice %269 {offsets = [0, 32], sizes = [2, 32], strides = [1, 1]} : vector<2x128xf32> to vector<2x32xf32>
    %272 = vector.extract_strided_slice %269 {offsets = [0, 64], sizes = [2, 32], strides = [1, 1]} : vector<2x128xf32> to vector<2x32xf32>
    %273 = vector.extract_strided_slice %269 {offsets = [0, 96], sizes = [2, 32], strides = [1, 1]} : vector<2x128xf32> to vector<2x32xf32>
    %274 = arith.mulf %271, %236 : vector<2x32xf32>
    %275 = arith.mulf %270, %272 : vector<2x32xf32>
    %276 = arith.addf %274, %275 : vector<2x32xf32>
    %277 = math.tanh %276 : vector<2x32xf32>
    %278 = arith.mulf %273, %277 : vector<2x32xf32>
    %279 = vector.extract_strided_slice %49 {offsets = [12, 0], sizes = [2, 128], strides = [1, 1]} : vector<32x128xf32> to vector<2x128xf32>
    %cst_71 = arith.constant dense<0.000000e+00> : vector<2x128xf32>
    %280 = tpu.matmul %257, %42, %cst_71 {dimension_numbers = #tpu.dot_dimension_numbers<[1], [0], [0], [1], [0, 0, 1, 1], [], []>} : vector<2x32xf32>, vector<32x128xf32>, vector<2x128xf32> -> vector<2x128xf32>
    %281 = arith.addf %279, %280 : vector<2x128xf32>
    %282 = math.tanh %281 : vector<2x128xf32>
    %283 = arith.negf %281 : vector<2x128xf32>
    %284 = math.exp %283 : vector<2x128xf32>
    %cst_72 = arith.constant 1.000000e+00 : f32
    %285 = vector.broadcast %cst_72 : f32 to vector<2x128xf32>
    %286 = arith.addf %285, %284 : vector<2x128xf32>
    %287 = arith.divf %285, %286 : vector<2x128xf32>
    %288 = arith.select %55, %282, %287 : vector<2x128xi1>, vector<2x128xf32>
    %289 = vector.extract_strided_slice %288 {offsets = [0, 0], sizes = [2, 32], strides = [1, 1]} : vector<2x128xf32> to vector<2x32xf32>
    %290 = vector.extract_strided_slice %288 {offsets = [0, 32], sizes = [2, 32], strides = [1, 1]} : vector<2x128xf32> to vector<2x32xf32>
    %291 = vector.extract_strided_slice %288 {offsets = [0, 64], sizes = [2, 32], strides = [1, 1]} : vector<2x128xf32> to vector<2x32xf32>
    %292 = vector.extract_strided_slice %288 {offsets = [0, 96], sizes = [2, 32], strides = [1, 1]} : vector<2x128xf32> to vector<2x32xf32>
    %293 = arith.mulf %290, %255 : vector<2x32xf32>
    %294 = arith.mulf %289, %291 : vector<2x32xf32>
    %295 = arith.addf %293, %294 : vector<2x32xf32>
    %296 = math.tanh %295 : vector<2x32xf32>
    %297 = arith.mulf %292, %296 : vector<2x32xf32>
    %cst_73 = arith.constant dense<0.000000e+00> : vector<2x128xf32>
    %298 = tpu.matmul %257, %44, %cst_73 {dimension_numbers = #tpu.dot_dimension_numbers<[1], [0], [0], [1], [0, 0, 1, 1], [], []>} : vector<2x32xf32>, vector<32x128xf32>, vector<2x128xf32> -> vector<2x128xf32>
    %299 = vector.broadcast %46 : vector<1x128xf32> to vector<2x128xf32>
    %300 = arith.addf %298, %299 : vector<2x128xf32>
    %cst_74 = arith.constant dense<0.000000e+00> : vector<2x128xf32>
    %301 = tpu.matmul %278, %45, %cst_74 {dimension_numbers = #tpu.dot_dimension_numbers<[1], [0], [0], [1], [0, 0, 1, 1], [], []>} : vector<2x32xf32>, vector<32x128xf32>, vector<2x128xf32> -> vector<2x128xf32>
    %302 = arith.addf %300, %301 : vector<2x128xf32>
    %303 = math.tanh %302 : vector<2x128xf32>
    %304 = arith.negf %302 : vector<2x128xf32>
    %305 = math.exp %304 : vector<2x128xf32>
    %cst_75 = arith.constant 1.000000e+00 : f32
    %306 = vector.broadcast %cst_75 : f32 to vector<2x128xf32>
    %307 = arith.addf %306, %305 : vector<2x128xf32>
    %308 = arith.divf %306, %307 : vector<2x128xf32>
    %309 = arith.select %55, %303, %308 : vector<2x128xi1>, vector<2x128xf32>
    %310 = vector.extract_strided_slice %309 {offsets = [0, 0], sizes = [2, 32], strides = [1, 1]} : vector<2x128xf32> to vector<2x32xf32>
    %311 = vector.extract_strided_slice %309 {offsets = [0, 32], sizes = [2, 32], strides = [1, 1]} : vector<2x128xf32> to vector<2x32xf32>
    %312 = vector.extract_strided_slice %309 {offsets = [0, 64], sizes = [2, 32], strides = [1, 1]} : vector<2x128xf32> to vector<2x32xf32>
    %313 = vector.extract_strided_slice %309 {offsets = [0, 96], sizes = [2, 32], strides = [1, 1]} : vector<2x128xf32> to vector<2x32xf32>
    %314 = arith.mulf %311, %276 : vector<2x32xf32>
    %315 = arith.mulf %310, %312 : vector<2x32xf32>
    %316 = arith.addf %314, %315 : vector<2x32xf32>
    %317 = math.tanh %316 : vector<2x32xf32>
    %318 = arith.mulf %313, %317 : vector<2x32xf32>
    %319 = vector.extract_strided_slice %49 {offsets = [14, 0], sizes = [2, 128], strides = [1, 1]} : vector<32x128xf32> to vector<2x128xf32>
    %cst_76 = arith.constant dense<0.000000e+00> : vector<2x128xf32>
    %320 = tpu.matmul %297, %42, %cst_76 {dimension_numbers = #tpu.dot_dimension_numbers<[1], [0], [0], [1], [0, 0, 1, 1], [], []>} : vector<2x32xf32>, vector<32x128xf32>, vector<2x128xf32> -> vector<2x128xf32>
    %321 = arith.addf %319, %320 : vector<2x128xf32>
    %322 = math.tanh %321 : vector<2x128xf32>
    %323 = arith.negf %321 : vector<2x128xf32>
    %324 = math.exp %323 : vector<2x128xf32>
    %cst_77 = arith.constant 1.000000e+00 : f32
    %325 = vector.broadcast %cst_77 : f32 to vector<2x128xf32>
    %326 = arith.addf %325, %324 : vector<2x128xf32>
    %327 = arith.divf %325, %326 : vector<2x128xf32>
    %328 = arith.select %55, %322, %327 : vector<2x128xi1>, vector<2x128xf32>
    %329 = vector.extract_strided_slice %328 {offsets = [0, 0], sizes = [2, 32], strides = [1, 1]} : vector<2x128xf32> to vector<2x32xf32>
    %330 = vector.extract_strided_slice %328 {offsets = [0, 32], sizes = [2, 32], strides = [1, 1]} : vector<2x128xf32> to vector<2x32xf32>
    %331 = vector.extract_strided_slice %328 {offsets = [0, 64], sizes = [2, 32], strides = [1, 1]} : vector<2x128xf32> to vector<2x32xf32>
    %332 = vector.extract_strided_slice %328 {offsets = [0, 96], sizes = [2, 32], strides = [1, 1]} : vector<2x128xf32> to vector<2x32xf32>
    %333 = arith.mulf %330, %295 : vector<2x32xf32>
    %334 = arith.mulf %329, %331 : vector<2x32xf32>
    %335 = arith.addf %333, %334 : vector<2x32xf32>
    %336 = math.tanh %335 : vector<2x32xf32>
    %337 = arith.mulf %332, %336 : vector<2x32xf32>
    %cst_78 = arith.constant dense<0.000000e+00> : vector<2x128xf32>
    %338 = tpu.matmul %297, %44, %cst_78 {dimension_numbers = #tpu.dot_dimension_numbers<[1], [0], [0], [1], [0, 0, 1, 1], [], []>} : vector<2x32xf32>, vector<32x128xf32>, vector<2x128xf32> -> vector<2x128xf32>
    %339 = vector.broadcast %46 : vector<1x128xf32> to vector<2x128xf32>
    %340 = arith.addf %338, %339 : vector<2x128xf32>
    %cst_79 = arith.constant dense<0.000000e+00> : vector<2x128xf32>
    %341 = tpu.matmul %318, %45, %cst_79 {dimension_numbers = #tpu.dot_dimension_numbers<[1], [0], [0], [1], [0, 0, 1, 1], [], []>} : vector<2x32xf32>, vector<32x128xf32>, vector<2x128xf32> -> vector<2x128xf32>
    %342 = arith.addf %340, %341 : vector<2x128xf32>
    %343 = math.tanh %342 : vector<2x128xf32>
    %344 = arith.negf %342 : vector<2x128xf32>
    %345 = math.exp %344 : vector<2x128xf32>
    %cst_80 = arith.constant 1.000000e+00 : f32
    %346 = vector.broadcast %cst_80 : f32 to vector<2x128xf32>
    %347 = arith.addf %346, %345 : vector<2x128xf32>
    %348 = arith.divf %346, %347 : vector<2x128xf32>
    %349 = arith.select %55, %343, %348 : vector<2x128xi1>, vector<2x128xf32>
    %350 = vector.extract_strided_slice %349 {offsets = [0, 0], sizes = [2, 32], strides = [1, 1]} : vector<2x128xf32> to vector<2x32xf32>
    %351 = vector.extract_strided_slice %349 {offsets = [0, 32], sizes = [2, 32], strides = [1, 1]} : vector<2x128xf32> to vector<2x32xf32>
    %352 = vector.extract_strided_slice %349 {offsets = [0, 64], sizes = [2, 32], strides = [1, 1]} : vector<2x128xf32> to vector<2x32xf32>
    %353 = vector.extract_strided_slice %349 {offsets = [0, 96], sizes = [2, 32], strides = [1, 1]} : vector<2x128xf32> to vector<2x32xf32>
    %354 = arith.mulf %351, %316 : vector<2x32xf32>
    %355 = arith.mulf %350, %352 : vector<2x32xf32>
    %356 = arith.addf %354, %355 : vector<2x32xf32>
    %357 = math.tanh %356 : vector<2x32xf32>
    %358 = arith.mulf %353, %357 : vector<2x32xf32>
    %359 = vector.extract_strided_slice %49 {offsets = [16, 0], sizes = [2, 128], strides = [1, 1]} : vector<32x128xf32> to vector<2x128xf32>
    %cst_81 = arith.constant dense<0.000000e+00> : vector<2x128xf32>
    %360 = tpu.matmul %337, %42, %cst_81 {dimension_numbers = #tpu.dot_dimension_numbers<[1], [0], [0], [1], [0, 0, 1, 1], [], []>} : vector<2x32xf32>, vector<32x128xf32>, vector<2x128xf32> -> vector<2x128xf32>
    %361 = arith.addf %359, %360 : vector<2x128xf32>
    %362 = math.tanh %361 : vector<2x128xf32>
    %363 = arith.negf %361 : vector<2x128xf32>
    %364 = math.exp %363 : vector<2x128xf32>
    %cst_82 = arith.constant 1.000000e+00 : f32
    %365 = vector.broadcast %cst_82 : f32 to vector<2x128xf32>
    %366 = arith.addf %365, %364 : vector<2x128xf32>
    %367 = arith.divf %365, %366 : vector<2x128xf32>
    %368 = arith.select %55, %362, %367 : vector<2x128xi1>, vector<2x128xf32>
    %369 = vector.extract_strided_slice %368 {offsets = [0, 0], sizes = [2, 32], strides = [1, 1]} : vector<2x128xf32> to vector<2x32xf32>
    %370 = vector.extract_strided_slice %368 {offsets = [0, 32], sizes = [2, 32], strides = [1, 1]} : vector<2x128xf32> to vector<2x32xf32>
    %371 = vector.extract_strided_slice %368 {offsets = [0, 64], sizes = [2, 32], strides = [1, 1]} : vector<2x128xf32> to vector<2x32xf32>
    %372 = vector.extract_strided_slice %368 {offsets = [0, 96], sizes = [2, 32], strides = [1, 1]} : vector<2x128xf32> to vector<2x32xf32>
    %373 = arith.mulf %370, %335 : vector<2x32xf32>
    %374 = arith.mulf %369, %371 : vector<2x32xf32>
    %375 = arith.addf %373, %374 : vector<2x32xf32>
    %376 = math.tanh %375 : vector<2x32xf32>
    %377 = arith.mulf %372, %376 : vector<2x32xf32>
    %cst_83 = arith.constant dense<0.000000e+00> : vector<2x128xf32>
    %378 = tpu.matmul %337, %44, %cst_83 {dimension_numbers = #tpu.dot_dimension_numbers<[1], [0], [0], [1], [0, 0, 1, 1], [], []>} : vector<2x32xf32>, vector<32x128xf32>, vector<2x128xf32> -> vector<2x128xf32>
    %379 = vector.broadcast %46 : vector<1x128xf32> to vector<2x128xf32>
    %380 = arith.addf %378, %379 : vector<2x128xf32>
    %cst_84 = arith.constant dense<0.000000e+00> : vector<2x128xf32>
    %381 = tpu.matmul %358, %45, %cst_84 {dimension_numbers = #tpu.dot_dimension_numbers<[1], [0], [0], [1], [0, 0, 1, 1], [], []>} : vector<2x32xf32>, vector<32x128xf32>, vector<2x128xf32> -> vector<2x128xf32>
    %382 = arith.addf %380, %381 : vector<2x128xf32>
    %383 = math.tanh %382 : vector<2x128xf32>
    %384 = arith.negf %382 : vector<2x128xf32>
    %385 = math.exp %384 : vector<2x128xf32>
    %cst_85 = arith.constant 1.000000e+00 : f32
    %386 = vector.broadcast %cst_85 : f32 to vector<2x128xf32>
    %387 = arith.addf %386, %385 : vector<2x128xf32>
    %388 = arith.divf %386, %387 : vector<2x128xf32>
    %389 = arith.select %55, %383, %388 : vector<2x128xi1>, vector<2x128xf32>
    %390 = vector.extract_strided_slice %389 {offsets = [0, 0], sizes = [2, 32], strides = [1, 1]} : vector<2x128xf32> to vector<2x32xf32>
    %391 = vector.extract_strided_slice %389 {offsets = [0, 32], sizes = [2, 32], strides = [1, 1]} : vector<2x128xf32> to vector<2x32xf32>
    %392 = vector.extract_strided_slice %389 {offsets = [0, 64], sizes = [2, 32], strides = [1, 1]} : vector<2x128xf32> to vector<2x32xf32>
    %393 = vector.extract_strided_slice %389 {offsets = [0, 96], sizes = [2, 32], strides = [1, 1]} : vector<2x128xf32> to vector<2x32xf32>
    %394 = arith.mulf %391, %356 : vector<2x32xf32>
    %395 = arith.mulf %390, %392 : vector<2x32xf32>
    %396 = arith.addf %394, %395 : vector<2x32xf32>
    %397 = math.tanh %396 : vector<2x32xf32>
    %398 = arith.mulf %393, %397 : vector<2x32xf32>
    %399 = vector.extract_strided_slice %49 {offsets = [18, 0], sizes = [2, 128], strides = [1, 1]} : vector<32x128xf32> to vector<2x128xf32>
    %cst_86 = arith.constant dense<0.000000e+00> : vector<2x128xf32>
    %400 = tpu.matmul %377, %42, %cst_86 {dimension_numbers = #tpu.dot_dimension_numbers<[1], [0], [0], [1], [0, 0, 1, 1], [], []>} : vector<2x32xf32>, vector<32x128xf32>, vector<2x128xf32> -> vector<2x128xf32>
    %401 = arith.addf %399, %400 : vector<2x128xf32>
    %402 = math.tanh %401 : vector<2x128xf32>
    %403 = arith.negf %401 : vector<2x128xf32>
    %404 = math.exp %403 : vector<2x128xf32>
    %cst_87 = arith.constant 1.000000e+00 : f32
    %405 = vector.broadcast %cst_87 : f32 to vector<2x128xf32>
    %406 = arith.addf %405, %404 : vector<2x128xf32>
    %407 = arith.divf %405, %406 : vector<2x128xf32>
    %408 = arith.select %55, %402, %407 : vector<2x128xi1>, vector<2x128xf32>
    %409 = vector.extract_strided_slice %408 {offsets = [0, 0], sizes = [2, 32], strides = [1, 1]} : vector<2x128xf32> to vector<2x32xf32>
    %410 = vector.extract_strided_slice %408 {offsets = [0, 32], sizes = [2, 32], strides = [1, 1]} : vector<2x128xf32> to vector<2x32xf32>
    %411 = vector.extract_strided_slice %408 {offsets = [0, 64], sizes = [2, 32], strides = [1, 1]} : vector<2x128xf32> to vector<2x32xf32>
    %412 = vector.extract_strided_slice %408 {offsets = [0, 96], sizes = [2, 32], strides = [1, 1]} : vector<2x128xf32> to vector<2x32xf32>
    %413 = arith.mulf %410, %375 : vector<2x32xf32>
    %414 = arith.mulf %409, %411 : vector<2x32xf32>
    %415 = arith.addf %413, %414 : vector<2x32xf32>
    %416 = math.tanh %415 : vector<2x32xf32>
    %417 = arith.mulf %412, %416 : vector<2x32xf32>
    %cst_88 = arith.constant dense<0.000000e+00> : vector<2x128xf32>
    %418 = tpu.matmul %377, %44, %cst_88 {dimension_numbers = #tpu.dot_dimension_numbers<[1], [0], [0], [1], [0, 0, 1, 1], [], []>} : vector<2x32xf32>, vector<32x128xf32>, vector<2x128xf32> -> vector<2x128xf32>
    %419 = vector.broadcast %46 : vector<1x128xf32> to vector<2x128xf32>
    %420 = arith.addf %418, %419 : vector<2x128xf32>
    %cst_89 = arith.constant dense<0.000000e+00> : vector<2x128xf32>
    %421 = tpu.matmul %398, %45, %cst_89 {dimension_numbers = #tpu.dot_dimension_numbers<[1], [0], [0], [1], [0, 0, 1, 1], [], []>} : vector<2x32xf32>, vector<32x128xf32>, vector<2x128xf32> -> vector<2x128xf32>
    %422 = arith.addf %420, %421 : vector<2x128xf32>
    %423 = math.tanh %422 : vector<2x128xf32>
    %424 = arith.negf %422 : vector<2x128xf32>
    %425 = math.exp %424 : vector<2x128xf32>
    %cst_90 = arith.constant 1.000000e+00 : f32
    %426 = vector.broadcast %cst_90 : f32 to vector<2x128xf32>
    %427 = arith.addf %426, %425 : vector<2x128xf32>
    %428 = arith.divf %426, %427 : vector<2x128xf32>
    %429 = arith.select %55, %423, %428 : vector<2x128xi1>, vector<2x128xf32>
    %430 = vector.extract_strided_slice %429 {offsets = [0, 0], sizes = [2, 32], strides = [1, 1]} : vector<2x128xf32> to vector<2x32xf32>
    %431 = vector.extract_strided_slice %429 {offsets = [0, 32], sizes = [2, 32], strides = [1, 1]} : vector<2x128xf32> to vector<2x32xf32>
    %432 = vector.extract_strided_slice %429 {offsets = [0, 64], sizes = [2, 32], strides = [1, 1]} : vector<2x128xf32> to vector<2x32xf32>
    %433 = vector.extract_strided_slice %429 {offsets = [0, 96], sizes = [2, 32], strides = [1, 1]} : vector<2x128xf32> to vector<2x32xf32>
    %434 = arith.mulf %431, %396 : vector<2x32xf32>
    %435 = arith.mulf %430, %432 : vector<2x32xf32>
    %436 = arith.addf %434, %435 : vector<2x32xf32>
    %437 = math.tanh %436 : vector<2x32xf32>
    %438 = arith.mulf %433, %437 : vector<2x32xf32>
    %439 = vector.extract_strided_slice %49 {offsets = [20, 0], sizes = [2, 128], strides = [1, 1]} : vector<32x128xf32> to vector<2x128xf32>
    %cst_91 = arith.constant dense<0.000000e+00> : vector<2x128xf32>
    %440 = tpu.matmul %417, %42, %cst_91 {dimension_numbers = #tpu.dot_dimension_numbers<[1], [0], [0], [1], [0, 0, 1, 1], [], []>} : vector<2x32xf32>, vector<32x128xf32>, vector<2x128xf32> -> vector<2x128xf32>
    %441 = arith.addf %439, %440 : vector<2x128xf32>
    %442 = math.tanh %441 : vector<2x128xf32>
    %443 = arith.negf %441 : vector<2x128xf32>
    %444 = math.exp %443 : vector<2x128xf32>
    %cst_92 = arith.constant 1.000000e+00 : f32
    %445 = vector.broadcast %cst_92 : f32 to vector<2x128xf32>
    %446 = arith.addf %445, %444 : vector<2x128xf32>
    %447 = arith.divf %445, %446 : vector<2x128xf32>
    %448 = arith.select %55, %442, %447 : vector<2x128xi1>, vector<2x128xf32>
    %449 = vector.extract_strided_slice %448 {offsets = [0, 0], sizes = [2, 32], strides = [1, 1]} : vector<2x128xf32> to vector<2x32xf32>
    %450 = vector.extract_strided_slice %448 {offsets = [0, 32], sizes = [2, 32], strides = [1, 1]} : vector<2x128xf32> to vector<2x32xf32>
    %451 = vector.extract_strided_slice %448 {offsets = [0, 64], sizes = [2, 32], strides = [1, 1]} : vector<2x128xf32> to vector<2x32xf32>
    %452 = vector.extract_strided_slice %448 {offsets = [0, 96], sizes = [2, 32], strides = [1, 1]} : vector<2x128xf32> to vector<2x32xf32>
    %453 = arith.mulf %450, %415 : vector<2x32xf32>
    %454 = arith.mulf %449, %451 : vector<2x32xf32>
    %455 = arith.addf %453, %454 : vector<2x32xf32>
    %456 = math.tanh %455 : vector<2x32xf32>
    %457 = arith.mulf %452, %456 : vector<2x32xf32>
    %cst_93 = arith.constant dense<0.000000e+00> : vector<2x128xf32>
    %458 = tpu.matmul %417, %44, %cst_93 {dimension_numbers = #tpu.dot_dimension_numbers<[1], [0], [0], [1], [0, 0, 1, 1], [], []>} : vector<2x32xf32>, vector<32x128xf32>, vector<2x128xf32> -> vector<2x128xf32>
    %459 = vector.broadcast %46 : vector<1x128xf32> to vector<2x128xf32>
    %460 = arith.addf %458, %459 : vector<2x128xf32>
    %cst_94 = arith.constant dense<0.000000e+00> : vector<2x128xf32>
    %461 = tpu.matmul %438, %45, %cst_94 {dimension_numbers = #tpu.dot_dimension_numbers<[1], [0], [0], [1], [0, 0, 1, 1], [], []>} : vector<2x32xf32>, vector<32x128xf32>, vector<2x128xf32> -> vector<2x128xf32>
    %462 = arith.addf %460, %461 : vector<2x128xf32>
    %463 = math.tanh %462 : vector<2x128xf32>
    %464 = arith.negf %462 : vector<2x128xf32>
    %465 = math.exp %464 : vector<2x128xf32>
    %cst_95 = arith.constant 1.000000e+00 : f32
    %466 = vector.broadcast %cst_95 : f32 to vector<2x128xf32>
    %467 = arith.addf %466, %465 : vector<2x128xf32>
    %468 = arith.divf %466, %467 : vector<2x128xf32>
    %469 = arith.select %55, %463, %468 : vector<2x128xi1>, vector<2x128xf32>
    %470 = vector.extract_strided_slice %469 {offsets = [0, 0], sizes = [2, 32], strides = [1, 1]} : vector<2x128xf32> to vector<2x32xf32>
    %471 = vector.extract_strided_slice %469 {offsets = [0, 32], sizes = [2, 32], strides = [1, 1]} : vector<2x128xf32> to vector<2x32xf32>
    %472 = vector.extract_strided_slice %469 {offsets = [0, 64], sizes = [2, 32], strides = [1, 1]} : vector<2x128xf32> to vector<2x32xf32>
    %473 = vector.extract_strided_slice %469 {offsets = [0, 96], sizes = [2, 32], strides = [1, 1]} : vector<2x128xf32> to vector<2x32xf32>
    %474 = arith.mulf %471, %436 : vector<2x32xf32>
    %475 = arith.mulf %470, %472 : vector<2x32xf32>
    %476 = arith.addf %474, %475 : vector<2x32xf32>
    %477 = math.tanh %476 : vector<2x32xf32>
    %478 = arith.mulf %473, %477 : vector<2x32xf32>
    %479 = vector.extract_strided_slice %49 {offsets = [22, 0], sizes = [2, 128], strides = [1, 1]} : vector<32x128xf32> to vector<2x128xf32>
    %cst_96 = arith.constant dense<0.000000e+00> : vector<2x128xf32>
    %480 = tpu.matmul %457, %42, %cst_96 {dimension_numbers = #tpu.dot_dimension_numbers<[1], [0], [0], [1], [0, 0, 1, 1], [], []>} : vector<2x32xf32>, vector<32x128xf32>, vector<2x128xf32> -> vector<2x128xf32>
    %481 = arith.addf %479, %480 : vector<2x128xf32>
    %482 = math.tanh %481 : vector<2x128xf32>
    %483 = arith.negf %481 : vector<2x128xf32>
    %484 = math.exp %483 : vector<2x128xf32>
    %cst_97 = arith.constant 1.000000e+00 : f32
    %485 = vector.broadcast %cst_97 : f32 to vector<2x128xf32>
    %486 = arith.addf %485, %484 : vector<2x128xf32>
    %487 = arith.divf %485, %486 : vector<2x128xf32>
    %488 = arith.select %55, %482, %487 : vector<2x128xi1>, vector<2x128xf32>
    %489 = vector.extract_strided_slice %488 {offsets = [0, 0], sizes = [2, 32], strides = [1, 1]} : vector<2x128xf32> to vector<2x32xf32>
    %490 = vector.extract_strided_slice %488 {offsets = [0, 32], sizes = [2, 32], strides = [1, 1]} : vector<2x128xf32> to vector<2x32xf32>
    %491 = vector.extract_strided_slice %488 {offsets = [0, 64], sizes = [2, 32], strides = [1, 1]} : vector<2x128xf32> to vector<2x32xf32>
    %492 = vector.extract_strided_slice %488 {offsets = [0, 96], sizes = [2, 32], strides = [1, 1]} : vector<2x128xf32> to vector<2x32xf32>
    %493 = arith.mulf %490, %455 : vector<2x32xf32>
    %494 = arith.mulf %489, %491 : vector<2x32xf32>
    %495 = arith.addf %493, %494 : vector<2x32xf32>
    %496 = math.tanh %495 : vector<2x32xf32>
    %497 = arith.mulf %492, %496 : vector<2x32xf32>
    %cst_98 = arith.constant dense<0.000000e+00> : vector<2x128xf32>
    %498 = tpu.matmul %457, %44, %cst_98 {dimension_numbers = #tpu.dot_dimension_numbers<[1], [0], [0], [1], [0, 0, 1, 1], [], []>} : vector<2x32xf32>, vector<32x128xf32>, vector<2x128xf32> -> vector<2x128xf32>
    %499 = vector.broadcast %46 : vector<1x128xf32> to vector<2x128xf32>
    %500 = arith.addf %498, %499 : vector<2x128xf32>
    %cst_99 = arith.constant dense<0.000000e+00> : vector<2x128xf32>
    %501 = tpu.matmul %478, %45, %cst_99 {dimension_numbers = #tpu.dot_dimension_numbers<[1], [0], [0], [1], [0, 0, 1, 1], [], []>} : vector<2x32xf32>, vector<32x128xf32>, vector<2x128xf32> -> vector<2x128xf32>
    %502 = arith.addf %500, %501 : vector<2x128xf32>
    %503 = math.tanh %502 : vector<2x128xf32>
    %504 = arith.negf %502 : vector<2x128xf32>
    %505 = math.exp %504 : vector<2x128xf32>
    %cst_100 = arith.constant 1.000000e+00 : f32
    %506 = vector.broadcast %cst_100 : f32 to vector<2x128xf32>
    %507 = arith.addf %506, %505 : vector<2x128xf32>
    %508 = arith.divf %506, %507 : vector<2x128xf32>
    %509 = arith.select %55, %503, %508 : vector<2x128xi1>, vector<2x128xf32>
    %510 = vector.extract_strided_slice %509 {offsets = [0, 0], sizes = [2, 32], strides = [1, 1]} : vector<2x128xf32> to vector<2x32xf32>
    %511 = vector.extract_strided_slice %509 {offsets = [0, 32], sizes = [2, 32], strides = [1, 1]} : vector<2x128xf32> to vector<2x32xf32>
    %512 = vector.extract_strided_slice %509 {offsets = [0, 64], sizes = [2, 32], strides = [1, 1]} : vector<2x128xf32> to vector<2x32xf32>
    %513 = vector.extract_strided_slice %509 {offsets = [0, 96], sizes = [2, 32], strides = [1, 1]} : vector<2x128xf32> to vector<2x32xf32>
    %514 = arith.mulf %511, %476 : vector<2x32xf32>
    %515 = arith.mulf %510, %512 : vector<2x32xf32>
    %516 = arith.addf %514, %515 : vector<2x32xf32>
    %517 = math.tanh %516 : vector<2x32xf32>
    %518 = arith.mulf %513, %517 : vector<2x32xf32>
    %519 = vector.extract_strided_slice %49 {offsets = [24, 0], sizes = [2, 128], strides = [1, 1]} : vector<32x128xf32> to vector<2x128xf32>
    %cst_101 = arith.constant dense<0.000000e+00> : vector<2x128xf32>
    %520 = tpu.matmul %497, %42, %cst_101 {dimension_numbers = #tpu.dot_dimension_numbers<[1], [0], [0], [1], [0, 0, 1, 1], [], []>} : vector<2x32xf32>, vector<32x128xf32>, vector<2x128xf32> -> vector<2x128xf32>
    %521 = arith.addf %519, %520 : vector<2x128xf32>
    %522 = math.tanh %521 : vector<2x128xf32>
    %523 = arith.negf %521 : vector<2x128xf32>
    %524 = math.exp %523 : vector<2x128xf32>
    %cst_102 = arith.constant 1.000000e+00 : f32
    %525 = vector.broadcast %cst_102 : f32 to vector<2x128xf32>
    %526 = arith.addf %525, %524 : vector<2x128xf32>
    %527 = arith.divf %525, %526 : vector<2x128xf32>
    %528 = arith.select %55, %522, %527 : vector<2x128xi1>, vector<2x128xf32>
    %529 = vector.extract_strided_slice %528 {offsets = [0, 0], sizes = [2, 32], strides = [1, 1]} : vector<2x128xf32> to vector<2x32xf32>
    %530 = vector.extract_strided_slice %528 {offsets = [0, 32], sizes = [2, 32], strides = [1, 1]} : vector<2x128xf32> to vector<2x32xf32>
    %531 = vector.extract_strided_slice %528 {offsets = [0, 64], sizes = [2, 32], strides = [1, 1]} : vector<2x128xf32> to vector<2x32xf32>
    %532 = vector.extract_strided_slice %528 {offsets = [0, 96], sizes = [2, 32], strides = [1, 1]} : vector<2x128xf32> to vector<2x32xf32>
    %533 = arith.mulf %530, %495 : vector<2x32xf32>
    %534 = arith.mulf %529, %531 : vector<2x32xf32>
    %535 = arith.addf %533, %534 : vector<2x32xf32>
    %536 = math.tanh %535 : vector<2x32xf32>
    %537 = arith.mulf %532, %536 : vector<2x32xf32>
    %cst_103 = arith.constant dense<0.000000e+00> : vector<2x128xf32>
    %538 = tpu.matmul %497, %44, %cst_103 {dimension_numbers = #tpu.dot_dimension_numbers<[1], [0], [0], [1], [0, 0, 1, 1], [], []>} : vector<2x32xf32>, vector<32x128xf32>, vector<2x128xf32> -> vector<2x128xf32>
    %539 = vector.broadcast %46 : vector<1x128xf32> to vector<2x128xf32>
    %540 = arith.addf %538, %539 : vector<2x128xf32>
    %cst_104 = arith.constant dense<0.000000e+00> : vector<2x128xf32>
    %541 = tpu.matmul %518, %45, %cst_104 {dimension_numbers = #tpu.dot_dimension_numbers<[1], [0], [0], [1], [0, 0, 1, 1], [], []>} : vector<2x32xf32>, vector<32x128xf32>, vector<2x128xf32> -> vector<2x128xf32>
    %542 = arith.addf %540, %541 : vector<2x128xf32>
    %543 = math.tanh %542 : vector<2x128xf32>
    %544 = arith.negf %542 : vector<2x128xf32>
    %545 = math.exp %544 : vector<2x128xf32>
    %cst_105 = arith.constant 1.000000e+00 : f32
    %546 = vector.broadcast %cst_105 : f32 to vector<2x128xf32>
    %547 = arith.addf %546, %545 : vector<2x128xf32>
    %548 = arith.divf %546, %547 : vector<2x128xf32>
    %549 = arith.select %55, %543, %548 : vector<2x128xi1>, vector<2x128xf32>
    %550 = vector.extract_strided_slice %549 {offsets = [0, 0], sizes = [2, 32], strides = [1, 1]} : vector<2x128xf32> to vector<2x32xf32>
    %551 = vector.extract_strided_slice %549 {offsets = [0, 32], sizes = [2, 32], strides = [1, 1]} : vector<2x128xf32> to vector<2x32xf32>
    %552 = vector.extract_strided_slice %549 {offsets = [0, 64], sizes = [2, 32], strides = [1, 1]} : vector<2x128xf32> to vector<2x32xf32>
    %553 = vector.extract_strided_slice %549 {offsets = [0, 96], sizes = [2, 32], strides = [1, 1]} : vector<2x128xf32> to vector<2x32xf32>
    %554 = arith.mulf %551, %516 : vector<2x32xf32>
    %555 = arith.mulf %550, %552 : vector<2x32xf32>
    %556 = arith.addf %554, %555 : vector<2x32xf32>
    %557 = math.tanh %556 : vector<2x32xf32>
    %558 = arith.mulf %553, %557 : vector<2x32xf32>
    %559 = vector.extract_strided_slice %49 {offsets = [26, 0], sizes = [2, 128], strides = [1, 1]} : vector<32x128xf32> to vector<2x128xf32>
    %cst_106 = arith.constant dense<0.000000e+00> : vector<2x128xf32>
    %560 = tpu.matmul %537, %42, %cst_106 {dimension_numbers = #tpu.dot_dimension_numbers<[1], [0], [0], [1], [0, 0, 1, 1], [], []>} : vector<2x32xf32>, vector<32x128xf32>, vector<2x128xf32> -> vector<2x128xf32>
    %561 = arith.addf %559, %560 : vector<2x128xf32>
    %562 = math.tanh %561 : vector<2x128xf32>
    %563 = arith.negf %561 : vector<2x128xf32>
    %564 = math.exp %563 : vector<2x128xf32>
    %cst_107 = arith.constant 1.000000e+00 : f32
    %565 = vector.broadcast %cst_107 : f32 to vector<2x128xf32>
    %566 = arith.addf %565, %564 : vector<2x128xf32>
    %567 = arith.divf %565, %566 : vector<2x128xf32>
    %568 = arith.select %55, %562, %567 : vector<2x128xi1>, vector<2x128xf32>
    %569 = vector.extract_strided_slice %568 {offsets = [0, 0], sizes = [2, 32], strides = [1, 1]} : vector<2x128xf32> to vector<2x32xf32>
    %570 = vector.extract_strided_slice %568 {offsets = [0, 32], sizes = [2, 32], strides = [1, 1]} : vector<2x128xf32> to vector<2x32xf32>
    %571 = vector.extract_strided_slice %568 {offsets = [0, 64], sizes = [2, 32], strides = [1, 1]} : vector<2x128xf32> to vector<2x32xf32>
    %572 = vector.extract_strided_slice %568 {offsets = [0, 96], sizes = [2, 32], strides = [1, 1]} : vector<2x128xf32> to vector<2x32xf32>
    %573 = arith.mulf %570, %535 : vector<2x32xf32>
    %574 = arith.mulf %569, %571 : vector<2x32xf32>
    %575 = arith.addf %573, %574 : vector<2x32xf32>
    %576 = math.tanh %575 : vector<2x32xf32>
    %577 = arith.mulf %572, %576 : vector<2x32xf32>
    %cst_108 = arith.constant dense<0.000000e+00> : vector<2x128xf32>
    %578 = tpu.matmul %537, %44, %cst_108 {dimension_numbers = #tpu.dot_dimension_numbers<[1], [0], [0], [1], [0, 0, 1, 1], [], []>} : vector<2x32xf32>, vector<32x128xf32>, vector<2x128xf32> -> vector<2x128xf32>
    %579 = vector.broadcast %46 : vector<1x128xf32> to vector<2x128xf32>
    %580 = arith.addf %578, %579 : vector<2x128xf32>
    %cst_109 = arith.constant dense<0.000000e+00> : vector<2x128xf32>
    %581 = tpu.matmul %558, %45, %cst_109 {dimension_numbers = #tpu.dot_dimension_numbers<[1], [0], [0], [1], [0, 0, 1, 1], [], []>} : vector<2x32xf32>, vector<32x128xf32>, vector<2x128xf32> -> vector<2x128xf32>
    %582 = arith.addf %580, %581 : vector<2x128xf32>
    %583 = math.tanh %582 : vector<2x128xf32>
    %584 = arith.negf %582 : vector<2x128xf32>
    %585 = math.exp %584 : vector<2x128xf32>
    %cst_110 = arith.constant 1.000000e+00 : f32
    %586 = vector.broadcast %cst_110 : f32 to vector<2x128xf32>
    %587 = arith.addf %586, %585 : vector<2x128xf32>
    %588 = arith.divf %586, %587 : vector<2x128xf32>
    %589 = arith.select %55, %583, %588 : vector<2x128xi1>, vector<2x128xf32>
    %590 = vector.extract_strided_slice %589 {offsets = [0, 0], sizes = [2, 32], strides = [1, 1]} : vector<2x128xf32> to vector<2x32xf32>
    %591 = vector.extract_strided_slice %589 {offsets = [0, 32], sizes = [2, 32], strides = [1, 1]} : vector<2x128xf32> to vector<2x32xf32>
    %592 = vector.extract_strided_slice %589 {offsets = [0, 64], sizes = [2, 32], strides = [1, 1]} : vector<2x128xf32> to vector<2x32xf32>
    %593 = vector.extract_strided_slice %589 {offsets = [0, 96], sizes = [2, 32], strides = [1, 1]} : vector<2x128xf32> to vector<2x32xf32>
    %594 = arith.mulf %591, %556 : vector<2x32xf32>
    %595 = arith.mulf %590, %592 : vector<2x32xf32>
    %596 = arith.addf %594, %595 : vector<2x32xf32>
    %597 = math.tanh %596 : vector<2x32xf32>
    %598 = arith.mulf %593, %597 : vector<2x32xf32>
    %599 = vector.extract_strided_slice %49 {offsets = [28, 0], sizes = [2, 128], strides = [1, 1]} : vector<32x128xf32> to vector<2x128xf32>
    %cst_111 = arith.constant dense<0.000000e+00> : vector<2x128xf32>
    %600 = tpu.matmul %577, %42, %cst_111 {dimension_numbers = #tpu.dot_dimension_numbers<[1], [0], [0], [1], [0, 0, 1, 1], [], []>} : vector<2x32xf32>, vector<32x128xf32>, vector<2x128xf32> -> vector<2x128xf32>
    %601 = arith.addf %599, %600 : vector<2x128xf32>
    %602 = math.tanh %601 : vector<2x128xf32>
    %603 = arith.negf %601 : vector<2x128xf32>
    %604 = math.exp %603 : vector<2x128xf32>
    %cst_112 = arith.constant 1.000000e+00 : f32
    %605 = vector.broadcast %cst_112 : f32 to vector<2x128xf32>
    %606 = arith.addf %605, %604 : vector<2x128xf32>
    %607 = arith.divf %605, %606 : vector<2x128xf32>
    %608 = arith.select %55, %602, %607 : vector<2x128xi1>, vector<2x128xf32>
    %609 = vector.extract_strided_slice %608 {offsets = [0, 0], sizes = [2, 32], strides = [1, 1]} : vector<2x128xf32> to vector<2x32xf32>
    %610 = vector.extract_strided_slice %608 {offsets = [0, 32], sizes = [2, 32], strides = [1, 1]} : vector<2x128xf32> to vector<2x32xf32>
    %611 = vector.extract_strided_slice %608 {offsets = [0, 64], sizes = [2, 32], strides = [1, 1]} : vector<2x128xf32> to vector<2x32xf32>
    %612 = vector.extract_strided_slice %608 {offsets = [0, 96], sizes = [2, 32], strides = [1, 1]} : vector<2x128xf32> to vector<2x32xf32>
    %613 = arith.mulf %610, %575 : vector<2x32xf32>
    %614 = arith.mulf %609, %611 : vector<2x32xf32>
    %615 = arith.addf %613, %614 : vector<2x32xf32>
    %616 = math.tanh %615 : vector<2x32xf32>
    %617 = arith.mulf %612, %616 : vector<2x32xf32>
    %cst_113 = arith.constant dense<0.000000e+00> : vector<2x128xf32>
    %618 = tpu.matmul %577, %44, %cst_113 {dimension_numbers = #tpu.dot_dimension_numbers<[1], [0], [0], [1], [0, 0, 1, 1], [], []>} : vector<2x32xf32>, vector<32x128xf32>, vector<2x128xf32> -> vector<2x128xf32>
    %619 = vector.broadcast %46 : vector<1x128xf32> to vector<2x128xf32>
    %620 = arith.addf %618, %619 : vector<2x128xf32>
    %cst_114 = arith.constant dense<0.000000e+00> : vector<2x128xf32>
    %621 = tpu.matmul %598, %45, %cst_114 {dimension_numbers = #tpu.dot_dimension_numbers<[1], [0], [0], [1], [0, 0, 1, 1], [], []>} : vector<2x32xf32>, vector<32x128xf32>, vector<2x128xf32> -> vector<2x128xf32>
    %622 = arith.addf %620, %621 : vector<2x128xf32>
    %623 = math.tanh %622 : vector<2x128xf32>
    %624 = arith.negf %622 : vector<2x128xf32>
    %625 = math.exp %624 : vector<2x128xf32>
    %cst_115 = arith.constant 1.000000e+00 : f32
    %626 = vector.broadcast %cst_115 : f32 to vector<2x128xf32>
    %627 = arith.addf %626, %625 : vector<2x128xf32>
    %628 = arith.divf %626, %627 : vector<2x128xf32>
    %629 = arith.select %55, %623, %628 : vector<2x128xi1>, vector<2x128xf32>
    %630 = vector.extract_strided_slice %629 {offsets = [0, 0], sizes = [2, 32], strides = [1, 1]} : vector<2x128xf32> to vector<2x32xf32>
    %631 = vector.extract_strided_slice %629 {offsets = [0, 32], sizes = [2, 32], strides = [1, 1]} : vector<2x128xf32> to vector<2x32xf32>
    %632 = vector.extract_strided_slice %629 {offsets = [0, 64], sizes = [2, 32], strides = [1, 1]} : vector<2x128xf32> to vector<2x32xf32>
    %633 = vector.extract_strided_slice %629 {offsets = [0, 96], sizes = [2, 32], strides = [1, 1]} : vector<2x128xf32> to vector<2x32xf32>
    %634 = arith.mulf %631, %596 : vector<2x32xf32>
    %635 = arith.mulf %630, %632 : vector<2x32xf32>
    %636 = arith.addf %634, %635 : vector<2x32xf32>
    %637 = math.tanh %636 : vector<2x32xf32>
    %638 = arith.mulf %633, %637 : vector<2x32xf32>
    %639 = vector.extract_strided_slice %49 {offsets = [30, 0], sizes = [2, 128], strides = [1, 1]} : vector<32x128xf32> to vector<2x128xf32>
    %cst_116 = arith.constant dense<0.000000e+00> : vector<2x128xf32>
    %640 = tpu.matmul %617, %42, %cst_116 {dimension_numbers = #tpu.dot_dimension_numbers<[1], [0], [0], [1], [0, 0, 1, 1], [], []>} : vector<2x32xf32>, vector<32x128xf32>, vector<2x128xf32> -> vector<2x128xf32>
    %641 = arith.addf %639, %640 : vector<2x128xf32>
    %642 = math.tanh %641 : vector<2x128xf32>
    %643 = arith.negf %641 : vector<2x128xf32>
    %644 = math.exp %643 : vector<2x128xf32>
    %cst_117 = arith.constant 1.000000e+00 : f32
    %645 = vector.broadcast %cst_117 : f32 to vector<2x128xf32>
    %646 = arith.addf %645, %644 : vector<2x128xf32>
    %647 = arith.divf %645, %646 : vector<2x128xf32>
    %648 = arith.select %55, %642, %647 : vector<2x128xi1>, vector<2x128xf32>
    %649 = vector.extract_strided_slice %648 {offsets = [0, 0], sizes = [2, 32], strides = [1, 1]} : vector<2x128xf32> to vector<2x32xf32>
    %650 = vector.extract_strided_slice %648 {offsets = [0, 32], sizes = [2, 32], strides = [1, 1]} : vector<2x128xf32> to vector<2x32xf32>
    %651 = vector.extract_strided_slice %648 {offsets = [0, 64], sizes = [2, 32], strides = [1, 1]} : vector<2x128xf32> to vector<2x32xf32>
    %652 = vector.extract_strided_slice %648 {offsets = [0, 96], sizes = [2, 32], strides = [1, 1]} : vector<2x128xf32> to vector<2x32xf32>
    %653 = arith.mulf %650, %615 : vector<2x32xf32>
    %654 = arith.mulf %649, %651 : vector<2x32xf32>
    %655 = arith.addf %653, %654 : vector<2x32xf32>
    %656 = math.tanh %655 : vector<2x32xf32>
    %657 = arith.mulf %652, %656 : vector<2x32xf32>
    %cst_118 = arith.constant dense<0.000000e+00> : vector<2x128xf32>
    %658 = tpu.matmul %617, %44, %cst_118 {dimension_numbers = #tpu.dot_dimension_numbers<[1], [0], [0], [1], [0, 0, 1, 1], [], []>} : vector<2x32xf32>, vector<32x128xf32>, vector<2x128xf32> -> vector<2x128xf32>
    %659 = vector.broadcast %46 : vector<1x128xf32> to vector<2x128xf32>
    %660 = arith.addf %658, %659 : vector<2x128xf32>
    %cst_119 = arith.constant dense<0.000000e+00> : vector<2x128xf32>
    %661 = tpu.matmul %638, %45, %cst_119 {dimension_numbers = #tpu.dot_dimension_numbers<[1], [0], [0], [1], [0, 0, 1, 1], [], []>} : vector<2x32xf32>, vector<32x128xf32>, vector<2x128xf32> -> vector<2x128xf32>
    %662 = arith.addf %660, %661 : vector<2x128xf32>
    %663 = math.tanh %662 : vector<2x128xf32>
    %664 = arith.negf %662 : vector<2x128xf32>
    %665 = math.exp %664 : vector<2x128xf32>
    %cst_120 = arith.constant 1.000000e+00 : f32
    %666 = vector.broadcast %cst_120 : f32 to vector<2x128xf32>
    %667 = arith.addf %666, %665 : vector<2x128xf32>
    %668 = arith.divf %666, %667 : vector<2x128xf32>
    %669 = arith.select %55, %663, %668 : vector<2x128xi1>, vector<2x128xf32>
    %670 = vector.extract_strided_slice %669 {offsets = [0, 0], sizes = [2, 32], strides = [1, 1]} : vector<2x128xf32> to vector<2x32xf32>
    %671 = vector.extract_strided_slice %669 {offsets = [0, 32], sizes = [2, 32], strides = [1, 1]} : vector<2x128xf32> to vector<2x32xf32>
    %672 = vector.extract_strided_slice %669 {offsets = [0, 64], sizes = [2, 32], strides = [1, 1]} : vector<2x128xf32> to vector<2x32xf32>
    %673 = vector.extract_strided_slice %669 {offsets = [0, 96], sizes = [2, 32], strides = [1, 1]} : vector<2x128xf32> to vector<2x32xf32>
    %674 = arith.mulf %671, %636 : vector<2x32xf32>
    %675 = arith.mulf %670, %672 : vector<2x32xf32>
    %676 = arith.addf %674, %675 : vector<2x32xf32>
    %677 = math.tanh %676 : vector<2x32xf32>
    %678 = arith.mulf %673, %677 : vector<2x32xf32>
    %cst_121 = arith.constant dense<0.000000e+00> : vector<2x128xf32>
    %679 = tpu.matmul %657, %44, %cst_121 {dimension_numbers = #tpu.dot_dimension_numbers<[1], [0], [0], [1], [0, 0, 1, 1], [], []>} : vector<2x32xf32>, vector<32x128xf32>, vector<2x128xf32> -> vector<2x128xf32>
    %680 = vector.broadcast %46 : vector<1x128xf32> to vector<2x128xf32>
    %681 = arith.addf %679, %680 : vector<2x128xf32>
    %cst_122 = arith.constant dense<0.000000e+00> : vector<2x128xf32>
    %682 = tpu.matmul %678, %45, %cst_122 {dimension_numbers = #tpu.dot_dimension_numbers<[1], [0], [0], [1], [0, 0, 1, 1], [], []>} : vector<2x32xf32>, vector<32x128xf32>, vector<2x128xf32> -> vector<2x128xf32>
    %683 = arith.addf %681, %682 : vector<2x128xf32>
    %684 = math.tanh %683 : vector<2x128xf32>
    %685 = arith.negf %683 : vector<2x128xf32>
    %686 = math.exp %685 : vector<2x128xf32>
    %cst_123 = arith.constant 1.000000e+00 : f32
    %687 = vector.broadcast %cst_123 : f32 to vector<2x128xf32>
    %688 = arith.addf %687, %686 : vector<2x128xf32>
    %689 = arith.divf %687, %688 : vector<2x128xf32>
    %690 = arith.select %55, %684, %689 : vector<2x128xi1>, vector<2x128xf32>
    %691 = vector.extract_strided_slice %690 {offsets = [0, 0], sizes = [2, 32], strides = [1, 1]} : vector<2x128xf32> to vector<2x32xf32>
    %692 = vector.extract_strided_slice %690 {offsets = [0, 32], sizes = [2, 32], strides = [1, 1]} : vector<2x128xf32> to vector<2x32xf32>
    %693 = vector.extract_strided_slice %690 {offsets = [0, 64], sizes = [2, 32], strides = [1, 1]} : vector<2x128xf32> to vector<2x32xf32>
    %694 = vector.extract_strided_slice %690 {offsets = [0, 96], sizes = [2, 32], strides = [1, 1]} : vector<2x128xf32> to vector<2x32xf32>
    %695 = arith.mulf %692, %676 : vector<2x32xf32>
    %696 = arith.mulf %691, %693 : vector<2x32xf32>
    %697 = arith.addf %695, %696 : vector<2x32xf32>
    %698 = math.tanh %697 : vector<2x32xf32>
    %699 = arith.mulf %694, %698 : vector<2x32xf32>
    %700 = tpu.concatenate %118, %158, %198, %238, %278, %318, %358, %398, %438, %478, %518, %558, %598, %638, %678, %699 in 0 : vector<2x32xf32>, vector<2x32xf32>, vector<2x32xf32>, vector<2x32xf32>, vector<2x32xf32>, vector<2x32xf32>, vector<2x32xf32>, vector<2x32xf32>, vector<2x32xf32>, vector<2x32xf32>, vector<2x32xf32>, vector<2x32xf32>, vector<2x32xf32>, vector<2x32xf32>, vector<2x32xf32>, vector<2x32xf32> -> vector<32x32xf32>
    %c0_124 = arith.constant 0 : index
    %c0_125 = arith.constant 0 : index
    %701 = vector.load %arg11[%c0_124, %c0_125] : memref<32x128xf32, #tpu.memory_space<vmem>>, vector<32x128xf32>
    %cst_126 = arith.constant dense<0.000000e+00> : vector<32x128xf32>
    %702 = tpu.matmul %700, %701, %cst_126 {dimension_numbers = #tpu.dot_dimension_numbers<[1], [0], [0], [1], [0, 0, 1, 1], [], []>} : vector<32x32xf32>, vector<32x128xf32>, vector<32x128xf32> -> vector<32x128xf32>
    %c0_127 = arith.constant 0 : index
    %c0_128 = arith.constant 0 : index
    %703 = vector.load %arg12[%c0_127, %c0_128] : memref<1x128xf32, #tpu.memory_space<vmem>>, vector<1x128xf32>
    %704 = vector.broadcast %703 : vector<1x128xf32> to vector<32x128xf32>
    %705 = arith.addf %702, %704 : vector<32x128xf32>
    %c0_129 = arith.constant 0 : index
    %c0_130 = arith.constant 0 : index
    %706 = vector.load %arg13[%c0_129, %c0_130] : memref<32x128xf32, #tpu.memory_space<vmem>>, vector<32x128xf32>
    tpu.vector_store %arg13[%c0_129, %c0_130], %705 {strides = array<i32>} : memref<32x128xf32, #tpu.memory_space<vmem>>, vector<32x128xf32>,
    return
  }
}

</mosaic_0001>

<bundles_post_ra>
// kernel: lstm_model_forward.1
= control target key start
LH: loop header
LB: loop body
LE: loop exit
PB: predicated region body
PF: predicated region fallthrough
CT: control target
= control target key end

     0   :  { %vm71_vm0 = vcmask 1043456   ;;  %vm58_vm1 = vcmask 162816   ;;  %v6884_v23 = vmov 0.0   ;;  %vm195_vm2 = vcmask 523264   ;;  %s6886_s28 = smov 64   ;;  %s6887_s29 = smov 32   ;;  %s8366_s1 = inlined_call_operand.vmem [shape: f32[20,64], index: 1, kind: input, shape index: {}]   ;;  %s8367_s0 = inlined_call_operand.vmem [shape: f32[32,20], index: 0, kind: input, shape index: {}]   ;;  %s8368_s3 = inlined_call_operand.vmem [shape: f32[5,64,64], index: 3, kind: input, shape index: {}]   ;;  %s8369_s2 = inlined_call_operand.vmem [shape: f32[1,64], index: 2, kind: input, shape index: {}]   ;;  %s8370_s5 = inlined_call_operand.vmem [shape: f32[64,128], index: 5, kind: input, shape index: {}]   ;;  %s8371_s6 = inlined_call_operand.vmem [shape: f32[32,128], index: 6, kind: input, shape index: {}]   ;;  %s8372_s4 = inlined_call_operand.vmem [shape: f32[1,64], index: 4, kind: input, shape index: {}]   ;;  %s8373_s7 = inlined_call_operand.vmem [shape: f32[1,128], index: 7, kind: input, shape index: {}]   ;;  %s8374_s8 = inlined_call_operand.vmem [shape: f32[32,128], index: 8, kind: input, shape index: {}]   ;;  %s8375_s9 = inlined_call_operand.vmem [shape: f32[32,128], index: 9, kind: input, shape index: {}]   ;;  %s8376_s10 = inlined_call_operand.vmem [shape: f32[1,128], index: 10, kind: input, shape index: {}]   ;;  %s8377_s11 = inlined_call_operand.vmem [shape: f32[32,128], index: 11, kind: input, shape index: {}]   ;;  %s8378_s12 = inlined_call_operand.vmem [shape: f32[1,128], index: 12, kind: input, shape index: {}]   ;;  %s8379_s13 = inlined_call_operand.vmem [shape: f32[32,128], index: 13, kind: output, shape index: {}]  }
   0x1   :  { %v50_v0 = vld [vmem:[%s8366_s1 + $0x10] sm:$0xf]  ;;  %v49_v1 = vld [vmem:[%s8366_s1 + $0x8] sm:$0xff]  ;;  %v44_v2 = vld [vmem:[%s8367_s0] sm:$0xff]  ;;  %v7046_v35 = vrot.slane %v6884_v23, 4  ;;  %vm6885_vm3 = vmmov 0  }
   0x2   :  { %5911 = vmatprep.subr.msk.mxu0 %vm71_vm0, %v50_v0  ;;  %v48_v3 = vld [vmem:[%s8366_s1] sm:$0xff]  ;;  %5917 = vmatprep.mubr.msk.f32.mxu0 %vm58_vm1, %v44_v2  ;;  %v5451_v4 = vld [vmem:[%s8368_s3 + $0x78] sm:$0xff]  ;;  %v5450_v5 = vld [vmem:[%s8368_s3 + $0x70] sm:$0xff]  ;;  %vm826_vm7 = vcmask 261120   ;;  %vm5300_vm8 = vcmask 1041408   ;;  %vm5303_vm9 = vcmask 1045504  }
   0x3   :  { %5912 = vmatpush3.msk.msra.mxu0 %vm71_vm0, %v50_v0  ;;  %v45_v6 = vld [vmem:[%s8367_s0 + $0x8] sm:$0xff]  ;;  %v171_v7 = vld [vmem:[%s8368_s3 + $0x38] sm:$0xff]  ;;  %5923 = vmatprep.subr.mxu1 %v5451_v4  ;;  %v46_v8 = vld [vmem:[%s8367_s0 + $0x10] sm:$0xff] }
   0x4   :  { %5913 = vmatprep.subr.mxu0 %v49_v1  ;;  %5924 = vmatpush3.msra.mxu1 %v5451_v4  ;;  %v170_v9 = vld [vmem:[%s8368_s3 + $0x30] sm:$0xff]  ;;  %v5449_v10 = vld [vmem:[%s8368_s3 + $0x68] sm:$0xff]  ;;  %v47_v11 = vld [vmem:[%s8367_s0 + $0x18] sm:$0xff] }
   0x5   :  { %5914 = vmatpush3.msra.mxu0 %v49_v1  ;;  %5925 = vmatprep.subr.mxu1 %v5450_v5  ;;  %v169_v12 = vld [vmem:[%s8368_s3 + $0x28] sm:$0xff]  ;;  %v168_v13 = vld [vmem:[%s8368_s3 + $0x20] sm:$0xff]  ;;  %v167_v14 = vld [vmem:[%s8368_s3 + $0x18] sm:$0xff] }
   0x6   :  { %5915 = vmatprep.subr.mxu0 %v48_v3  ;;  %5926 = vmatpush3.msra.mxu1 %v5450_v5  ;;  %v5448_v15 = vld [vmem:[%s8368_s3 + $0x60] sm:$0xff]  ;;  %v166_v16 = vld [vmem:[%s8368_s3 + $0x10] sm:$0xff]  ;;  %v5447_v17 = vld [vmem:[%s8368_s3 + $0x58] sm:$0xff] }
   0x7   :  { %5916 = vmatpush3.msra.mxu0 %v48_v3  ;;  %5927 = vmatprep.subr.mxu1 %v5449_v10  ;;  %v165_v18 = vld [vmem:[%s8368_s3 + $0x8] sm:$0xff]  ;;  %v5446_v19 = vld [vmem:[%s8368_s3 + $0x50] sm:$0xff]  ;;  %v164_v20 = vld [vmem:[%s8368_s3] sm:$0xff] }
   0x8   :  { %5918 = vmatmul.mubr.msk.f32.vlgmr.msra.gmra.mxu0 %vm58_vm1, %v45_v6  ;;  %5945 = vmatprep.subr.mxu0 %v171_v7  ;;  %v5445_v21 = vld [vmem:[%s8368_s3 + $0x48] sm:$0xff]  ;;  %v5478_v22 = vld [vmem:[%s8368_s3 + $0xf8] sm:$0xff]  ;;  %v5444_v24 = vld [vmem:[%s8368_s3 + $0x40] sm:$0xff] }
   0x9   :  { %5920 = vmatprep.mubr.msk.f32.mxu0 %vm58_vm1, %v46_v8  ;;  %5946 = vmatpush3.msra.mxu0 %v171_v7  ;;  %v5466_v25 = vld [vmem:[%s8368_s3 + $0xb8] sm:$0xff]  ;;  %v5438_v26 = vld [vmem:[%s8369_s2] ss:$0 sm:$0xff]  ;;  %v5477_v37 = vld [vmem:[%s8368_s3 + $0xf0] sm:$0xff] }
   0xa   :  { %5947 = vmatprep.subr.mxu0 %v170_v9  ;;  %5928 = vmatpush3.msra.mxu1 %v5449_v10  ;;  %v5476_v42 = vld [vmem:[%s8368_s3 + $0xe8] sm:$0xff]  ;;  %v5465_v47 = vld [vmem:[%s8368_s3 + $0xb0] sm:$0xff]  ;;  %v5475_v48 = vld [vmem:[%s8368_s3 + $0xe0] sm:$0xff] }
   0xb   :  { %5948 = vmatpush3.msra.mxu0 %v170_v9  ;;  %5929 = vmatprep.subr.mxu1 %v5448_v15  ;;  %v5464_v51 = vld [vmem:[%s8368_s3 + $0xa8] sm:$0xff]  ;;  %v5474_v52 = vld [vmem:[%s8368_s3 + $0xd8] sm:$0xff]  ;;  %v5463_v54 = vld [vmem:[%s8368_s3 + $0xa0] sm:$0xff] }
   0xc   :  { %5921 = vmatmul.mubr.msk.f32.gmra.mxu0 %vm58_vm1, %v47_v11  ;;  %5949 = vmatprep.subr.mxu0 %v169_v12  ;;  %v5473_v55 = vld [vmem:[%s8368_s3 + $0xd0] sm:$0xff]  ;;  %v5462_v56 = vld [vmem:[%s8368_s3 + $0x98] sm:$0xff]  ;;  %v5472_v57 = vld [vmem:[%s8368_s3 + $0xc8] sm:$0xff] }
   0xd   :  { %5950 = vmatpush3.msra.mxu0 %v169_v12  ;;  %5930 = vmatpush3.msra.mxu1 %v5448_v15  ;;  %v5461_v58 = vld [vmem:[%s8368_s3 + $0x90] sm:$0xff]  ;;  %v5471_v59 = vld [vmem:[%s8368_s3 + $0xc0] sm:$0xff]  ;;  %v5460_v60 = vld [vmem:[%s8368_s3 + $0x88] sm:$0xff] }
   0xe   :  { %5951 = vmatprep.subr.mxu0 %v168_v13  ;;  %5931 = vmatprep.subr.mxu1 %v5447_v17  ;;  %v5459_v61 = vld [vmem:[%s8368_s3 + $0x80] sm:$0xff]  ;;  %v5490_v62 = vld [vmem:[%s8368_s3 + $0x138] sm:$0xff]  ;;  %v5489_v0 = vld [vmem:[%s8368_s3 + $0x130] sm:$0xff] }
   0xf   :  { %5952 = vmatpush3.msra.mxu0 %v168_v13  ;;  %5932 = vmatpush3.msra.mxu1 %v5447_v17  ;;  %v5488_v1 = vld [vmem:[%s8368_s3 + $0x128] sm:$0xff]  ;;  %v5487_v2 = vld [vmem:[%s8368_s3 + $0x120] sm:$0xff]  ;;  %v5486_v3 = vld [vmem:[%s8368_s3 + $0x118] sm:$0xff] }
  0x10   :  { %5953 = vmatprep.subr.mxu0 %v167_v14  ;;  %5933 = vmatprep.subr.mxu1 %v5446_v19  ;;  %v5485_v4 = vld [vmem:[%s8368_s3 + $0x110] sm:$0xff]  ;;  %v5484_v5 = vld [vmem:[%s8368_s3 + $0x108] sm:$0xff]  ;;  %v5483_v6 = vld [vmem:[%s8368_s3 + $0x100] sm:$0xff] }
  0x11   :  { %5954 = vmatpush3.msra.mxu0 %v167_v14  ;;  %5934 = vmatpush3.msra.mxu1 %v5446_v19  ;;  %v703_v7 = vld [vmem:[%s8370_s5 + $0x38] sm:$0xff]  ;;  %v702_v8 = vld [vmem:[%s8370_s5 + $0x30] sm:$0xff]  ;;  %v701_v9 = vld [vmem:[%s8370_s5 + $0x28] sm:$0xff] }
  0x12   :  { %5955 = vmatprep.subr.mxu0 %v166_v16  ;;  %5935 = vmatprep.subr.mxu1 %v5445_v21  ;;  %v700_v10 = vld [vmem:[%s8370_s5 + $0x20] sm:$0xff]  ;;  %v699_v11 = vld [vmem:[%s8370_s5 + $0x18] sm:$0xff]  ;;  %v698_v12 = vld [vmem:[%s8370_s5 + $0x10] sm:$0xff] }
  0x13   :  { %5956 = vmatpush3.msra.mxu0 %v166_v16  ;;  %5961 = vmatprep.mubr.f32.mxu0 %v6884_v23  ;;  %v7177_v13 = vld [vmem:[%s8371_s6 + $0x18] sm:$0xff]  ;;  %v697_v14 = vld [vmem:[%s8370_s5 + $0x8] sm:$0xff]  ;;  %v7187_v15 = vld [vmem:[%s8371_s6 + $0x10] sm:$0xff] }
  0x14   :  { %5957 = vmatprep.subr.mxu0 %v165_v18  ;;  %5936 = vmatpush3.msra.mxu1 %v5445_v21  ;;  %v696_v16 = vld [vmem:[%s8370_s5] sm:$0xff]  ;;  %v7197_v17 = vld [vmem:[%s8371_s6 + $0x8] sm:$0xff] }
  0x15   :  { %5958 = vmatpush3.msra.mxu0 %v165_v18  ;;  %5937 = vmatprep.subr.mxu1 %v5444_v24  ;;  %v7204_v18 = vld [vmem:[%s8371_s6] sm:$0xff] }
  0x16   :  { %5959 = vmatprep.subr.mxu0 %v164_v20  ;;  %5938 = vmatpush3.msra.mxu1 %v5444_v24 }
  0x17   :  { %5960 = vmatpush3.msra.mxu0 %v164_v20  ;;  %5967 = vmatprep.subr.mxu1 %v5466_v25 }
  0x18   :  { %5989 = vmatprep.subr.mxu0 %v5478_v22 }
  0xc8   :  { %v5919_v27 = vpop.f32.mrf.mxu0 }
  0xc9   :  { %v147_v28 = vadd.f32 %v5919_v27, %v5438_v26 }
  0xca   :  { %v141_v29 = vpop.f32.mrf.mxu0 }
  0xcb   :  { %v7043_v30 = vmax.f32 %v147_v28, 0.0  ;;  %v142_v31 = vadd.f32 %v5438_v26, %v141_v29 }
  0xcc   :  { %v5922_v32 = vpop.f32.mrf.mxu0 }
  0xcd   :  { %v160_v33 = vmax.f32 %v142_v31, 0.0  ;;  %v157_v34 = vadd.f32 %v5922_v32, %v5438_v26  ;;  %v189_v41 = vrot.slane %v7043_v30, 4 }
  0xce   :  { %v151_v36 = vpop.f32.mrf.mxu0 }
  0xcf   :  { %v7051_v38 = vmax.f32 %v157_v34, 0.0  ;;  %v152_v39 = vadd.f32 %v5438_v26, %v151_v36  ;;  %5962 = vmatmul.mubr.msk.f32.vlgmr.msra.gmra.mxu0 %vm195_vm2, %v160_v33  ;;  %v187_v40 = vrot.slane %v160_v33, 4 }
  0xd0   :  { %5990 = vmatpush3.msra.mxu0 %v5478_v22  ;;  %5964 = vmatprep.mubr.msk.f32.mxu0 %vm195_vm2, %v7043_v30 }
  0xd1   :  { %v7060_v43 = vmax.f32 %v152_v39, 0.0  ;;  %5991 = vmatprep.subr.mxu0 %v5477_v37  ;;  %v188_v44 = vsel %vm71_vm0, %v7046_v35, %v187_v40  ;;  %v190_v45 = vsel %vm71_vm0, %v187_v40, %v189_v41  ;;  %v193_v46 = vrot.slane %v7051_v38, 4 }
  0xd2   :  { %5992 = vmatpush3.msra.mxu0 %v5477_v37  ;;  %5939 = vmatprep.mubr.msk.f32.mxu1 %vm195_vm2, %v188_v44 }
  0xd3   :  { %5993 = vmatprep.subr.mxu0 %v5476_v42  ;;  %5940 = vmatmul.mubr.msk.f32.vlgmr.msra.gmra.mxu1 %vm195_vm2, %v190_v45  ;;  %v191_v49 = vrot.slane %v7060_v43, 4  ;;  %v491_v63 = vsel %vm71_vm0, %v193_v46, %v7046_v35 }
  0xd4   :  { %5965 = vmatmul.mubr.msk.f32.gmra.mxu0 %vm195_vm2, %v7060_v43  ;;  %5968 = vmatpush3.msra.mxu1 %v5466_v25 }
  0xd5   :  { %5994 = vmatpush3.msra.mxu0 %v5476_v42  ;;  %5969 = vmatprep.subr.mxu1 %v5465_v47  ;;  %v192_v50 = vsel %vm71_vm0, %v189_v41, %v191_v49  ;;  %v194_v53 = vsel %vm71_vm0, %v191_v49, %v193_v46  ;;  %v5494_v46 = vld [vmem:[%s8372_s4] ss:$0 sm:$0xff] }
  0xd6   :  { %5995 = vmatprep.subr.mxu0 %v5475_v48  ;;  %6005 = vmatprep.mubr.msk.f32.mxu0 %vm195_vm2, %v190_v45 }
  0xd7   :  { %5970 = vmatpush3.msra.mxu1 %v5465_v47  ;;  %5996 = vmatpush3.msra.mxu0 %v5475_v48 }
  0xd8   :  { %5942 = vmatprep.mubr.msk.f32.mxu1 %vm195_vm2, %v192_v50  ;;  %5971 = vmatprep.subr.mxu1 %v5464_v51 }
  0xd9   :  { %5997 = vmatprep.subr.mxu0 %v5474_v52  ;;  %5943 = vmatmul.mubr.msk.f32.gmra.mxu1 %vm195_vm2, %v194_v53 }
  0xda   :  { %5972 = vmatpush3.msra.mxu1 %v5464_v51  ;;  %5998 = vmatpush3.msra.mxu0 %v5474_v52 }
  0xdb   :  { %5973 = vmatprep.subr.mxu1 %v5463_v54  ;;  %5983 = vmatprep.mubr.msk.f32.mxu1 %vm195_vm2, %v160_v33 }
  0xdc   :  { %5999 = vmatprep.subr.mxu0 %v5473_v55  ;;  %5974 = vmatpush3.msra.mxu1 %v5463_v54 }
  0xdd   :  { %6000 = vmatpush3.msra.mxu0 %v5473_v55  ;;  %5975 = vmatprep.subr.mxu1 %v5462_v56 }
  0xde   :  { %6001 = vmatprep.subr.mxu0 %v5472_v57  ;;  %5976 = vmatpush3.msra.mxu1 %v5462_v56 }
  0xdf   :  { %6002 = vmatpush3.msra.mxu0 %v5472_v57  ;;  %5977 = vmatprep.subr.mxu1 %v5461_v58 }
  0xe0   :  { %6003 = vmatprep.subr.mxu0 %v5471_v59  ;;  %5978 = vmatpush3.msra.mxu1 %v5461_v58 }
  0xe1   :  { %6004 = vmatpush3.msra.mxu0 %v5471_v59  ;;  %5979 = vmatprep.subr.mxu1 %v5460_v60 }
  0xe2   :  { %6006 = vmatmul.mubr.msk.f32.vlgmr.msra.gmra.mxu0 %vm195_vm2, %v192_v50  ;;  %5980 = vmatpush3.msra.mxu1 %v5460_v60 }
  0xe3   :  { %6008 = vmatprep.mubr.msk.f32.mxu0 %vm195_vm2, %v194_v53  ;;  %5981 = vmatprep.subr.mxu1 %v5459_v61 }
  0xe4   :  { %5982 = vmatpush3.msra.mxu1 %v5459_v61  ;;  %6033 = vmatprep.subr.mxu0 %v703_v7 }
  0xe5   :  { %5984 = vmatmul.mubr.msk.f32.vlgmr.msra.gmra.mxu1 %vm195_vm2, %v7043_v30  ;;  %6011 = vmatprep.subr.mxu1 %v5490_v62 }
  0xe6   :  { %6009 = vmatmul.mubr.msk.f32.gmra.mxu0 %vm195_vm2, %v491_v63  ;;  %5986 = vmatprep.mubr.msk.f32.mxu1 %vm195_vm2, %v7060_v43 }
  0xe7   :  { %6012 = vmatpush3.msra.mxu1 %v5490_v62  ;;  %6034 = vmatpush3.msra.mxu0 %v703_v7 }
  0xe8   :  { %6013 = vmatprep.subr.mxu1 %v5489_v0  ;;  %6035 = vmatprep.subr.mxu0 %v702_v8 }
  0xe9   :  { %6014 = vmatpush3.msra.mxu1 %v5489_v0  ;;  %6036 = vmatpush3.msra.mxu0 %v702_v8 }
  0xea   :  { %5987 = vmatmul.mubr.msk.f32.gmra.mxu1 %vm195_vm2, %v7051_v38  ;;  %6015 = vmatprep.subr.mxu1 %v5488_v1 }
  0xeb   :  { %6016 = vmatpush3.msra.mxu1 %v5488_v1  ;;  %6027 = vmatprep.mubr.msk.f32.mxu1 %vm195_vm2, %v7043_v30 }
  0xec   :  { %6017 = vmatprep.subr.mxu1 %v5487_v2  ;;  %6037 = vmatprep.subr.mxu0 %v701_v9 }
  0xed   :  { %6018 = vmatpush3.msra.mxu1 %v5487_v2  ;;  %6038 = vmatpush3.msra.mxu0 %v701_v9 }
  0xee   :  { %6019 = vmatprep.subr.mxu1 %v5486_v3  ;;  %6039 = vmatprep.subr.mxu0 %v700_v10 }
  0xef   :  { %6020 = vmatpush3.msra.mxu1 %v5486_v3  ;;  %6040 = vmatpush3.msra.mxu0 %v700_v10  ;;  %v5495_v3 = vld [vmem:[%s8373_s7] ss:$0 sm:$0xff] }
  0xf0   :  { %6021 = vmatprep.subr.mxu1 %v5485_v4  ;;  %6041 = vmatprep.subr.mxu0 %v699_v11 }
  0xf1   :  { %6022 = vmatpush3.msra.mxu1 %v5485_v4  ;;  %6042 = vmatpush3.msra.mxu0 %v699_v11 }
  0xf2   :  { %6023 = vmatprep.subr.mxu1 %v5484_v5  ;;  %6043 = vmatprep.subr.mxu0 %v698_v12 }
  0xf3   :  { %6024 = vmatpush3.msra.mxu1 %v5484_v5  ;;  %6044 = vmatpush3.msra.mxu0 %v698_v12 }
  0xf4   :  { %6025 = vmatprep.subr.mxu1 %v5483_v6  ;;  %6045 = vmatprep.subr.mxu0 %v697_v14 }
  0xf5   :  { %6026 = vmatpush3.msra.mxu1 %v5483_v6  ;;  %6046 = vmatpush3.msra.mxu0 %v697_v14 }
  0xf6   :  { %6028 = vmatmul.mubr.msk.f32.vlgmr.msra.gmra.mxu1 %vm195_vm2, %v7060_v43  ;;  %6055 = vmatprep.subr.mxu1 %v6884_v23 }
  0xf7   :  { %6030 = vmatprep.mubr.msk.f32.mxu1 %vm195_vm2, %v7051_v38  ;;  %6056 = vmatpush3.msra.mxu1 %v7177_v13 }
  0xf8   :  { %6057 = vmatprep.subr.mxu1 %v6884_v23  ;;  %6047 = vmatprep.subr.mxu0 %v696_v16 }
  0xf9   :  { %6058 = vmatpush3.msra.mxu1 %v7187_v15  ;;  %6048 = vmatpush3.msra.mxu0 %v696_v16  ;;  %v821_v16 = vlaneseq }
  0xfa   :  { %6031 = vmatmul.mubr.f32.gmra.mxu1 %v6884_v23  ;;  %6059 = vmatprep.subr.mxu1 %v6884_v23 }
  0xfb   :  { %6060 = vmatpush3.msra.mxu1 %v7197_v17  ;;  %6066 = vmatprep.subr.mxu0 %v6884_v23 }
  0xfc   :  { %6061 = vmatprep.subr.mxu1 %v6884_v23  ;;  %6063 = vmatprep.mubr.msk.f32.mxu1 %vm6885_vm3, %v6884_v23 }
  0xfd   :  { %6062 = vmatpush3.msra.mxu1 %v7204_v18 }
  0xfe   :  { %6064 = vmatmul.mubr.f32.vlgmr.msra.gmra.mxu1 %v6884_v23  ;;  %6077 = vmatprep.subr.mxu1 %v6884_v23 }
  0xff   :  { %6085 = vmatprep.mubr.msk.f32.mxu1 %vm6885_vm3, %v6884_v23 }
 0x18f   :  { %v5963_v21 = vpop.f32.mrf.mxu0 }
 0x191   :  { %v363_v24 = vpop.f32.mrf.mxu0 }
 0x193   :  { %v5941_v19 = vpop.f32.mrf.mxu1 }
 0x194   :  { %v5966_v26 = vpop.f32.mrf.mxu0  ;;  %v369_v31 = vadd.f32 %v5963_v21, %v5941_v19  ;;  %v822_v19 = vand.u32 127, %v821_v16 }
 0x195   :  { %v270_v20 = vpop.f32.mrf.mxu1 }
 0x196   :  { %v373_v28 = vpop.f32.mrf.mxu0  ;;  %v364_v33 = vadd.f32 %v363_v24, %v270_v20  ;;  %vm823_vm4 = vcmp.ge.s32.totalorder %v822_v19, 64  ;;  %vm824_vm5 = vcmp.lt.s32.totalorder %v822_v19, 96  ;;  %v5316_v20 = vld [vmem:[%s8377_s11 + $0x10] sm:$0xff] }
 0x197   :  { %vm7241_vm6 = vmand %vm823_vm4, %vm824_vm5 }
 0x199   :  { %v5944_v22 = vpop.f32.mrf.mxu1 }
 0x19a   :  { %v379_v36 = vadd.f32 %v5966_v26, %v5944_v22 }
 0x19b   :  { %v280_v25 = vpop.f32.mrf.mxu1 }
 0x19c   :  { %v374_v39 = vadd.f32 %v373_v28, %v280_v25 }
 0x1a2   :  { %v6007_v30 = vpop.f32.mrf.mxu0 }
 0x1a4   :  { %v560_v35 = vpop.f32.mrf.mxu0 }
 0x1a5   :  { %v5985_v27 = vpop.f32.mrf.mxu1 }
 0x1a6   :  { %v479_v34 = vadd.f32 %v5985_v27, %v369_v31  ;;  %v6010_v42 = vpop.f32.mrf.mxu0  ;;  %v7260_v31 = vld [vmem:[%s8374_s8 + $0x10] sm:$0xff] }
 0x1a7   :  { %v459_v29 = vpop.f32.mrf.mxu1 }
 0x1a8   :  { %v478_v37 = vadd.f32 %v459_v29, %v364_v33  ;;  %v580_v41 = vadd.f32 %v6007_v30, %v479_v34  ;;  %v570_v51 = vpop.f32.mrf.mxu0  ;;  %v7255_v30 = vld [vmem:[%s8374_s8 + $0x18] sm:$0xff]  ;;  %v7274_v33 = vld [vmem:[%s8374_s8] sm:$0xff] }
 0x1a9   :  { %6078 = vmatpush3.msra.mxu1 %v7255_v30 }
 0x1aa   :  { %v5988_v32 = vpop.f32.mrf.mxu1  ;;  %v579_v47 = vadd.f32 %v560_v35, %v478_v37  ;;  %6079 = vmatprep.subr.mxu1 %v6884_v23  ;;  %v7285_v37 = vld [vmem:[%s8375_s9 + $0x18] sm:$0xff] }
 0x1ab   :  { %v481_v40 = vadd.f32 %v5988_v32, %v379_v36  ;;  %v7267_v32 = vld [vmem:[%s8374_s8 + $0x8] sm:$0xff]  ;;  %6080 = vmatpush3.msra.mxu1 %v7260_v31 }
 0x1ac   :  { %v469_v38 = vpop.f32.mrf.mxu1  ;;  %6081 = vmatprep.subr.mxu1 %v6884_v23 }
 0x1ad   :  { %v480_v44 = vadd.f32 %v469_v38, %v374_v39  ;;  %v582_v50 = vadd.f32 %v6010_v42, %v481_v40  ;;  %6082 = vmatpush3.msra.mxu1 %v7267_v32  ;;  %v7292_v39 = vld [vmem:[%s8375_s9 + $0x10] sm:$0xff]  ;;  %v7301_v40 = vld [vmem:[%s8375_s9 + $0x8] sm:$0xff] }
 0x1ae   :  { %6083 = vmatprep.subr.mxu1 %v6884_v23 }
 0x1af   :  { %v581_v56 = vadd.f32 %v570_v51, %v480_v44  ;;  %6084 = vmatpush3.msra.mxu1 %v7274_v33 }
 0x1b0   :  { %6099 = vmatprep.subr.mxu1 %v6884_v23 }
 0x1b6   :  { %v6029_v43 = vpop.f32.mrf.mxu1 }
 0x1b7   :  { %v678_v45 = vadd.f32 %v6029_v43, %v580_v41  ;;  %v7310_v41 = vld [vmem:[%s8375_s9] sm:$0xff] }
 0x1b8   :  { %v658_v48 = vpop.f32.mrf.mxu1 }
 0x1b9   :  { %v677_v49 = vadd.f32 %v658_v48, %v579_v47  ;;  %v689_v52 = vadd.f32 %v5494_v46, %v678_v45 }
 0x1ba   :  { %v6032_v53 = vpop.f32.mrf.mxu1 }
 0x1bb   :  { %v688_v54 = vadd.f32 %v5494_v46, %v677_v49  ;;  %v680_v55 = vadd.f32 %v6032_v53, %v582_v50  ;;  %v693_v60 = vmax.f32 %v689_v52, 0.0  ;;  %v7341_v49 = vld [vmem:[%s8376_s10] ss:$0 sm:$0xff] }
 0x1bc   :  { %v668_v57 = vpop.f32.mrf.mxu1 }
 0x1bd   :  { %v692_v58 = vmax.f32 %v688_v54, 0.0  ;;  %v679_v59 = vadd.f32 %v668_v57, %v581_v56  ;;  %v691_v61 = vadd.f32 %v5494_v46, %v680_v55 }
 0x1be   :  { %v895_v1 = vpop.f32.mrf.mxu1 }
 0x1bf   :  { %v690_v62 = vadd.f32 %v5494_v46, %v679_v59  ;;  %6049 = vmatprep.mubr.msk.f32.mxu0 %vm195_vm2, %v692_v58  ;;  %v695_v0 = vmax.f32 %v691_v61, 0.0 }
 0x1c0   :  { %6050 = vmatmul.mubr.msk.f32.vlgmr.msra.gmra.mxu0 %vm195_vm2, %v693_v60  ;;  %v6065_v2 = vpop.f32.mrf.mxu1 }
 0x1c1   :  { %v694_v63 = vmax.f32 %v690_v62, 0.0  ;;  %6067 = vmatpush3.msra.mxu0 %v7177_v13 }
 0x1c2   :  { %6068 = vmatprep.subr.mxu0 %v6884_v23 }
 0x1c3   :  { %6052 = vmatprep.mubr.msk.f32.mxu0 %vm195_vm2, %v694_v63  ;;  %6069 = vmatpush3.msra.mxu0 %v7187_v15 }
 0x1c4   :  { %6053 = vmatmul.mubr.msk.f32.gmra.mxu0 %vm195_vm2, %v695_v0  ;;  %6070 = vmatprep.subr.mxu0 %v6884_v23 }
 0x1c5   :  { %6071 = vmatpush3.msra.mxu0 %v7197_v17  ;;  %6074 = vmatprep.mubr.msk.f32.mxu0 %vm6885_vm3, %v6884_v23 }
 0x1c6   :  { %6072 = vmatprep.subr.mxu0 %v6884_v23 }
 0x1c7   :  { %6073 = vmatpush3.msra.mxu0 %v7204_v18 }
 0x1c8   :  { %6088 = vmatprep.subr.mxu0 %v6884_v23 }
 0x280   :  { %v6051_v4 = vpop.f32.mrf.mxu0 }
 0x281   :  { %v7234_v5 = vadd.f32 %v6051_v4, %v5495_v3 }
 0x282   :  { %v802_v6 = vpop.f32.mrf.mxu0 }
 0x283   :  { %v7236_v7 = vadd.f32 %v5495_v3, %v802_v6 }
 0x284   :  { %v6054_v8 = vpop.f32.mrf.mxu0 }
 0x285   :  { %v899_v9 = vadd.f32 %v895_v1, %v7236_v7  ;;  %v7239_v10 = vadd.f32 %v6054_v8, %v5495_v3 }
 0x286   :  { %v7335_v42 = vpop.f32.mrf.mxu0 }
 0x287   :  { %v5500_v11 = vmul.f32 -1.442695, %v899_v9 }
 0x289   :  { %6601 = vpow2.f32 %v5500_v11 }
 0x28a   :  { %6603 = vtanh.f32 %v899_v9 }
 0x296   :  { %v6602_v12 = vpop.eup %6601 }
 0x297   :  { %v904_v14 = vadd.f32 1.0, %v6602_v12  ;;  %v6604_v21 = vpop.eup %6603 }
 0x299   :  { %6605 = vrcp.f32 %v904_v14 }
 0x2a6   :  { %v6606_v22 = vpop.eup %6605 }
 0x2a7   :  { %v907_v24 = vsel %vm7241_vm6, %v6604_v21, %v6606_v22 }
 0x2a8   :  { %910 = vrot.lane.b32.xlu0 %v907_v24, %s6886_s28  ;;  %v908_v27 = vmul.f32 0.0, %v907_v24 }
 0x31a   :  { %v911_v25 = vpop.permute.xlu0 %910 }
 0x31b   :  { %v913_v26 = vmul.f32 %v911_v25, %v907_v24 }
 0x31d   :  { %915 = vrot.lane.b32.xlu0 %v913_v26, %s6887_s29 }
 0x38f   :  { %v916_v28 = vpop.permute.xlu0 %915 }
 0x390   :  { %v7249_v29 = vadd.f32 %v916_v28, %v908_v27 }
 0x392   :  { %6607 = vtanh.f32 %v7249_v29  ;;  %v1013_v8 = vrot.slane %v7249_v29, 6 }
 0x39f   :  { %v6608_v34 = vpop.eup %6607 }
 0x3a0   :  { %921 = vrot.lane.b32.xlu1 %v6608_v34, %s6886_s28 }
 0x412   :  { %v922_v35 = vpop.permute.xlu1 %921 }
 0x413   :  { %v924_v36 = vmul.f32 %v922_v35, %v907_v24 }
 0x415   :  { %926 = vrot.lane.b32.xlu1 %v924_v36, %s6887_s29 }
 0x487   :  { %v927_v38 = vpop.permute.xlu1 %926 }
 0x488   :  { %6075 = vmatmul.mubr.msk.f32.vlgmr.msra.gmra.mxu0 %vm826_vm7, %v927_v38  ;;  %6086 = vmatmul.mubr.msk.f32.vlgmr.msra.gmra.mxu1 %vm826_vm7, %v927_v38 }
 0x489   :  { %6089 = vmatpush3.msra.mxu0 %v7285_v37  ;;  %6096 = vmatprep.mubr.msk.f32.mxu0 %vm6885_vm3, %v6884_v23 }
 0x48a   :  { %6090 = vmatprep.subr.mxu0 %v6884_v23  ;;  %6100 = vmatpush3.msra.mxu1 %v7177_v13 }
 0x48b   :  { %6091 = vmatpush3.msra.mxu0 %v7292_v39  ;;  %6101 = vmatprep.subr.mxu1 %v6884_v23 }
 0x48c   :  { %6092 = vmatprep.subr.mxu0 %v6884_v23  ;;  %6102 = vmatpush3.msra.mxu1 %v7187_v15 }
 0x48d   :  { %6093 = vmatpush3.msra.mxu0 %v7301_v40  ;;  %6103 = vmatprep.subr.mxu1 %v6884_v23 }
 0x48e   :  { %6094 = vmatprep.subr.mxu0 %v6884_v23  ;;  %6104 = vmatpush3.msra.mxu1 %v7197_v17 }
 0x48f   :  { %6095 = vmatpush3.msra.mxu0 %v7310_v41  ;;  %6105 = vmatprep.subr.mxu1 %v6884_v23 }
 0x490   :  { %6097 = vmatmul.mubr.f32.vlgmr.msra.gmra.mxu0 %v6884_v23  ;;  %6110 = vmatprep.subr.mxu0 %v6884_v23 }
 0x491   :  { %6111 = vmatpush3.msra.mxu0 %v7255_v30  ;;  %6106 = vmatpush3.msra.mxu1 %v7204_v18 }
 0x492   :  { %6112 = vmatprep.subr.mxu0 %v6884_v23  ;;  %6107 = vmatprep.mubr.msk.f32.mxu1 %vm6885_vm3, %v6884_v23 }
 0x493   :  { %6113 = vmatpush3.msra.mxu0 %v7260_v31  ;;  %6118 = vmatprep.mubr.msk.f32.mxu0 %vm6885_vm3, %v6884_v23 }
 0x494   :  { %6114 = vmatprep.subr.mxu0 %v6884_v23  ;;  %6121 = vmatprep.subr.mxu1 %v6884_v23 }
 0x495   :  { %6115 = vmatpush3.msra.mxu0 %v7267_v32 }
 0x496   :  { %6116 = vmatprep.subr.mxu0 %v6884_v23 }
 0x497   :  { %6117 = vmatpush3.msra.mxu0 %v7274_v33 }
 0x498   :  { %6132 = vmatprep.subr.mxu0 %v6884_v23 }
 0x548   :  { %v996_v43 = vpop.f32.mrf.mxu0  ;;  %v1104_v44 = vpop.f32.mrf.mxu1 }
 0x549   :  { %v1001_v45 = vrot.slane %v996_v43, 6  ;;  %v1105_v51 = vadd.f32 %v7341_v49, %v1104_v44 }
 0x54a   :  { %v6076_v46 = vpop.f32.mrf.mxu0  ;;  %v6087_v47 = vpop.f32.mrf.mxu1 }
 0x54b   :  { %v1003_v48 = vadd.f32 %v1001_v45, %v7236_v7 }
 0x54d   :  { %v5502_v50 = vmul.f32 -1.442695, %v1003_v48 }
 0x54f   :  { %6609 = vpow2.f32 %v5502_v50 }
 0x550   :  { %v1174_v52 = vpop.f32.mrf.mxu0 }
 0x551   :  { %v1178_v53 = vadd.f32 %v1174_v52, %v1105_v51 }
 0x552   :  { %v6098_v54 = vpop.f32.mrf.mxu0 }
 0x553   :  { %v5505_v55 = vmul.f32 -1.442695, %v1178_v53 }
 0x555   :  { %6611 = vpow2.f32 %v5505_v55 }
 0x556   :  { %6613 = vtanh.f32 %v1003_v48 }
 0x55c   :  { %v6610_v56 = vpop.eup %6609 }
 0x55d   :  { %v1008_v57 = vadd.f32 1.0, %v6610_v56 }
 0x55f   :  { %6615 = vrcp.f32 %v1008_v57 }
 0x560   :  { %6617 = vtanh.f32 %v1178_v53 }
 0x562   :  { %v6612_v58 = vpop.eup %6611 }
 0x563   :  { %v1183_v59 = vadd.f32 1.0, %v6612_v58  ;;  %v6614_v60 = vpop.eup %6613 }
 0x565   :  { %6619 = vrcp.f32 %v1183_v59 }
 0x56c   :  { %v6616_v61 = vpop.eup %6615 }
 0x56d   :  { %v1011_v62 = vsel %vm7241_vm6, %v6614_v60, %v6616_v61  ;;  %v6618_v63 = vpop.eup %6617 }
 0x56e   :  { %1017 = vrot.lane.b32.xlu0 %v1011_v62, %s6886_s28  ;;  %v1015_v9 = vmul.f32 %v1013_v8, %v1011_v62 }
 0x572   :  { %v6620_v0 = vpop.eup %6619 }
 0x573   :  { %v1186_v1 = vsel %vm7241_vm6, %v6618_v63, %v6620_v0 }
 0x574   :  { %1189 = vrot.lane.b32.xlu1 %v1186_v1, %s6886_s28  ;;  %v1187_v14 = vmul.f32 0.0, %v1186_v1 }
 0x5e0   :  { %v1018_v2 = vpop.permute.xlu0 %1017 }
 0x5e1   :  { %v1020_v3 = vmul.f32 %v1018_v2, %v1011_v62 }
 0x5e3   :  { %1022 = vrot.lane.b32.xlu0 %v1020_v3, %s6887_s29 }
 0x5e6   :  { %v1190_v4 = vpop.permute.xlu1 %1189 }
 0x5e7   :  { %v1192_v6 = vmul.f32 %v1190_v4, %v1186_v1 }
 0x5e9   :  { %1194 = vrot.lane.b32.xlu1 %v1192_v6, %s6887_s29 }
 0x655   :  { %v1023_v11 = vpop.permute.xlu0 %1022 }
 0x656   :  { %v7353_v12 = vadd.f32 %v1023_v11, %v1015_v9 }
 0x658   :  { %6621 = vtanh.f32 %v7353_v12  ;;  %v1293_v3 = vrot.slane %v7353_v12, 6 }
 0x65b   :  { %v1195_v16 = vpop.permute.xlu1 %1194 }
 0x65c   :  { %v7356_v19 = vadd.f32 %v1195_v16, %v1187_v14 }
 0x65e   :  { %6623 = vtanh.f32 %v7356_v19 }
 0x665   :  { %v6622_v21 = vpop.eup %6621 }
 0x666   :  { %1028 = vrot.lane.b32.xlu0 %v6622_v21, %s6886_s28 }
 0x66b   :  { %v6624_v22 = vpop.eup %6623 }
 0x66c   :  { %1200 = vrot.lane.b32.xlu1 %v6624_v22, %s6886_s28 }
 0x6d8   :  { %v1029_v24 = vpop.permute.xlu0 %1028 }
 0x6d9   :  { %v1031_v25 = vmul.f32 %v1029_v24, %v1011_v62 }
 0x6db   :  { %v1205_v26 = vrot.slane %v1031_v25, 2 }
 0x6dd   :  { %1206 = vrot.lane.b32.xlu0 %v1205_v26, %s6887_s29 }
 0x6de   :  { %v1201_v27 = vpop.permute.xlu1 %1200 }
 0x6df   :  { %v7362_v28 = vmul.f32 %v1201_v27, %v1186_v1 }
 0x6e1   :  { %1383 = vrot.lane.b32.xlu1 %v7362_v28, %s6887_s29 }
 0x74f   :  { %v1207_v29 = vpop.permute.xlu0 %1206 }
 0x750   :  { %6108 = vmatmul.mubr.msk.f32.vlgmr.msra.gmra.mxu1 %vm826_vm7, %v1207_v29  ;;  %6119 = vmatmul.mubr.msk.f32.vlgmr.msra.gmra.mxu0 %vm826_vm7, %v1207_v29 }
 0x751   :  { %6122 = vmatpush3.msra.mxu1 %v7285_v37  ;;  %6129 = vmatprep.mubr.msk.f32.mxu1 %vm6885_vm3, %v6884_v23 }
 0x752   :  { %6123 = vmatprep.subr.mxu1 %v6884_v23  ;;  %6133 = vmatpush3.msra.mxu0 %v7177_v13 }
 0x753   :  { %6124 = vmatpush3.msra.mxu1 %v7292_v39  ;;  %6134 = vmatprep.subr.mxu0 %v6884_v23  ;;  %v1384_v34 = vpop.permute.xlu1 %1383 }
 0x754   :  { %6125 = vmatprep.subr.mxu1 %v6884_v23  ;;  %6135 = vmatpush3.msra.mxu0 %v7187_v15 }
 0x755   :  { %6126 = vmatpush3.msra.mxu1 %v7301_v40  ;;  %6136 = vmatprep.subr.mxu0 %v6884_v23 }
 0x756   :  { %6127 = vmatprep.subr.mxu1 %v6884_v23  ;;  %6137 = vmatpush3.msra.mxu0 %v7197_v17 }
 0x757   :  { %6128 = vmatpush3.msra.mxu1 %v7310_v41  ;;  %6138 = vmatprep.subr.mxu0 %v6884_v23 }
 0x758   :  { %6130 = vmatmul.mubr.msk.f32.vlgmr.msra.gmra.mxu1 %vm826_vm7, %v1384_v34  ;;  %6143 = vmatprep.subr.mxu1 %v6884_v23 }
 0x759   :  { %6144 = vmatpush3.msra.mxu1 %v7255_v30  ;;  %6139 = vmatpush3.msra.mxu0 %v7204_v18 }
 0x75a   :  { %6145 = vmatprep.subr.mxu1 %v6884_v23  ;;  %6140 = vmatprep.mubr.msk.f32.mxu0 %vm6885_vm3, %v6884_v23 }
 0x75b   :  { %6146 = vmatpush3.msra.mxu1 %v7260_v31  ;;  %6154 = vmatprep.subr.mxu0 %v6884_v23 }
 0x75c   :  { %6147 = vmatprep.subr.mxu1 %v6884_v23  ;;  %6151 = vmatprep.mubr.msk.f32.mxu1 %vm6885_vm3, %v6884_v23 }
 0x75d   :  { %6148 = vmatpush3.msra.mxu1 %v7267_v32 }
 0x75e   :  { %6149 = vmatprep.subr.mxu1 %v6884_v23 }
 0x75f   :  { %6150 = vmatpush3.msra.mxu1 %v7274_v33 }
 0x760   :  { %6165 = vmatprep.subr.mxu1 %v6884_v23 }
 0x810   :  { %v1276_v35 = vpop.f32.mrf.mxu1  ;;  %v1378_v36 = vpop.f32.mrf.mxu0 }
 0x811   :  { %v1281_v38 = vrot.slane %v1276_v35, 4  ;;  %v1379_v47 = vadd.f32 %v7341_v49, %v1378_v36 }
 0x812   :  { %v6109_v43 = vpop.f32.mrf.mxu1  ;;  %v6120_v44 = vpop.f32.mrf.mxu0 }
 0x813   :  { %v1283_v45 = vadd.f32 %v1281_v38, %v7236_v7 }
 0x815   :  { %v5507_v46 = vmul.f32 -1.442695, %v1283_v45 }
 0x817   :  { %6625 = vpow2.f32 %v5507_v46 }
 0x818   :  { %v1453_v48 = vpop.f32.mrf.mxu1 }
 0x819   :  { %v1457_v50 = vadd.f32 %v1453_v48, %v1379_v47 }
 0x81a   :  { %v6131_v51 = vpop.f32.mrf.mxu1 }
 0x81b   :  { %v5510_v52 = vmul.f32 -1.442695, %v1457_v50 }
 0x81d   :  { %6627 = vpow2.f32 %v5510_v52 }
 0x81e   :  { %6629 = vtanh.f32 %v1283_v45 }
 0x824   :  { %v6626_v53 = vpop.eup %6625 }
 0x825   :  { %v1288_v54 = vadd.f32 1.0, %v6626_v53 }
 0x827   :  { %6631 = vrcp.f32 %v1288_v54 }
 0x828   :  { %6633 = vtanh.f32 %v1457_v50 }
 0x82a   :  { %v6628_v55 = vpop.eup %6627 }
 0x82b   :  { %v1462_v56 = vadd.f32 1.0, %v6628_v55  ;;  %v6630_v57 = vpop.eup %6629 }
 0x82d   :  { %6635 = vrcp.f32 %v1462_v56 }
 0x834   :  { %v6632_v58 = vpop.eup %6631 }
 0x835   :  { %v1291_v59 = vsel %vm7241_vm6, %v6630_v57, %v6632_v58  ;;  %v6634_v60 = vpop.eup %6633 }
 0x836   :  { %1297 = vrot.lane.b32.xlu0 %v1291_v59, %s6886_s28  ;;  %v1295_v4 = vmul.f32 %v1293_v3, %v1291_v59 }
 0x83a   :  { %v6636_v61 = vpop.eup %6635 }
 0x83b   :  { %v1465_v62 = vsel %vm7241_vm6, %v6634_v60, %v6636_v61 }
 0x83c   :  { %1468 = vrot.lane.b32.xlu1 %v1465_v62, %s6886_s28  ;;  %v1466_v9 = vmul.f32 %v1465_v62, %v7356_v19 }
 0x8a8   :  { %v1298_v63 = vpop.permute.xlu0 %1297 }
 0x8a9   :  { %v1300_v0 = vmul.f32 %v1298_v63, %v1291_v59 }
 0x8ab   :  { %1302 = vrot.lane.b32.xlu0 %v1300_v0, %s6887_s29 }
 0x8ae   :  { %v1469_v1 = vpop.permute.xlu1 %1468 }
 0x8af   :  { %v1471_v2 = vmul.f32 %v1469_v1, %v1465_v62 }
 0x8b1   :  { %1473 = vrot.lane.b32.xlu1 %v1471_v2, %s6887_s29 }
 0x91d   :  { %v1303_v6 = vpop.permute.xlu0 %1302 }
 0x91e   :  { %v7410_v8 = vadd.f32 %v1303_v6, %v1295_v4 }
 0x920   :  { %6637 = vtanh.f32 %v7410_v8  ;;  %v1572_v0 = vrot.slane %v7410_v8, 6 }
 0x923   :  { %v1474_v11 = vpop.permute.xlu1 %1473 }
 0x924   :  { %v7414_v14 = vadd.f32 %v1474_v11, %v1466_v9 }
 0x926   :  { %6639 = vtanh.f32 %v7414_v14 }
 0x92d   :  { %v6638_v16 = vpop.eup %6637 }
 0x92e   :  { %1308 = vrot.lane.b32.xlu0 %v6638_v16, %s6886_s28 }
 0x933   :  { %v6640_v21 = vpop.eup %6639 }
 0x934   :  { %1479 = vrot.lane.b32.xlu1 %v6640_v21, %s6886_s28 }
 0x9a0   :  { %v1309_v12 = vpop.permute.xlu0 %1308 }
 0x9a1   :  { %v1311_v22 = vmul.f32 %v1309_v12, %v1291_v59 }
 0x9a3   :  { %v1484_v24 = vrot.slane %v1311_v22, 4 }
 0x9a5   :  { %1485 = vrot.lane.b32.xlu0 %v1484_v24, %s6887_s29 }
 0x9a6   :  { %v1480_v25 = vpop.permute.xlu1 %1479 }
 0x9a7   :  { %v7420_v26 = vmul.f32 %v1480_v25, %v1465_v62 }
 0x9a9   :  { %1662 = vrot.lane.b32.xlu1 %v7420_v26, %s6887_s29  ;;  %v5275_v22 = vrot.slane %v7420_v26, 6 }
 0xa17   :  { %v1486_v19 = vpop.permute.xlu0 %1485 }
 0xa18   :  { %6141 = vmatmul.mubr.msk.f32.vlgmr.msra.gmra.mxu0 %vm826_vm7, %v1486_v19  ;;  %6152 = vmatmul.mubr.msk.f32.vlgmr.msra.gmra.mxu1 %vm826_vm7, %v1486_v19  ;;  %v5301_v19 = vsel %vm5300_vm8, %v7362_v28, %v5275_v22 }
 0xa19   :  { %6155 = vmatpush3.msra.mxu0 %v7285_v37  ;;  %6162 = vmatprep.mubr.msk.f32.mxu0 %vm6885_vm3, %v6884_v23 }
 0xa1a   :  { %6156 = vmatprep.subr.mxu0 %v6884_v23  ;;  %6166 = vmatpush3.msra.mxu1 %v7177_v13 }
 0xa1b   :  { %6157 = vmatpush3.msra.mxu0 %v7292_v39  ;;  %6167 = vmatprep.subr.mxu1 %v6884_v23  ;;  %v1663_v27 = vpop.permute.xlu1 %1662 }
 0xa1c   :  { %6158 = vmatprep.subr.mxu0 %v6884_v23  ;;  %6168 = vmatpush3.msra.mxu1 %v7187_v15 }
 0xa1d   :  { %6159 = vmatpush3.msra.mxu0 %v7301_v40  ;;  %6169 = vmatprep.subr.mxu1 %v6884_v23 }
 0xa1e   :  { %6160 = vmatprep.subr.mxu0 %v6884_v23  ;;  %6170 = vmatpush3.msra.mxu1 %v7197_v17 }
 0xa1f   :  { %6161 = vmatpush3.msra.mxu0 %v7310_v41  ;;  %6171 = vmatprep.subr.mxu1 %v6884_v23 }
 0xa20   :  { %6163 = vmatmul.mubr.msk.f32.vlgmr.msra.gmra.mxu0 %vm826_vm7, %v1663_v27  ;;  %6176 = vmatprep.subr.mxu0 %v6884_v23 }
 0xa21   :  { %6177 = vmatpush3.msra.mxu0 %v7255_v30  ;;  %6172 = vmatpush3.msra.mxu1 %v7204_v18 }
 0xa22   :  { %6178 = vmatprep.subr.mxu0 %v6884_v23  ;;  %6173 = vmatprep.mubr.msk.f32.mxu1 %vm6885_vm3, %v6884_v23 }
 0xa23   :  { %6179 = vmatpush3.msra.mxu0 %v7260_v31  ;;  %6184 = vmatprep.mubr.msk.f32.mxu0 %vm6885_vm3, %v6884_v23 }
 0xa24   :  { %6180 = vmatprep.subr.mxu0 %v6884_v23  ;;  %6187 = vmatprep.subr.mxu1 %v6884_v23 }
 0xa25   :  { %6181 = vmatpush3.msra.mxu0 %v7267_v32 }
 0xa26   :  { %6182 = vmatprep.subr.mxu0 %v6884_v23 }
 0xa27   :  { %6183 = vmatpush3.msra.mxu0 %v7274_v33 }
 0xa28   :  { %6198 = vmatprep.subr.mxu0 %v6884_v23 }
 0xad8   :  { %v1555_v29 = vpop.f32.mrf.mxu0  ;;  %v1657_v34 = vpop.f32.mrf.mxu1 }
 0xad9   :  { %v1560_v35 = vrot.slane %v1555_v29, 2  ;;  %v1658_v45 = vadd.f32 %v7341_v49, %v1657_v34 }
 0xada   :  { %v6142_v36 = vpop.f32.mrf.mxu0  ;;  %v6153_v38 = vpop.f32.mrf.mxu1 }
 0xadb   :  { %v1562_v43 = vadd.f32 %v1560_v35, %v7236_v7 }
 0xadd   :  { %v5512_v44 = vmul.f32 -1.442695, %v1562_v43 }
 0xadf   :  { %6641 = vpow2.f32 %v5512_v44 }
 0xae0   :  { %v1732_v46 = vpop.f32.mrf.mxu0 }
 0xae1   :  { %v1736_v47 = vadd.f32 %v1732_v46, %v1658_v45 }
 0xae2   :  { %v6164_v48 = vpop.f32.mrf.mxu0 }
 0xae3   :  { %v5515_v50 = vmul.f32 -1.442695, %v1736_v47 }
 0xae5   :  { %6643 = vpow2.f32 %v5515_v50 }
 0xae6   :  { %6645 = vtanh.f32 %v1562_v43 }
 0xaec   :  { %v6642_v51 = vpop.eup %6641 }
 0xaed   :  { %v1567_v52 = vadd.f32 1.0, %v6642_v51 }
 0xaef   :  { %6647 = vrcp.f32 %v1567_v52 }
 0xaf0   :  { %6649 = vtanh.f32 %v1736_v47 }
 0xaf2   :  { %v6644_v53 = vpop.eup %6643 }
 0xaf3   :  { %v1741_v54 = vadd.f32 1.0, %v6644_v53  ;;  %v6646_v55 = vpop.eup %6645 }
 0xaf5   :  { %6651 = vrcp.f32 %v1741_v54 }
 0xafc   :  { %v6648_v56 = vpop.eup %6647 }
 0xafd   :  { %v1570_v7 = vsel %vm7241_vm6, %v6646_v55, %v6648_v56  ;;  %v6650_v57 = vpop.eup %6649 }
 0xafe   :  { %1576 = vrot.lane.b32.xlu0 %v1570_v7, %s6886_s28  ;;  %v1574_v1 = vmul.f32 %v1572_v0, %v1570_v7 }
 0xb02   :  { %v6652_v58 = vpop.eup %6651 }
 0xb03   :  { %v1744_v59 = vsel %vm7241_vm6, %v6650_v57, %v6652_v58 }
 0xb04   :  { %1747 = vrot.lane.b32.xlu1 %v1744_v59, %s6886_s28  ;;  %v1745_v4 = vmul.f32 %v1744_v59, %v7414_v14 }
 0xb70   :  { %v1577_v60 = vpop.permute.xlu0 %1576 }
 0xb71   :  { %v1579_v61 = vmul.f32 %v1577_v60, %v1570_v7 }
 0xb73   :  { %1581 = vrot.lane.b32.xlu0 %v1579_v61, %s6887_s29 }
 0xb76   :  { %v1748_v62 = vpop.permute.xlu1 %1747 }
 0xb77   :  { %v1750_v63 = vmul.f32 %v1748_v62, %v1744_v59 }
 0xb79   :  { %1752 = vrot.lane.b32.xlu1 %v1750_v63, %s6887_s29 }
 0xbe5   :  { %v1582_v2 = vpop.permute.xlu0 %1581 }
 0xbe6   :  { %v7468_v3 = vadd.f32 %v1582_v2, %v1574_v1 }
 0xbe8   :  { %6653 = vtanh.f32 %v7468_v3  ;;  %v1848_v63 = vrot.slane %v7468_v3, 6 }
 0xbeb   :  { %v1753_v6 = vpop.permute.xlu1 %1752 }
 0xbec   :  { %v7472_v9 = vadd.f32 %v1753_v6, %v1745_v4 }
 0xbee   :  { %6655 = vtanh.f32 %v7472_v9 }
 0xbf5   :  { %v6654_v11 = vpop.eup %6653 }
 0xbf6   :  { %1587 = vrot.lane.b32.xlu0 %v6654_v11, %s6886_s28 }
 0xbfb   :  { %v6656_v16 = vpop.eup %6655 }
 0xbfc   :  { %1758 = vrot.lane.b32.xlu1 %v6656_v16, %s6886_s28 }
 0xc68   :  { %v1588_v8 = vpop.permute.xlu0 %1587 }
 0xc69   :  { %v1590_v21 = vmul.f32 %v1588_v8, %v1570_v7 }
 0xc6b   :  { %v1763_v12 = vrot.slane %v1590_v21, 6 }
 0xc6d   :  { %1764 = vrot.lane.b32.xlu0 %v1763_v12, %s6887_s29 }
 0xc6e   :  { %v1759_v24 = vpop.permute.xlu1 %1758 }
 0xc6f   :  { %v1761_v14 = vmul.f32 %v1759_v24, %v1744_v59 }
 0xc71   :  { %v5277_v25 = vrot.slane %v1761_v14, 4  ;;  %1938 = vrot.lane.b32.xlu1 %v1761_v14, %s6887_s29 }
 0xc73   :  { %v7483_v27 = vsel %vm71_vm0, %v5301_v19, %v5277_v25 }
 0xcdf   :  { %v1765_v29 = vpop.permute.xlu0 %1764 }
 0xce0   :  { %6174 = vmatmul.mubr.msk.f32.vlgmr.msra.gmra.mxu1 %vm826_vm7, %v1765_v29  ;;  %6185 = vmatmul.mubr.msk.f32.vlgmr.msra.gmra.mxu0 %vm826_vm7, %v1765_v29 }
 0xce1   :  { %6188 = vmatpush3.msra.mxu1 %v7285_v37  ;;  %6195 = vmatprep.mubr.msk.f32.mxu1 %vm6885_vm3, %v6884_v23 }
 0xce2   :  { %6189 = vmatprep.subr.mxu1 %v6884_v23  ;;  %6199 = vmatpush3.msra.mxu0 %v7177_v13 }
 0xce3   :  { %6190 = vmatpush3.msra.mxu1 %v7292_v39  ;;  %6200 = vmatprep.subr.mxu0 %v6884_v23  ;;  %v1939_v28 = vpop.permute.xlu1 %1938 }
 0xce4   :  { %6191 = vmatprep.subr.mxu1 %v6884_v23  ;;  %6201 = vmatpush3.msra.mxu0 %v7187_v15 }
 0xce5   :  { %6192 = vmatpush3.msra.mxu1 %v7301_v40  ;;  %6202 = vmatprep.subr.mxu0 %v6884_v23 }
 0xce6   :  { %6193 = vmatprep.subr.mxu1 %v6884_v23  ;;  %6203 = vmatpush3.msra.mxu0 %v7197_v17 }
 0xce7   :  { %6194 = vmatpush3.msra.mxu1 %v7310_v41  ;;  %6204 = vmatprep.subr.mxu0 %v6884_v23 }
 0xce8   :  { %6196 = vmatmul.mubr.msk.f32.vlgmr.msra.gmra.mxu1 %vm826_vm7, %v1939_v28  ;;  %6209 = vmatprep.subr.mxu1 %v6884_v23 }
 0xce9   :  { %6210 = vmatpush3.msra.mxu1 %v7255_v30  ;;  %6205 = vmatpush3.msra.mxu0 %v7204_v18 }
 0xcea   :  { %6211 = vmatprep.subr.mxu1 %v6884_v23  ;;  %6206 = vmatprep.mubr.msk.f32.mxu0 %vm6885_vm3, %v6884_v23 }
 0xceb   :  { %6212 = vmatpush3.msra.mxu1 %v7260_v31  ;;  %6220 = vmatprep.subr.mxu0 %v6884_v23 }
 0xcec   :  { %6213 = vmatprep.subr.mxu1 %v6884_v23  ;;  %6217 = vmatprep.mubr.msk.f32.mxu1 %vm6885_vm3, %v6884_v23 }
 0xced   :  { %6214 = vmatpush3.msra.mxu1 %v7267_v32 }
 0xcee   :  { %6215 = vmatprep.subr.mxu1 %v6884_v23 }
 0xcef   :  { %6216 = vmatpush3.msra.mxu1 %v7274_v33 }
 0xcf0   :  { %6231 = vmatprep.subr.mxu1 %v6884_v23 }
 0xda0   :  { %v1834_v26 = vpop.f32.mrf.mxu1  ;;  %v1933_v34 = vpop.f32.mrf.mxu0 }
 0xda1   :  { %v1838_v35 = vadd.f32 %v1834_v26, %v7234_v5  ;;  %v1934_v44 = vadd.f32 %v7341_v49, %v1933_v34 }
 0xda2   :  { %v6175_v36 = vpop.f32.mrf.mxu1  ;;  %v6186_v38 = vpop.f32.mrf.mxu0 }
 0xda3   :  { %v5517_v43 = vmul.f32 -1.442695, %v1838_v35 }
 0xda5   :  { %6657 = vpow2.f32 %v5517_v43 }
 0xda8   :  { %v2008_v45 = vpop.f32.mrf.mxu1 }
 0xda9   :  { %v2012_v46 = vadd.f32 %v2008_v45, %v1934_v44 }
 0xdaa   :  { %v6197_v47 = vpop.f32.mrf.mxu1 }
 0xdab   :  { %v5520_v48 = vmul.f32 -1.442695, %v2012_v46 }
 0xdad   :  { %6659 = vpow2.f32 %v5520_v48 }
 0xdae   :  { %6661 = vtanh.f32 %v1838_v35 }
 0xdb2   :  { %v6658_v50 = vpop.eup %6657 }
 0xdb3   :  { %v1843_v51 = vadd.f32 1.0, %v6658_v50 }
 0xdb5   :  { %6663 = vrcp.f32 %v1843_v51 }
 0xdb6   :  { %6665 = vtanh.f32 %v2012_v46 }
 0xdba   :  { %v6660_v52 = vpop.eup %6659 }
 0xdbb   :  { %v2017_v53 = vadd.f32 1.0, %v6660_v52  ;;  %v6662_v54 = vpop.eup %6661 }
 0xdbd   :  { %6667 = vrcp.f32 %v2017_v53 }
 0xdc2   :  { %v6664_v55 = vpop.eup %6663 }
 0xdc3   :  { %v1846_v56 = vsel %vm7241_vm6, %v6662_v54, %v6664_v55  ;;  %v6666_v7 = vpop.eup %6665 }
 0xdc4   :  { %1852 = vrot.lane.b32.xlu0 %v1846_v56, %s6886_s28  ;;  %v1850_v0 = vmul.f32 %v1848_v63, %v1846_v56 }
 0xdca   :  { %v6668_v57 = vpop.eup %6667 }
 0xdcb   :  { %v2020_v58 = vsel %vm7241_vm6, %v6666_v7, %v6668_v57 }
 0xdcc   :  { %2023 = vrot.lane.b32.xlu1 %v2020_v58, %s6886_s28  ;;  %v2021_v4 = vmul.f32 %v2020_v58, %v7472_v9 }
 0xe36   :  { %v1853_v59 = vpop.permute.xlu0 %1852 }
 0xe37   :  { %v1855_v60 = vmul.f32 %v1853_v59, %v1846_v56 }
 0xe39   :  { %1857 = vrot.lane.b32.xlu0 %v1855_v60, %s6887_s29 }
 0xe3e   :  { %v2024_v61 = vpop.permute.xlu1 %2023 }
 0xe3f   :  { %v2026_v62 = vmul.f32 %v2024_v61, %v2020_v58 }
 0xe41   :  { %2028 = vrot.lane.b32.xlu1 %v2026_v62, %s6887_s29 }
 0xeab   :  { %v1858_v1 = vpop.permute.xlu0 %1857 }
 0xeac   :  { %v7529_v2 = vadd.f32 %v1858_v1, %v1850_v0 }
 0xeae   :  { %6669 = vtanh.f32 %v7529_v2  ;;  %v2126_v7 = vrot.slane %v7529_v2, 6 }
 0xeb3   :  { %v2029_v6 = vpop.permute.xlu1 %2028 }
 0xeb4   :  { %v7533_v11 = vadd.f32 %v2029_v6, %v2021_v4 }
 0xeb6   :  { %6671 = vtanh.f32 %v7533_v11 }
 0xebb   :  { %v6670_v16 = vpop.eup %6669 }
 0xebc   :  { %1863 = vrot.lane.b32.xlu0 %v6670_v16, %s6886_s28 }
 0xec3   :  { %v6672_v8 = vpop.eup %6671 }
 0xec4   :  { %2034 = vrot.lane.b32.xlu1 %v6672_v8, %s6886_s28  ;;  %v7611_v8 = vld [vmem:[%s8371_s6 + $0x18] sm:$0xff] }
 0xf2e   :  { %v1864_v3 = vpop.permute.xlu0 %1863 }
 0xf2f   :  { %v1866_v21 = vmul.f32 %v1864_v3, %v1846_v56 }
 0xf31   :  { %2039 = vrot.lane.b32.xlu0 %v1866_v21, %s6887_s29 }
 0xf36   :  { %v2035_v12 = vpop.permute.xlu1 %2034 }
 0xf37   :  { %v2037_v22 = vmul.f32 %v2035_v12, %v2020_v58 }
 0xf39   :  { %v5279_v24 = vrot.slane %v2037_v22, 2  ;;  %2216 = vrot.lane.b32.xlu1 %v2037_v22, %s6887_s29 }
 0xf3b   :  { %v7542_v9 = vsel %vm5303_vm9, %v7483_v27, %v5279_v24 }
 0xfa3   :  { %v2040_v14 = vpop.permute.xlu0 %2039 }
 0xfa4   :  { %6207 = vmatmul.mubr.msk.f32.vlgmr.msra.gmra.mxu0 %vm826_vm7, %v2040_v14  ;;  %6218 = vmatmul.mubr.msk.f32.vlgmr.msra.gmra.mxu1 %vm826_vm7, %v2040_v14 }
 0xfa5   :  { %6221 = vmatpush3.msra.mxu0 %v7285_v37  ;;  %6228 = vmatprep.mubr.msk.f32.mxu0 %vm6885_vm3, %v6884_v23 }
 0xfa6   :  { %6222 = vmatprep.subr.mxu0 %v6884_v23  ;;  %6232 = vmatpush3.msra.mxu1 %v7177_v13 }
 0xfa7   :  { %6223 = vmatpush3.msra.mxu0 %v7292_v39  ;;  %6233 = vmatprep.subr.mxu1 %v6884_v23 }
 0xfa8   :  { %6224 = vmatprep.subr.mxu0 %v6884_v23  ;;  %6234 = vmatpush3.msra.mxu1 %v7187_v15 }
 0xfa9   :  { %6225 = vmatpush3.msra.mxu0 %v7301_v40  ;;  %6235 = vmatprep.subr.mxu1 %v6884_v23 }
 0xfaa   :  { %6226 = vmatprep.subr.mxu0 %v6884_v23  ;;  %6236 = vmatpush3.msra.mxu1 %v7197_v17 }
 0xfab   :  { %6227 = vmatpush3.msra.mxu0 %v7310_v41  ;;  %v2217_v25 = vpop.permute.xlu1 %2216  ;;  %6237 = vmatprep.subr.mxu1 %v6884_v23 }
 0xfac   :  { %6229 = vmatmul.mubr.msk.f32.vlgmr.msra.gmra.mxu0 %vm826_vm7, %v2217_v25  ;;  %6242 = vmatprep.subr.mxu0 %v6884_v23 }
 0xfad   :  { %6243 = vmatpush3.msra.mxu0 %v7255_v30  ;;  %6238 = vmatpush3.msra.mxu1 %v7204_v18 }
 0xfae   :  { %6244 = vmatprep.subr.mxu0 %v6884_v23  ;;  %6239 = vmatprep.mubr.msk.f32.mxu1 %vm6885_vm3, %v6884_v23 }
 0xfaf   :  { %6245 = vmatpush3.msra.mxu0 %v7260_v31  ;;  %6250 = vmatprep.mubr.msk.f32.mxu0 %vm6885_vm3, %v6884_v23 }
 0xfb0   :  { %6246 = vmatprep.subr.mxu0 %v6884_v23  ;;  %6253 = vmatprep.subr.mxu1 %v6884_v23 }
 0xfb1   :  { %6247 = vmatpush3.msra.mxu0 %v7267_v32 }
 0xfb2   :  { %6248 = vmatprep.subr.mxu0 %v6884_v23 }
 0xfb3   :  { %6249 = vmatpush3.msra.mxu0 %v7274_v33 }
 0xfb4   :  { %6264 = vmatprep.subr.mxu0 %v6884_v23 }
0x1064   :  { %v2109_v13 = vpop.f32.mrf.mxu0  ;;  %v2211_v15 = vpop.f32.mrf.mxu1 }
0x1065   :  { %v2114_v17 = vrot.slane %v2109_v13, 6  ;;  %v2212_v28 = vadd.f32 %v7341_v49, %v2211_v15 }
0x1066   :  { %v6208_v18 = vpop.f32.mrf.mxu0  ;;  %v6219_v19 = vpop.f32.mrf.mxu1 }
0x1067   :  { %v2116_v27 = vadd.f32 %v2114_v17, %v7234_v5 }
0x1069   :  { %v5522_v29 = vmul.f32 -1.442695, %v2116_v27 }
0x106b   :  { %6673 = vpow2.f32 %v5522_v29 }
0x106c   :  { %v2286_v26 = vpop.f32.mrf.mxu0 }
0x106d   :  { %v2290_v34 = vadd.f32 %v2286_v26, %v2212_v28 }
0x106e   :  { %v6230_v35 = vpop.f32.mrf.mxu0 }
0x106f   :  { %v5525_v36 = vmul.f32 -1.442695, %v2290_v34 }
0x1071   :  { %6675 = vpow2.f32 %v5525_v36 }
0x1072   :  { %6677 = vtanh.f32 %v2116_v27 }
0x1078   :  { %v6674_v38 = vpop.eup %6673 }
0x1079   :  { %v2121_v43 = vadd.f32 1.0, %v6674_v38 }
0x107b   :  { %6679 = vrcp.f32 %v2121_v43 }
0x107c   :  { %6681 = vtanh.f32 %v2290_v34 }
0x107e   :  { %v6676_v44 = vpop.eup %6675 }
0x107f   :  { %v2295_v45 = vadd.f32 1.0, %v6676_v44  ;;  %v6678_v46 = vpop.eup %6677 }
0x1081   :  { %6683 = vrcp.f32 %v2295_v45 }
0x1088   :  { %v6680_v47 = vpop.eup %6679 }
0x1089   :  { %v2124_v48 = vsel %vm7241_vm6, %v6678_v46, %v6680_v47  ;;  %v6682_v50 = vpop.eup %6681 }
0x108a   :  { %2130 = vrot.lane.b32.xlu0 %v2124_v48, %s6886_s28  ;;  %v2128_v57 = vmul.f32 %v2126_v7, %v2124_v48 }
0x108e   :  { %v6684_v51 = vpop.eup %6683 }
0x108f   :  { %v2298_v52 = vsel %vm7241_vm6, %v6682_v50, %v6684_v51 }
0x1090   :  { %2301 = vrot.lane.b32.xlu1 %v2298_v52, %s6886_s28  ;;  %v2299_v60 = vmul.f32 %v2298_v52, %v7533_v11 }
0x10fc   :  { %v2131_v53 = vpop.permute.xlu0 %2130 }
0x10fd   :  { %v2133_v54 = vmul.f32 %v2131_v53, %v2124_v48 }
0x10ff   :  { %2135 = vrot.lane.b32.xlu0 %v2133_v54, %s6887_s29 }
0x1102   :  { %v2302_v55 = vpop.permute.xlu1 %2301 }
0x1103   :  { %v2304_v56 = vmul.f32 %v2302_v55, %v2298_v52 }
0x1105   :  { %2306 = vrot.lane.b32.xlu1 %v2304_v56, %s6887_s29 }
0x1171   :  { %v2136_v58 = vpop.permute.xlu0 %2135 }
0x1172   :  { %v7588_v59 = vadd.f32 %v2136_v58, %v2128_v57 }
0x1174   :  { %6685 = vtanh.f32 %v7588_v59  ;;  %v2405_v44 = vrot.slane %v7588_v59, 6  ;;  %v7685_v59 = vld [vmem:[%s8375_s9 + $0x18] sm:$0xff] }
0x1177   :  { %v2307_v61 = vpop.permute.xlu1 %2306 }
0x1178   :  { %v7592_v62 = vadd.f32 %v2307_v61, %v2299_v60  ;;  %v7695_v60 = vld [vmem:[%s8375_s9 + $0x10] sm:$0xff]  ;;  %v7704_v61 = vld [vmem:[%s8375_s9 + $0x8] sm:$0xff] }
0x117a   :  { %6687 = vtanh.f32 %v7592_v62 }
0x1181   :  { %v6686_v63 = vpop.eup %6685 }
0x1182   :  { %2141 = vrot.lane.b32.xlu0 %v6686_v63, %s6886_s28  ;;  %v7713_v63 = vld [vmem:[%s8375_s9] sm:$0xff] }
0x1187   :  { %v6688_v0 = vpop.eup %6687 }
0x1188   :  { %2312 = vrot.lane.b32.xlu1 %v6688_v0, %s6886_s28  ;;  %v7722_v0 = vld [vmem:[%s8374_s8 + $0x18] sm:$0xff] }
0x11f4   :  { %v2142_v1 = vpop.permute.xlu0 %2141 }
0x11f5   :  { %v2144_v2 = vmul.f32 %v2142_v1, %v2124_v48  ;;  %v7732_v1 = vld [vmem:[%s8374_s8 + $0x10] sm:$0xff] }
0x11f7   :  { %v2317_v4 = vrot.slane %v2144_v2, 2  ;;  %v7742_v2 = vld [vmem:[%s8374_s8 + $0x8] sm:$0xff] }
0x11f9   :  { %2318 = vrot.lane.b32.xlu0 %v2317_v4, %s6887_s29  ;;  %v7749_v4 = vld [vmem:[%s8374_s8] sm:$0xff] }
0x11fa   :  { %v2313_v6 = vpop.permute.xlu1 %2312 }
0x11fb   :  { %v7598_v16 = vmul.f32 %v2313_v6, %v2298_v52 }
0x11fd   :  { %2495 = vrot.lane.b32.xlu1 %v7598_v16, %s6887_s29 }
0x126b   :  { %v2319_v11 = vpop.permute.xlu0 %2318 }
0x126c   :  { %6240 = vmatmul.mubr.msk.f32.vlgmr.msra.gmra.mxu1 %vm826_vm7, %v2319_v11  ;;  %6251 = vmatmul.mubr.msk.f32.vlgmr.msra.gmra.mxu0 %vm826_vm7, %v2319_v11 }
0x126d   :  { %6254 = vmatpush3.msra.mxu1 %v7285_v37  ;;  %6261 = vmatprep.mubr.msk.f32.mxu1 %vm6885_vm3, %v6884_v23  ;;  %v7620_v37 = vld [vmem:[%s8371_s6 + $0x10] sm:$0xff] }
0x126e   :  { %6255 = vmatprep.subr.mxu1 %v6884_v23  ;;  %6265 = vmatpush3.msra.mxu0 %v7611_v8 }
0x126f   :  { %6256 = vmatpush3.msra.mxu1 %v7292_v39  ;;  %6266 = vmatprep.subr.mxu0 %v6884_v23  ;;  %v7629_v39 = vld [vmem:[%s8371_s6 + $0x8] sm:$0xff]  ;;  %v2496_v3 = vpop.permute.xlu1 %2495 }
0x1270   :  { %6257 = vmatprep.subr.mxu1 %v6884_v23  ;;  %6267 = vmatpush3.msra.mxu0 %v7620_v37 }
0x1271   :  { %6258 = vmatpush3.msra.mxu1 %v7301_v40  ;;  %6268 = vmatprep.subr.mxu0 %v6884_v23  ;;  %v7640_v40 = vld [vmem:[%s8371_s6] sm:$0xff] }
0x1272   :  { %6259 = vmatprep.subr.mxu1 %v6884_v23  ;;  %6269 = vmatpush3.msra.mxu0 %v7629_v39 }
0x1273   :  { %6260 = vmatpush3.msra.mxu1 %v7310_v41  ;;  %6270 = vmatprep.subr.mxu0 %v6884_v23 }
0x1274   :  { %6262 = vmatmul.mubr.msk.f32.vlgmr.msra.gmra.mxu1 %vm826_vm7, %v2496_v3  ;;  %6275 = vmatprep.subr.mxu1 %v6884_v23 }
0x1275   :  { %6276 = vmatpush3.msra.mxu1 %v7255_v30  ;;  %6271 = vmatpush3.msra.mxu0 %v7640_v40 }
0x1276   :  { %6277 = vmatprep.subr.mxu1 %v6884_v23  ;;  %6272 = vmatprep.mubr.msk.f32.mxu0 %vm6885_vm3, %v6884_v23 }
0x1277   :  { %6278 = vmatpush3.msra.mxu1 %v7260_v31  ;;  %6286 = vmatprep.subr.mxu0 %v6884_v23 }
0x1278   :  { %6279 = vmatprep.subr.mxu1 %v6884_v23  ;;  %6283 = vmatprep.mubr.msk.f32.mxu1 %vm6885_vm3, %v6884_v23 }
0x1279   :  { %6280 = vmatpush3.msra.mxu1 %v7267_v32 }
0x127a   :  { %6281 = vmatprep.subr.mxu1 %v6884_v23 }
0x127b   :  { %6282 = vmatpush3.msra.mxu1 %v7274_v33 }
0x127c   :  { %6297 = vmatprep.subr.mxu1 %v6884_v23 }
0x132c   :  { %v2388_v30 = vpop.f32.mrf.mxu1  ;;  %v2490_v41 = vpop.f32.mrf.mxu0 }
0x132d   :  { %v2393_v21 = vrot.slane %v2388_v30, 4  ;;  %v2491_v14 = vadd.f32 %v7341_v49, %v2490_v41 }
0x132e   :  { %v6241_v12 = vpop.f32.mrf.mxu1  ;;  %v6252_v31 = vpop.f32.mrf.mxu0 }
0x132f   :  { %v2395_v22 = vadd.f32 %v2393_v21, %v7234_v5  ;;  %v7757_v31 = vld [vmem:[%s8376_s10] ss:$0 sm:$0xff] }
0x1331   :  { %v5527_v24 = vmul.f32 -1.442695, %v2395_v22 }
0x1333   :  { %6689 = vpow2.f32 %v5527_v24 }
0x1334   :  { %v2565_v25 = vpop.f32.mrf.mxu1 }
0x1335   :  { %v2569_v13 = vadd.f32 %v2565_v25, %v2491_v14 }
0x1336   :  { %v6263_v32 = vpop.f32.mrf.mxu1 }
0x1337   :  { %v5530_v15 = vmul.f32 -1.442695, %v2569_v13 }
0x1339   :  { %6691 = vpow2.f32 %v5530_v15 }
0x133a   :  { %6693 = vtanh.f32 %v2395_v22 }
0x1340   :  { %v6690_v17 = vpop.eup %6689 }
0x1341   :  { %v2400_v33 = vadd.f32 1.0, %v6690_v17 }
0x1343   :  { %6695 = vrcp.f32 %v2400_v33 }
0x1344   :  { %6697 = vtanh.f32 %v2569_v13 }
0x1346   :  { %v6692_v18 = vpop.eup %6691 }
0x1347   :  { %v2574_v19 = vadd.f32 1.0, %v6692_v18  ;;  %v6694_v27 = vpop.eup %6693 }
0x1349   :  { %6699 = vrcp.f32 %v2574_v19 }
0x1350   :  { %v6696_v29 = vpop.eup %6695 }
0x1351   :  { %v2403_v28 = vsel %vm7241_vm6, %v6694_v27, %v6696_v29  ;;  %v6698_v49 = vpop.eup %6697 }
0x1352   :  { %2409 = vrot.lane.b32.xlu0 %v2403_v28, %s6886_s28  ;;  %v2407_v45 = vmul.f32 %v2405_v44, %v2403_v28 }
0x1356   :  { %v6700_v26 = vpop.eup %6699 }
0x1357   :  { %v2577_v34 = vsel %vm7241_vm6, %v6698_v49, %v6700_v26 }
0x1358   :  { %2580 = vrot.lane.b32.xlu1 %v2577_v34, %s6886_s28  ;;  %v2578_v48 = vmul.f32 %v2577_v34, %v7592_v62 }
0x13c4   :  { %v2410_v35 = vpop.permute.xlu0 %2409 }
0x13c5   :  { %v2412_v36 = vmul.f32 %v2410_v35, %v2403_v28 }
0x13c7   :  { %2414 = vrot.lane.b32.xlu0 %v2412_v36, %s6887_s29 }
0x13ca   :  { %v2581_v38 = vpop.permute.xlu1 %2580 }
0x13cb   :  { %v2583_v43 = vmul.f32 %v2581_v38, %v2577_v34 }
0x13cd   :  { %2585 = vrot.lane.b32.xlu1 %v2583_v43, %s6887_s29 }
0x1439   :  { %v2415_v46 = vpop.permute.xlu0 %2414 }
0x143a   :  { %v7666_v47 = vadd.f32 %v2415_v46, %v2407_v45 }
0x143c   :  { %6701 = vtanh.f32 %v7666_v47  ;;  %v2684_v36 = vrot.slane %v7666_v47, 6 }
0x143f   :  { %v2586_v50 = vpop.permute.xlu1 %2585 }
0x1440   :  { %v7670_v51 = vadd.f32 %v2586_v50, %v2578_v48 }
0x1442   :  { %6703 = vtanh.f32 %v7670_v51 }
0x1449   :  { %v6702_v52 = vpop.eup %6701 }
0x144a   :  { %2420 = vrot.lane.b32.xlu0 %v6702_v52, %s6886_s28 }
0x144f   :  { %v6704_v53 = vpop.eup %6703 }
0x1450   :  { %2591 = vrot.lane.b32.xlu1 %v6704_v53, %s6886_s28 }
0x14bc   :  { %v2421_v54 = vpop.permute.xlu0 %2420 }
0x14bd   :  { %v2423_v55 = vmul.f32 %v2421_v54, %v2403_v28 }
0x14bf   :  { %v2596_v56 = vrot.slane %v2423_v55, 4 }
0x14c1   :  { %2597 = vrot.lane.b32.xlu0 %v2596_v56, %s6887_s29 }
0x14c2   :  { %v2592_v7 = vpop.permute.xlu1 %2591 }
0x14c3   :  { %v7676_v57 = vmul.f32 %v2592_v7, %v2577_v34 }
0x14c5   :  { %2774 = vrot.lane.b32.xlu1 %v7676_v57, %s6887_s29  ;;  %v5281_v55 = vrot.slane %v7676_v57, 6  ;;  %v6870_v57 = vld [vmem:[%s8373_s7] ss:$0 sm:$0xff] }
0x1533   :  { %v2598_v58 = vpop.permute.xlu0 %2597 }
0x1534   :  { %6273 = vmatmul.mubr.msk.f32.vlgmr.msra.gmra.mxu0 %vm826_vm7, %v2598_v58  ;;  %6284 = vmatmul.mubr.msk.f32.vlgmr.msra.gmra.mxu1 %vm826_vm7, %v2598_v58  ;;  %v5305_v58 = vsel %vm5300_vm8, %v7598_v16, %v5281_v55 }
0x1535   :  { %6287 = vmatpush3.msra.mxu0 %v7685_v59  ;;  %6294 = vmatprep.mubr.msk.f32.mxu0 %vm6885_vm3, %v6884_v23 }
0x1536   :  { %6288 = vmatprep.subr.mxu0 %v6884_v23  ;;  %6298 = vmatpush3.msra.mxu1 %v7611_v8 }
0x1537   :  { %6289 = vmatpush3.msra.mxu0 %v7695_v60  ;;  %6299 = vmatprep.subr.mxu1 %v6884_v23  ;;  %v2775_v62 = vpop.permute.xlu1 %2774 }
0x1538   :  { %6290 = vmatprep.subr.mxu0 %v6884_v23  ;;  %6300 = vmatpush3.msra.mxu1 %v7620_v37 }
0x1539   :  { %6291 = vmatpush3.msra.mxu0 %v7704_v61  ;;  %6301 = vmatprep.subr.mxu1 %v6884_v23 }
0x153a   :  { %6292 = vmatprep.subr.mxu0 %v6884_v23  ;;  %6302 = vmatpush3.msra.mxu1 %v7629_v39 }
0x153b   :  { %6293 = vmatpush3.msra.mxu0 %v7713_v63  ;;  %6303 = vmatprep.subr.mxu1 %v6884_v23 }
0x153c   :  { %6295 = vmatmul.mubr.msk.f32.vlgmr.msra.gmra.mxu0 %vm826_vm7, %v2775_v62  ;;  %6308 = vmatprep.subr.mxu0 %v6884_v23 }
0x153d   :  { %6309 = vmatpush3.msra.mxu0 %v7722_v0  ;;  %6304 = vmatpush3.msra.mxu1 %v7640_v40 }
0x153e   :  { %6310 = vmatprep.subr.mxu0 %v6884_v23  ;;  %6305 = vmatprep.mubr.msk.f32.mxu1 %vm6885_vm3, %v6884_v23 }
0x153f   :  { %6311 = vmatpush3.msra.mxu0 %v7732_v1  ;;  %6316 = vmatprep.mubr.msk.f32.mxu0 %vm6885_vm3, %v6884_v23 }
0x1540   :  { %6312 = vmatprep.subr.mxu0 %v6884_v23  ;;  %6319 = vmatprep.subr.mxu1 %v6884_v23 }
0x1541   :  { %6313 = vmatpush3.msra.mxu0 %v7742_v2 }
0x1542   :  { %6314 = vmatprep.subr.mxu0 %v6884_v23 }
0x1543   :  { %6315 = vmatpush3.msra.mxu0 %v7749_v4 }
0x1544   :  { %6330 = vmatprep.subr.mxu0 %v6884_v23 }
0x15f4   :  { %v2667_v6 = vpop.f32.mrf.mxu0  ;;  %v2769_v11 = vpop.f32.mrf.mxu1 }
0x15f5   :  { %v2672_v3 = vrot.slane %v2667_v6, 2  ;;  %v2770_v22 = vadd.f32 %v7757_v31, %v2769_v11  ;;  %v7823_v11 = vadd.f32 %v6870_v57, %v7335_v42 }
0x15f6   :  { %v6274_v30 = vpop.f32.mrf.mxu0  ;;  %v6285_v41 = vpop.f32.mrf.mxu1 }
0x15f7   :  { %v2674_v21 = vadd.f32 %v2672_v3, %v7234_v5 }
0x15f9   :  { %v5532_v12 = vmul.f32 -1.442695, %v2674_v21 }
0x15fb   :  { %6705 = vpow2.f32 %v5532_v12 }
0x15fc   :  { %v2844_v24 = vpop.f32.mrf.mxu0 }
0x15fd   :  { %v2848_v14 = vadd.f32 %v2844_v24, %v2770_v22 }
0x15fe   :  { %v6296_v25 = vpop.f32.mrf.mxu0 }
0x15ff   :  { %v5535_v13 = vmul.f32 -1.442695, %v2848_v14 }
0x1601   :  { %6707 = vpow2.f32 %v5535_v13 }
0x1602   :  { %6709 = vtanh.f32 %v2674_v21 }
0x1608   :  { %v6706_v32 = vpop.eup %6705 }
0x1609   :  { %v2679_v15 = vadd.f32 1.0, %v6706_v32 }
0x160b   :  { %6711 = vrcp.f32 %v2679_v15 }
0x160c   :  { %6713 = vtanh.f32 %v2848_v14 }
0x160e   :  { %v6708_v17 = vpop.eup %6707 }
0x160f   :  { %v2853_v5 = vadd.f32 1.0, %v6708_v17  ;;  %v6710_v33 = vpop.eup %6709 }
0x1611   :  { %6715 = vrcp.f32 %v2853_v5 }
0x1618   :  { %v6712_v18 = vpop.eup %6711 }
0x1619   :  { %v2682_v19 = vsel %vm7241_vm6, %v6710_v33, %v6712_v18  ;;  %v6714_v27 = vpop.eup %6713 }
0x161a   :  { %2688 = vrot.lane.b32.xlu0 %v2682_v19, %s6886_s28  ;;  %v2686_v38 = vmul.f32 %v2684_v36, %v2682_v19 }
0x161e   :  { %v6716_v29 = vpop.eup %6715 }
0x161f   :  { %v2856_v28 = vsel %vm7241_vm6, %v6714_v27, %v6716_v29 }
0x1620   :  { %2859 = vrot.lane.b32.xlu1 %v2856_v28, %s6886_s28  ;;  %v2857_v45 = vmul.f32 %v2856_v28, %v7670_v51 }
0x168c   :  { %v2689_v49 = vpop.permute.xlu0 %2688 }
0x168d   :  { %v2691_v26 = vmul.f32 %v2689_v49, %v2682_v19 }
0x168f   :  { %2693 = vrot.lane.b32.xlu0 %v2691_v26, %s6887_s29 }
0x1692   :  { %v2860_v34 = vpop.permute.xlu1 %2859 }
0x1693   :  { %v2862_v35 = vmul.f32 %v2860_v34, %v2856_v28 }
0x1695   :  { %2864 = vrot.lane.b32.xlu1 %v2862_v35, %s6887_s29 }
0x1701   :  { %v2694_v43 = vpop.permute.xlu0 %2693 }
0x1702   :  { %v7769_v44 = vadd.f32 %v2694_v43, %v2686_v38 }
0x1704   :  { %6717 = vtanh.f32 %v7769_v44  ;;  %v2960_v36 = vrot.slane %v7769_v44, 6 }
0x1707   :  { %v2865_v46 = vpop.permute.xlu1 %2864 }
0x1708   :  { %v7773_v48 = vadd.f32 %v2865_v46, %v2857_v45 }
0x170a   :  { %6719 = vtanh.f32 %v7773_v48 }
0x1711   :  { %v6718_v50 = vpop.eup %6717 }
0x1712   :  { %2699 = vrot.lane.b32.xlu0 %v6718_v50, %s6886_s28 }
0x1717   :  { %v6720_v52 = vpop.eup %6719 }
0x1718   :  { %2870 = vrot.lane.b32.xlu1 %v6720_v52, %s6886_s28 }
0x1784   :  { %v2700_v47 = vpop.permute.xlu0 %2699 }
0x1785   :  { %v2702_v53 = vmul.f32 %v2700_v47, %v2682_v19 }
0x1787   :  { %v2875_v54 = vrot.slane %v2702_v53, 6 }
0x1789   :  { %2876 = vrot.lane.b32.xlu0 %v2875_v54, %s6887_s29 }
0x178a   :  { %v2871_v56 = vpop.permute.xlu1 %2870 }
0x178b   :  { %v2873_v51 = vmul.f32 %v2871_v56, %v2856_v28 }
0x178d   :  { %v5283_v7 = vrot.slane %v2873_v51, 4  ;;  %3050 = vrot.lane.b32.xlu1 %v2873_v51, %s6887_s29 }
0x178f   :  { %v7784_v62 = vsel %vm71_vm0, %v5305_v58, %v5283_v7 }
0x17fb   :  { %v2877_v6 = vpop.permute.xlu0 %2876 }
0x17fc   :  { %6306 = vmatmul.mubr.msk.f32.vlgmr.msra.gmra.mxu1 %vm826_vm7, %v2877_v6  ;;  %6317 = vmatmul.mubr.msk.f32.vlgmr.msra.gmra.mxu0 %vm826_vm7, %v2877_v6 }
0x17fd   :  { %6320 = vmatpush3.msra.mxu1 %v7685_v59  ;;  %6327 = vmatprep.mubr.msk.f32.mxu1 %vm6885_vm3, %v6884_v23 }
0x17fe   :  { %6321 = vmatprep.subr.mxu1 %v6884_v23  ;;  %6331 = vmatpush3.msra.mxu0 %v7611_v8 }
0x17ff   :  { %6322 = vmatpush3.msra.mxu1 %v7695_v60  ;;  %6332 = vmatprep.subr.mxu0 %v6884_v23  ;;  %v3051_v16 = vpop.permute.xlu1 %3050 }
0x1800   :  { %6323 = vmatprep.subr.mxu1 %v6884_v23  ;;  %6333 = vmatpush3.msra.mxu0 %v7620_v37 }
0x1801   :  { %6324 = vmatpush3.msra.mxu1 %v7704_v61  ;;  %6334 = vmatprep.subr.mxu0 %v6884_v23 }
0x1802   :  { %6325 = vmatprep.subr.mxu1 %v6884_v23  ;;  %6335 = vmatpush3.msra.mxu0 %v7629_v39 }
0x1803   :  { %6326 = vmatpush3.msra.mxu1 %v7713_v63  ;;  %6336 = vmatprep.subr.mxu0 %v6884_v23 }
0x1804   :  { %6328 = vmatmul.mubr.msk.f32.vlgmr.msra.gmra.mxu1 %vm826_vm7, %v3051_v16  ;;  %6341 = vmatprep.subr.mxu1 %v6884_v23 }
0x1805   :  { %6342 = vmatpush3.msra.mxu1 %v7722_v0  ;;  %6337 = vmatpush3.msra.mxu0 %v7640_v40 }
0x1806   :  { %6343 = vmatprep.subr.mxu1 %v6884_v23  ;;  %6338 = vmatprep.mubr.msk.f32.mxu0 %vm6885_vm3, %v6884_v23 }
0x1807   :  { %6344 = vmatpush3.msra.mxu1 %v7732_v1  ;;  %6349 = vmatprep.mubr.msk.f32.mxu1 %vm6885_vm3, %v6884_v23 }
0x1808   :  { %6345 = vmatprep.subr.mxu1 %v6884_v23  ;;  %6352 = vmatprep.subr.mxu0 %v6884_v23 }
0x1809   :  { %6346 = vmatpush3.msra.mxu1 %v7742_v2 }
0x180a   :  { %6347 = vmatprep.subr.mxu1 %v6884_v23 }
0x180b   :  { %6348 = vmatpush3.msra.mxu1 %v7749_v4 }
0x180c   :  { %6363 = vmatprep.subr.mxu1 %v6884_v23 }
0x18bc   :  { %v2946_v3 = vpop.f32.mrf.mxu1  ;;  %v3045_v30 = vpop.f32.mrf.mxu0 }
0x18bd   :  { %v2950_v41 = vadd.f32 %v2946_v3, %v7823_v11  ;;  %v3046_v24 = vadd.f32 %v7757_v31, %v3045_v30 }
0x18be   :  { %v6307_v21 = vpop.f32.mrf.mxu1  ;;  %v6318_v12 = vpop.f32.mrf.mxu0 }
0x18bf   :  { %v5537_v22 = vmul.f32 -1.442695, %v2950_v41 }
0x18c1   :  { %6721 = vpow2.f32 %v5537_v22 }
0x18c4   :  { %v3120_v14 = vpop.f32.mrf.mxu1 }
0x18c5   :  { %v3124_v25 = vadd.f32 %v3120_v14, %v3046_v24 }
0x18c6   :  { %v6329_v13 = vpop.f32.mrf.mxu1 }
0x18c7   :  { %v5540_v32 = vmul.f32 -1.442695, %v3124_v25 }
0x18c9   :  { %6723 = vpow2.f32 %v5540_v32 }
0x18ca   :  { %6725 = vtanh.f32 %v2950_v41 }
0x18ce   :  { %v6722_v15 = vpop.eup %6721 }
0x18cf   :  { %v2955_v17 = vadd.f32 1.0, %v6722_v15 }
0x18d1   :  { %6727 = vrcp.f32 %v2955_v17 }
0x18d2   :  { %6729 = vtanh.f32 %v3124_v25 }
0x18d6   :  { %v6724_v42 = vpop.eup %6723 }
0x18d7   :  { %v3129_v5 = vadd.f32 1.0, %v6724_v42  ;;  %v6726_v33 = vpop.eup %6725 }
0x18d9   :  { %6731 = vrcp.f32 %v3129_v5 }
0x18de   :  { %v6728_v18 = vpop.eup %6727 }
0x18df   :  { %v2958_v19 = vsel %vm7241_vm6, %v6726_v33, %v6728_v18  ;;  %v6730_v27 = vpop.eup %6729 }
0x18e0   :  { %2964 = vrot.lane.b32.xlu0 %v2958_v19, %s6886_s28  ;;  %v2962_v38 = vmul.f32 %v2960_v36, %v2958_v19 }
0x18e6   :  { %v6732_v29 = vpop.eup %6731 }
0x18e7   :  { %v3132_v28 = vsel %vm7241_vm6, %v6730_v27, %v6732_v29 }
0x18e8   :  { %3135 = vrot.lane.b32.xlu1 %v3132_v28, %s6886_s28  ;;  %v3133_v46 = vmul.f32 %v3132_v28, %v7773_v48 }
0x1952   :  { %v2965_v49 = vpop.permute.xlu0 %2964 }
0x1953   :  { %v2967_v26 = vmul.f32 %v2965_v49, %v2958_v19 }
0x1955   :  { %2969 = vrot.lane.b32.xlu0 %v2967_v26, %s6887_s29 }
0x195a   :  { %v3136_v34 = vpop.permute.xlu1 %3135 }
0x195b   :  { %v3138_v35 = vmul.f32 %v3136_v34, %v3132_v28 }
0x195d   :  { %3140 = vrot.lane.b32.xlu1 %v3138_v35, %s6887_s29 }
0x19c7   :  { %v2970_v43 = vpop.permute.xlu0 %2969 }
0x19c8   :  { %v7836_v45 = vadd.f32 %v2970_v43, %v2962_v38 }
0x19ca   :  { %6733 = vtanh.f32 %v7836_v45  ;;  %v3238_v26 = vrot.slane %v7836_v45, 6 }
0x19cf   :  { %v3141_v50 = vpop.permute.xlu1 %3140 }
0x19d0   :  { %v7840_v52 = vadd.f32 %v3141_v50, %v3133_v46 }
0x19d2   :  { %6735 = vtanh.f32 %v7840_v52 }
0x19d7   :  { %v6734_v47 = vpop.eup %6733 }
0x19d8   :  { %2975 = vrot.lane.b32.xlu0 %v6734_v47, %s6886_s28 }
0x19df   :  { %v6736_v53 = vpop.eup %6735 }
0x19e0   :  { %3146 = vrot.lane.b32.xlu1 %v6736_v53, %s6886_s28 }
0x1a4a   :  { %v2976_v44 = vpop.permute.xlu0 %2975 }
0x1a4b   :  { %v2978_v54 = vmul.f32 %v2976_v44, %v2958_v19 }
0x1a4d   :  { %3151 = vrot.lane.b32.xlu0 %v2978_v54, %s6887_s29 }
0x1a52   :  { %v3147_v55 = vpop.permute.xlu1 %3146 }
0x1a53   :  { %v3149_v56 = vmul.f32 %v3147_v55, %v3132_v28 }
0x1a55   :  { %v5285_v51 = vrot.slane %v3149_v56, 2  ;;  %3328 = vrot.lane.b32.xlu1 %v3149_v56, %s6887_s29 }
0x1a57   :  { %v7849_v48 = vsel %vm5303_vm9, %v7784_v62, %v5285_v51 }
0x1abf   :  { %v3152_v7 = vpop.permute.xlu0 %3151 }
0x1ac0   :  { %6339 = vmatmul.mubr.msk.f32.vlgmr.msra.gmra.mxu0 %vm826_vm7, %v3152_v7  ;;  %6350 = vmatmul.mubr.msk.f32.vlgmr.msra.gmra.mxu1 %vm826_vm7, %v3152_v7 }
0x1ac1   :  { %6353 = vmatpush3.msra.mxu0 %v7685_v59  ;;  %6360 = vmatprep.mubr.msk.f32.mxu0 %vm6885_vm3, %v6884_v23 }
0x1ac2   :  { %6354 = vmatprep.subr.mxu0 %v6884_v23  ;;  %6364 = vmatpush3.msra.mxu1 %v7611_v8 }
0x1ac3   :  { %6355 = vmatpush3.msra.mxu0 %v7695_v60  ;;  %6365 = vmatprep.subr.mxu1 %v6884_v23 }
0x1ac4   :  { %6356 = vmatprep.subr.mxu0 %v6884_v23  ;;  %6366 = vmatpush3.msra.mxu1 %v7620_v37 }
0x1ac5   :  { %6357 = vmatpush3.msra.mxu0 %v7704_v61  ;;  %6367 = vmatprep.subr.mxu1 %v6884_v23 }
0x1ac6   :  { %6358 = vmatprep.subr.mxu0 %v6884_v23  ;;  %6368 = vmatpush3.msra.mxu1 %v7629_v39 }
0x1ac7   :  { %v3329_v58 = vpop.permute.xlu1 %3328  ;;  %6359 = vmatpush3.msra.mxu0 %v7713_v63  ;;  %6369 = vmatprep.subr.mxu1 %v6884_v23 }
0x1ac8   :  { %6361 = vmatmul.mubr.msk.f32.vlgmr.msra.gmra.mxu0 %vm826_vm7, %v3329_v58  ;;  %6374 = vmatprep.subr.mxu0 %v6884_v23 }
0x1ac9   :  { %6375 = vmatpush3.msra.mxu0 %v7722_v0  ;;  %6370 = vmatpush3.msra.mxu1 %v7640_v40 }
0x1aca   :  { %6376 = vmatprep.subr.mxu0 %v6884_v23  ;;  %6371 = vmatprep.mubr.msk.f32.mxu1 %vm6885_vm3, %v6884_v23 }
0x1acb   :  { %6377 = vmatpush3.msra.mxu0 %v7732_v1  ;;  %6382 = vmatprep.mubr.msk.f32.mxu0 %vm6885_vm3, %v6884_v23 }
0x1acc   :  { %6378 = vmatprep.subr.mxu0 %v6884_v23  ;;  %6385 = vmatprep.subr.mxu1 %v6884_v23 }
0x1acd   :  { %6379 = vmatpush3.msra.mxu0 %v7742_v2 }
0x1ace   :  { %6380 = vmatprep.subr.mxu0 %v6884_v23 }
0x1acf   :  { %6381 = vmatpush3.msra.mxu0 %v7749_v4 }
0x1ad0   :  { %6396 = vmatprep.subr.mxu0 %v6884_v23 }
0x1b80   :  { %v3221_v62 = vpop.f32.mrf.mxu0  ;;  %v3323_v6 = vpop.f32.mrf.mxu1 }
0x1b81   :  { %v3226_v16 = vrot.slane %v3221_v62, 6  ;;  %v3324_v21 = vadd.f32 %v7757_v31, %v3323_v6 }
0x1b82   :  { %v6340_v57 = vpop.f32.mrf.mxu0  ;;  %v6351_v3 = vpop.f32.mrf.mxu1 }
0x1b83   :  { %v3228_v30 = vadd.f32 %v3226_v16, %v7823_v11 }
0x1b85   :  { %v5542_v41 = vmul.f32 -1.442695, %v3228_v30 }
0x1b87   :  { %6737 = vpow2.f32 %v5542_v41 }
0x1b88   :  { %v3398_v12 = vpop.f32.mrf.mxu0 }
0x1b89   :  { %v3402_v22 = vadd.f32 %v3398_v12, %v3324_v21 }
0x1b8a   :  { %v6362_v24 = vpop.f32.mrf.mxu0 }
0x1b8b   :  { %v5545_v14 = vmul.f32 -1.442695, %v3402_v22 }
0x1b8d   :  { %6739 = vpow2.f32 %v5545_v14 }
0x1b8e   :  { %6741 = vtanh.f32 %v3228_v30 }
0x1b94   :  { %v6738_v25 = vpop.eup %6737 }
0x1b95   :  { %v3233_v13 = vadd.f32 1.0, %v6738_v25 }
0x1b97   :  { %6743 = vrcp.f32 %v3233_v13 }
0x1b98   :  { %6745 = vtanh.f32 %v3402_v22 }
0x1b9a   :  { %v6740_v32 = vpop.eup %6739 }
0x1b9b   :  { %v3407_v15 = vadd.f32 1.0, %v6740_v32  ;;  %v6742_v17 = vpop.eup %6741 }
0x1b9d   :  { %6747 = vrcp.f32 %v3407_v15 }
0x1ba4   :  { %v6744_v42 = vpop.eup %6743 }
0x1ba5   :  { %v3236_v5 = vsel %vm7241_vm6, %v6742_v17, %v6744_v42  ;;  %v6746_v33 = vpop.eup %6745 }
0x1ba6   :  { %3242 = vrot.lane.b32.xlu0 %v3236_v5, %s6886_s28  ;;  %v3240_v34 = vmul.f32 %v3238_v26, %v3236_v5 }
0x1baa   :  { %v6748_v18 = vpop.eup %6747 }
0x1bab   :  { %v3410_v19 = vsel %vm7241_vm6, %v6746_v33, %v6748_v18 }
0x1bac   :  { %3413 = vrot.lane.b32.xlu1 %v3410_v19, %s6886_s28  ;;  %v3411_v38 = vmul.f32 %v3410_v19, %v7840_v52 }
0x1c18   :  { %v3243_v27 = vpop.permute.xlu0 %3242 }
0x1c19   :  { %v3245_v29 = vmul.f32 %v3243_v27, %v3236_v5 }
0x1c1b   :  { %3247 = vrot.lane.b32.xlu0 %v3245_v29, %s6887_s29 }
0x1c1e   :  { %v3414_v28 = vpop.permute.xlu1 %3413 }
0x1c1f   :  { %v3416_v49 = vmul.f32 %v3414_v28, %v3410_v19 }
0x1c21   :  { %3418 = vrot.lane.b32.xlu1 %v3416_v49, %s6887_s29 }
0x1c8d   :  { %v3248_v35 = vpop.permute.xlu0 %3247 }
0x1c8e   :  { %v7895_v36 = vadd.f32 %v3248_v35, %v3240_v34 }
0x1c90   :  { %6749 = vtanh.f32 %v7895_v36  ;;  %v3517_v29 = vrot.slane %v7895_v36, 6 }
0x1c93   :  { %v3419_v43 = vpop.permute.xlu1 %3418 }
0x1c94   :  { %v7899_v46 = vadd.f32 %v3419_v43, %v3411_v38 }
0x1c96   :  { %6751 = vtanh.f32 %v7899_v46 }
0x1c9d   :  { %v6750_v50 = vpop.eup %6749 }
0x1c9e   :  { %3253 = vrot.lane.b32.xlu0 %v6750_v50, %s6886_s28 }
0x1ca3   :  { %v6752_v47 = vpop.eup %6751 }
0x1ca4   :  { %3424 = vrot.lane.b32.xlu1 %v6752_v47, %s6886_s28 }
0x1d10   :  { %v3254_v45 = vpop.permute.xlu0 %3253 }
0x1d11   :  { %v3256_v53 = vmul.f32 %v3254_v45, %v3236_v5 }
0x1d13   :  { %v3429_v44 = vrot.slane %v3256_v53, 2 }
0x1d15   :  { %3430 = vrot.lane.b32.xlu0 %v3429_v44, %s6887_s29 }
0x1d16   :  { %v3425_v54 = vpop.permute.xlu1 %3424 }
0x1d17   :  { %v7905_v55 = vmul.f32 %v3425_v54, %v3410_v19 }
0x1d19   :  { %3607 = vrot.lane.b32.xlu1 %v7905_v55, %s6887_s29 }
0x1d87   :  { %v3431_v52 = vpop.permute.xlu0 %3430 }
0x1d88   :  { %6372 = vmatmul.mubr.msk.f32.vlgmr.msra.gmra.mxu1 %vm826_vm7, %v3431_v52  ;;  %6383 = vmatmul.mubr.msk.f32.vlgmr.msra.gmra.mxu0 %vm826_vm7, %v3431_v52 }
0x1d89   :  { %6386 = vmatpush3.msra.mxu1 %v7685_v59  ;;  %6393 = vmatprep.mubr.msk.f32.mxu1 %vm6885_vm3, %v6884_v23 }
0x1d8a   :  { %6387 = vmatprep.subr.mxu1 %v6884_v23  ;;  %6397 = vmatpush3.msra.mxu0 %v7611_v8 }
0x1d8b   :  { %6388 = vmatpush3.msra.mxu1 %v7695_v60  ;;  %6398 = vmatprep.subr.mxu0 %v6884_v23  ;;  %v3608_v56 = vpop.permute.xlu1 %3607 }
0x1d8c   :  { %6389 = vmatprep.subr.mxu1 %v6884_v23  ;;  %6399 = vmatpush3.msra.mxu0 %v7620_v37 }
0x1d8d   :  { %6390 = vmatpush3.msra.mxu1 %v7704_v61  ;;  %6400 = vmatprep.subr.mxu0 %v6884_v23 }
0x1d8e   :  { %6391 = vmatprep.subr.mxu1 %v6884_v23  ;;  %6401 = vmatpush3.msra.mxu0 %v7629_v39 }
0x1d8f   :  { %6392 = vmatpush3.msra.mxu1 %v7713_v63  ;;  %6402 = vmatprep.subr.mxu0 %v6884_v23 }
0x1d90   :  { %6394 = vmatmul.mubr.msk.f32.vlgmr.msra.gmra.mxu1 %vm826_vm7, %v3608_v56  ;;  %6407 = vmatprep.subr.mxu1 %v6884_v23 }
0x1d91   :  { %6408 = vmatpush3.msra.mxu1 %v7722_v0  ;;  %6403 = vmatpush3.msra.mxu0 %v7640_v40 }
0x1d92   :  { %6409 = vmatprep.subr.mxu1 %v6884_v23  ;;  %6404 = vmatprep.mubr.msk.f32.mxu0 %vm6885_vm3, %v6884_v23 }
0x1d93   :  { %6410 = vmatpush3.msra.mxu1 %v7732_v1  ;;  %6418 = vmatprep.subr.mxu0 %v6884_v23 }
0x1d94   :  { %6411 = vmatprep.subr.mxu1 %v6884_v23  ;;  %6415 = vmatprep.mubr.msk.f32.mxu1 %vm6885_vm3, %v6884_v23 }
0x1d95   :  { %6412 = vmatpush3.msra.mxu1 %v7742_v2 }
0x1d96   :  { %6413 = vmatprep.subr.mxu1 %v6884_v23 }
0x1d97   :  { %6414 = vmatpush3.msra.mxu1 %v7749_v4 }
0x1d98   :  { %6429 = vmatprep.subr.mxu1 %v6884_v23 }
0x1e48   :  { %v3500_v51 = vpop.f32.mrf.mxu1  ;;  %v3602_v7 = vpop.f32.mrf.mxu0 }
0x1e49   :  { %v3505_v58 = vrot.slane %v3500_v51, 4  ;;  %v3603_v3 = vadd.f32 %v7757_v31, %v3602_v7 }
0x1e4a   :  { %v6373_v62 = vpop.f32.mrf.mxu1  ;;  %v6384_v6 = vpop.f32.mrf.mxu0 }
0x1e4b   :  { %v3507_v16 = vadd.f32 %v3505_v58, %v7823_v11 }
0x1e4d   :  { %v5547_v57 = vmul.f32 -1.442695, %v3507_v16 }
0x1e4f   :  { %6753 = vpow2.f32 %v5547_v57 }
0x1e50   :  { %v3677_v30 = vpop.f32.mrf.mxu1 }
0x1e51   :  { %v3681_v41 = vadd.f32 %v3677_v30, %v3603_v3 }
0x1e52   :  { %v6395_v21 = vpop.f32.mrf.mxu1 }
0x1e53   :  { %v5550_v12 = vmul.f32 -1.442695, %v3681_v41 }
0x1e55   :  { %6755 = vpow2.f32 %v5550_v12 }
0x1e56   :  { %6757 = vtanh.f32 %v3507_v16 }
0x1e5c   :  { %v6754_v22 = vpop.eup %6753 }
0x1e5d   :  { %v3512_v24 = vadd.f32 1.0, %v6754_v22 }
0x1e5f   :  { %6759 = vrcp.f32 %v3512_v24 }
0x1e60   :  { %6761 = vtanh.f32 %v3681_v41 }
0x1e62   :  { %v6756_v14 = vpop.eup %6755 }
0x1e63   :  { %v3686_v25 = vadd.f32 1.0, %v6756_v14  ;;  %v6758_v13 = vpop.eup %6757 }
0x1e65   :  { %6763 = vrcp.f32 %v3686_v25 }
0x1e6c   :  { %v6760_v32 = vpop.eup %6759 }
0x1e6d   :  { %v3515_v15 = vsel %vm7241_vm6, %v6758_v13, %v6760_v32  ;;  %v6762_v17 = vpop.eup %6761 }
0x1e6e   :  { %3521 = vrot.lane.b32.xlu0 %v3515_v15, %s6886_s28  ;;  %v3519_v28 = vmul.f32 %v3517_v29, %v3515_v15 }
0x1e72   :  { %v6764_v42 = vpop.eup %6763 }
0x1e73   :  { %v3689_v5 = vsel %vm7241_vm6, %v6762_v17, %v6764_v42 }
0x1e74   :  { %3692 = vrot.lane.b32.xlu1 %v3689_v5, %s6886_s28  ;;  %v3690_v34 = vmul.f32 %v3689_v5, %v7899_v46 }
0x1ee0   :  { %v3522_v33 = vpop.permute.xlu0 %3521 }
0x1ee1   :  { %v3524_v18 = vmul.f32 %v3522_v33, %v3515_v15 }
0x1ee3   :  { %3526 = vrot.lane.b32.xlu0 %v3524_v18, %s6887_s29 }
0x1ee6   :  { %v3693_v19 = vpop.permute.xlu1 %3692 }
0x1ee7   :  { %v3695_v27 = vmul.f32 %v3693_v19, %v3689_v5 }
0x1ee9   :  { %3697 = vrot.lane.b32.xlu1 %v3695_v27, %s6887_s29 }
0x1f55   :  { %v3527_v49 = vpop.permute.xlu0 %3526 }
0x1f56   :  { %v7953_v26 = vadd.f32 %v3527_v49, %v3519_v28 }
0x1f58   :  { %6765 = vtanh.f32 %v7953_v26  ;;  %v3796_v17 = vrot.slane %v7953_v26, 6 }
0x1f5b   :  { %v3698_v35 = vpop.permute.xlu1 %3697 }
0x1f5c   :  { %v7957_v38 = vadd.f32 %v3698_v35, %v3690_v34 }
0x1f5e   :  { %6767 = vtanh.f32 %v7957_v38 }
0x1f65   :  { %v6766_v43 = vpop.eup %6765 }
0x1f66   :  { %3532 = vrot.lane.b32.xlu0 %v6766_v43, %s6886_s28 }
0x1f6b   :  { %v6768_v50 = vpop.eup %6767 }
0x1f6c   :  { %3703 = vrot.lane.b32.xlu1 %v6768_v50, %s6886_s28 }
0x1fd8   :  { %v3533_v36 = vpop.permute.xlu0 %3532 }
0x1fd9   :  { %v3535_v47 = vmul.f32 %v3533_v36, %v3515_v15 }
0x1fdb   :  { %v3708_v45 = vrot.slane %v3535_v47, 4 }
0x1fdd   :  { %3709 = vrot.lane.b32.xlu0 %v3708_v45, %s6887_s29 }
0x1fde   :  { %v3704_v53 = vpop.permute.xlu1 %3703 }
0x1fdf   :  { %v7963_v44 = vmul.f32 %v3704_v53, %v3689_v5  ;;  %v8037_v53 = vld [vmem:[%s8371_s6 + $0x18] sm:$0xff] }
0x1fe1   :  { %3886 = vrot.lane.b32.xlu1 %v7963_v44, %s6887_s29  ;;  %v5287_v35 = vrot.slane %v7963_v44, 6 }
0x1fe3   :  { %v5308_v36 = vsel %vm5300_vm8, %v7905_v55, %v5287_v35  ;;  %v8159_v35 = vld [vmem:[%s8374_s8 + $0x10] sm:$0xff] }
0x204f   :  { %v3710_v46 = vpop.permute.xlu0 %3709 }
0x2050   :  { %6405 = vmatmul.mubr.msk.f32.vlgmr.msra.gmra.mxu0 %vm826_vm7, %v3710_v46  ;;  %6416 = vmatmul.mubr.msk.f32.vlgmr.msra.gmra.mxu1 %vm826_vm7, %v3710_v46 }
0x2051   :  { %6419 = vmatpush3.msra.mxu0 %v7685_v59  ;;  %6426 = vmatprep.mubr.msk.f32.mxu0 %vm6885_vm3, %v6884_v23 }
0x2052   :  { %6420 = vmatprep.subr.mxu0 %v6884_v23  ;;  %6430 = vmatpush3.msra.mxu1 %v7611_v8 }
0x2053   :  { %6421 = vmatpush3.msra.mxu0 %v7695_v60  ;;  %6431 = vmatprep.subr.mxu1 %v6884_v23  ;;  %v3887_v54 = vpop.permute.xlu1 %3886 }
0x2054   :  { %6422 = vmatprep.subr.mxu0 %v6884_v23  ;;  %6432 = vmatpush3.msra.mxu1 %v7620_v37 }
0x2055   :  { %6423 = vmatpush3.msra.mxu0 %v7704_v61  ;;  %6433 = vmatprep.subr.mxu1 %v6884_v23 }
0x2056   :  { %6424 = vmatprep.subr.mxu0 %v6884_v23  ;;  %6434 = vmatpush3.msra.mxu1 %v7629_v39 }
0x2057   :  { %6425 = vmatpush3.msra.mxu0 %v7713_v63  ;;  %6435 = vmatprep.subr.mxu1 %v6884_v23 }
0x2058   :  { %6427 = vmatmul.mubr.msk.f32.vlgmr.msra.gmra.mxu0 %vm826_vm7, %v3887_v54  ;;  %6440 = vmatprep.subr.mxu0 %v6884_v23 }
0x2059   :  { %6441 = vmatpush3.msra.mxu0 %v7722_v0  ;;  %6436 = vmatpush3.msra.mxu1 %v7640_v40 }
0x205a   :  { %6442 = vmatprep.subr.mxu0 %v6884_v23  ;;  %6437 = vmatprep.mubr.msk.f32.mxu1 %vm6885_vm3, %v6884_v23 }
0x205b   :  { %6443 = vmatpush3.msra.mxu0 %v7732_v1  ;;  %6448 = vmatprep.mubr.msk.f32.mxu0 %vm6885_vm3, %v6884_v23 }
0x205c   :  { %6444 = vmatprep.subr.mxu0 %v6884_v23  ;;  %6451 = vmatprep.subr.mxu1 %v6884_v23 }
0x205d   :  { %6445 = vmatpush3.msra.mxu0 %v7742_v2 }
0x205e   :  { %6446 = vmatprep.subr.mxu0 %v6884_v23 }
0x205f   :  { %6447 = vmatpush3.msra.mxu0 %v7749_v4 }
0x2060   :  { %6462 = vmatprep.subr.mxu0 %v6884_v23 }
0x2110   :  { %v3779_v8 = vpop.f32.mrf.mxu0  ;;  %v3881_v37 = vpop.f32.mrf.mxu1 }
0x2111   :  { %v3784_v39 = vrot.slane %v3779_v8, 2  ;;  %v3882_v7 = vadd.f32 %v7757_v31, %v3881_v37 }
0x2112   :  { %v6406_v40 = vpop.f32.mrf.mxu0  ;;  %v6417_v52 = vpop.f32.mrf.mxu1 }
0x2113   :  { %v3786_v56 = vadd.f32 %v3784_v39, %v7823_v11 }
0x2115   :  { %v5552_v51 = vmul.f32 -1.442695, %v3786_v56 }
0x2117   :  { %6769 = vpow2.f32 %v5552_v51 }
0x2118   :  { %v3956_v58 = vpop.f32.mrf.mxu0 }
0x2119   :  { %v3960_v62 = vadd.f32 %v3956_v58, %v3882_v7 }
0x211a   :  { %v6428_v6 = vpop.f32.mrf.mxu0 }
0x211b   :  { %v5555_v16 = vmul.f32 -1.442695, %v3960_v62 }
0x211d   :  { %6771 = vpow2.f32 %v5555_v16 }
0x211e   :  { %6773 = vtanh.f32 %v3786_v56 }
0x2124   :  { %v6770_v57 = vpop.eup %6769 }
0x2125   :  { %v3791_v3 = vadd.f32 1.0, %v6770_v57 }
0x2127   :  { %6775 = vrcp.f32 %v3791_v3 }
0x2128   :  { %6777 = vtanh.f32 %v3960_v62 }
0x212a   :  { %v6772_v30 = vpop.eup %6771 }
0x212b   :  { %v3965_v41 = vadd.f32 1.0, %v6772_v30  ;;  %v6774_v21 = vpop.eup %6773 }
0x212d   :  { %6779 = vrcp.f32 %v3965_v41 }
0x2134   :  { %v6776_v12 = vpop.eup %6775 }
0x2135   :  { %v3794_v11 = vsel %vm7241_vm6, %v6774_v21, %v6776_v12  ;;  %v6778_v22 = vpop.eup %6777 }
0x2136   :  { %3800 = vrot.lane.b32.xlu0 %v3794_v11, %s6886_s28  ;;  %v3798_v42 = vmul.f32 %v3796_v17, %v3794_v11 }
0x213a   :  { %v6780_v24 = vpop.eup %6779 }
0x213b   :  { %v3968_v14 = vsel %vm7241_vm6, %v6778_v22, %v6780_v24 }
0x213c   :  { %3971 = vrot.lane.b32.xlu1 %v3968_v14, %s6886_s28  ;;  %v3969_v18 = vmul.f32 %v3968_v14, %v7957_v38 }
0x21a8   :  { %v3801_v25 = vpop.permute.xlu0 %3800 }
0x21a9   :  { %v3803_v13 = vmul.f32 %v3801_v25, %v3794_v11 }
0x21ab   :  { %3805 = vrot.lane.b32.xlu0 %v3803_v13, %s6887_s29 }
0x21ae   :  { %v3972_v32 = vpop.permute.xlu1 %3971 }
0x21af   :  { %v3974_v15 = vmul.f32 %v3972_v32, %v3968_v14 }
0x21b1   :  { %3976 = vrot.lane.b32.xlu1 %v3974_v15, %s6887_s29 }
0x221d   :  { %v3806_v5 = vpop.permute.xlu0 %3805 }
0x221e   :  { %v8011_v33 = vadd.f32 %v3806_v5, %v3798_v42 }
0x2220   :  { %6781 = vtanh.f32 %v8011_v33  ;;  %v4072_v21 = vrot.slane %v8011_v33, 6 }
0x2223   :  { %v3977_v19 = vpop.permute.xlu1 %3976 }
0x2224   :  { %v8015_v27 = vadd.f32 %v3977_v19, %v3969_v18 }
0x2226   :  { %6783 = vtanh.f32 %v8015_v27 }
0x222d   :  { %v6782_v29 = vpop.eup %6781 }
0x222e   :  { %3811 = vrot.lane.b32.xlu0 %v6782_v29, %s6886_s28  ;;  %v8122_v29 = vld [vmem:[%s8375_s9 + $0x10] sm:$0xff] }
0x2233   :  { %v6784_v28 = vpop.eup %6783 }
0x2234   :  { %3982 = vrot.lane.b32.xlu1 %v6784_v28, %s6886_s28  ;;  %v8131_v28 = vld [vmem:[%s8375_s9 + $0x8] sm:$0xff] }
0x22a0   :  { %v3812_v49 = vpop.permute.xlu0 %3811 }
0x22a1   :  { %v3814_v26 = vmul.f32 %v3812_v49, %v3794_v11  ;;  %v8140_v49 = vld [vmem:[%s8375_s9] sm:$0xff] }
0x22a3   :  { %v3987_v34 = vrot.slane %v3814_v26, 6 }
0x22a5   :  { %3988 = vrot.lane.b32.xlu0 %v3987_v34, %s6887_s29  ;;  %v8149_v34 = vld [vmem:[%s8374_s8 + $0x18] sm:$0xff] }
0x22a6   :  { %v3983_v43 = vpop.permute.xlu1 %3982 }
0x22a7   :  { %v3985_v38 = vmul.f32 %v3983_v43, %v3968_v14  ;;  %v8169_v43 = vld [vmem:[%s8374_s8 + $0x8] sm:$0xff] }
0x22a9   :  { %v5289_v50 = vrot.slane %v3985_v38, 4  ;;  %4162 = vrot.lane.b32.xlu1 %v3985_v38, %s6887_s29  ;;  %v8176_v38 = vld [vmem:[%s8374_s8] sm:$0xff] }
0x22ab   :  { %v8026_v47 = vsel %vm71_vm0, %v5308_v36, %v5289_v50 }
0x2317   :  { %v3989_v45 = vpop.permute.xlu0 %3988 }
0x2318   :  { %6438 = vmatmul.mubr.msk.f32.vlgmr.msra.gmra.mxu1 %vm826_vm7, %v3989_v45  ;;  %6449 = vmatmul.mubr.msk.f32.vlgmr.msra.gmra.mxu0 %vm826_vm7, %v3989_v45 }
0x2319   :  { %6452 = vmatpush3.msra.mxu1 %v7685_v59  ;;  %6459 = vmatprep.mubr.msk.f32.mxu1 %vm6885_vm3, %v6884_v23  ;;  %v8046_v59 = vld [vmem:[%s8371_s6 + $0x10] sm:$0xff] }
0x231a   :  { %6453 = vmatprep.subr.mxu1 %v6884_v23  ;;  %6463 = vmatpush3.msra.mxu0 %v8037_v53 }
0x231b   :  { %6454 = vmatpush3.msra.mxu1 %v7695_v60  ;;  %6464 = vmatprep.subr.mxu0 %v6884_v23  ;;  %v8055_v60 = vld [vmem:[%s8371_s6 + $0x8] sm:$0xff]  ;;  %v4163_v55 = vpop.permute.xlu1 %4162 }
0x231c   :  { %6455 = vmatprep.subr.mxu1 %v6884_v23  ;;  %6465 = vmatpush3.msra.mxu0 %v8046_v59 }
0x231d   :  { %6456 = vmatpush3.msra.mxu1 %v7704_v61  ;;  %6466 = vmatprep.subr.mxu0 %v6884_v23  ;;  %v8066_v61 = vld [vmem:[%s8371_s6] sm:$0xff] }
0x231e   :  { %6457 = vmatprep.subr.mxu1 %v6884_v23  ;;  %6467 = vmatpush3.msra.mxu0 %v8055_v60 }
0x231f   :  { %6458 = vmatpush3.msra.mxu1 %v7713_v63  ;;  %6468 = vmatprep.subr.mxu0 %v6884_v23 }
0x2320   :  { %6460 = vmatmul.mubr.msk.f32.vlgmr.msra.gmra.mxu1 %vm826_vm7, %v4163_v55  ;;  %6473 = vmatprep.subr.mxu1 %v6884_v23 }
0x2321   :  { %6474 = vmatpush3.msra.mxu1 %v7722_v0  ;;  %6469 = vmatpush3.msra.mxu0 %v8066_v61 }
0x2322   :  { %6475 = vmatprep.subr.mxu1 %v6884_v23  ;;  %6470 = vmatprep.mubr.msk.f32.mxu0 %vm6885_vm3, %v6884_v23 }
0x2323   :  { %6476 = vmatpush3.msra.mxu1 %v7732_v1  ;;  %6484 = vmatprep.subr.mxu0 %v6884_v23 }
0x2324   :  { %6477 = vmatprep.subr.mxu1 %v6884_v23  ;;  %6481 = vmatprep.mubr.msk.f32.mxu1 %vm6885_vm3, %v6884_v23 }
0x2325   :  { %6478 = vmatpush3.msra.mxu1 %v7742_v2 }
0x2326   :  { %6479 = vmatprep.subr.mxu1 %v6884_v23 }
0x2327   :  { %6480 = vmatpush3.msra.mxu1 %v7749_v4 }
0x2328   :  { %6495 = vmatprep.subr.mxu1 %v6884_v23 }
0x23d8   :  { %v4058_v63 = vpop.f32.mrf.mxu1  ;;  %v4157_v0 = vpop.f32.mrf.mxu0 }
0x23d9   :  { %v4062_v44 = vadd.f32 %v4058_v63, %v7239_v10  ;;  %v4158_v8 = vadd.f32 %v7757_v31, %v4157_v0 }
0x23da   :  { %v6439_v1 = vpop.f32.mrf.mxu1  ;;  %v6450_v46 = vpop.f32.mrf.mxu0 }
0x23db   :  { %v5557_v54 = vmul.f32 -1.442695, %v4062_v44 }
0x23dd   :  { %6785 = vpow2.f32 %v5557_v54 }
0x23e0   :  { %v4232_v37 = vpop.f32.mrf.mxu1 }
0x23e1   :  { %v4236_v39 = vadd.f32 %v4232_v37, %v4158_v8 }
0x23e2   :  { %v6461_v40 = vpop.f32.mrf.mxu1 }
0x23e3   :  { %v5560_v2 = vmul.f32 -1.442695, %v4236_v39 }
0x23e5   :  { %6787 = vpow2.f32 %v5560_v2 }
0x23e6   :  { %6789 = vtanh.f32 %v4062_v44  ;;  %v8184_v44 = vld [vmem:[%s8376_s10] ss:$0 sm:$0xff] }
0x23ea   :  { %v6786_v52 = vpop.eup %6785 }
0x23eb   :  { %v4067_v56 = vadd.f32 1.0, %v6786_v52 }
0x23ed   :  { %6791 = vrcp.f32 %v4067_v56 }
0x23ee   :  { %6793 = vtanh.f32 %v4236_v39 }
0x23f2   :  { %v6788_v4 = vpop.eup %6787 }
0x23f3   :  { %v4241_v51 = vadd.f32 1.0, %v6788_v4  ;;  %v6790_v7 = vpop.eup %6789 }
0x23f5   :  { %6795 = vrcp.f32 %v4241_v51 }
0x23fa   :  { %v6792_v58 = vpop.eup %6791 }
0x23fb   :  { %v4070_v62 = vsel %vm7241_vm6, %v6790_v7, %v6792_v58  ;;  %v6794_v31 = vpop.eup %6793 }
0x23fc   :  { %4076 = vrot.lane.b32.xlu0 %v4070_v62, %s6886_s28  ;;  %v4074_v12 = vmul.f32 %v4072_v21, %v4070_v62 }
0x2402   :  { %v6796_v6 = vpop.eup %6795 }
0x2403   :  { %v4244_v16 = vsel %vm7241_vm6, %v6794_v31, %v6796_v6 }
0x2404   :  { %4247 = vrot.lane.b32.xlu1 %v4244_v16, %s6886_s28  ;;  %v4245_v24 = vmul.f32 %v4244_v16, %v8015_v27  ;;  %v8112_v27 = vld [vmem:[%s8375_s9 + $0x18] sm:$0xff] }
0x246e   :  { %v4077_v57 = vpop.permute.xlu0 %4076 }
0x246f   :  { %v4079_v3 = vmul.f32 %v4077_v57, %v4070_v62 }
0x2471   :  { %4081 = vrot.lane.b32.xlu0 %v4079_v3, %s6887_s29 }
0x2476   :  { %v4248_v30 = vpop.permute.xlu1 %4247 }
0x2477   :  { %v4250_v41 = vmul.f32 %v4248_v30, %v4244_v16 }
0x2479   :  { %4252 = vrot.lane.b32.xlu1 %v4250_v41, %s6887_s29 }
0x24e3   :  { %v4082_v11 = vpop.permute.xlu0 %4081 }
0x24e4   :  { %v8092_v22 = vadd.f32 %v4082_v11, %v4074_v12 }
0x24e6   :  { %6797 = vtanh.f32 %v8092_v22  ;;  %v4350_v3 = vrot.slane %v8092_v22, 6 }
0x24eb   :  { %v4253_v14 = vpop.permute.xlu1 %4252 }
0x24ec   :  { %v8096_v25 = vadd.f32 %v4253_v14, %v4245_v24 }
0x24ee   :  { %6799 = vtanh.f32 %v8096_v25 }
0x24f3   :  { %v6798_v13 = vpop.eup %6797 }
0x24f4   :  { %4087 = vrot.lane.b32.xlu0 %v6798_v13, %s6886_s28 }
0x24fb   :  { %v6800_v32 = vpop.eup %6799 }
0x24fc   :  { %4258 = vrot.lane.b32.xlu1 %v6800_v32, %s6886_s28 }
0x2566   :  { %v4088_v15 = vpop.permute.xlu0 %4087 }
0x2567   :  { %v4090_v17 = vmul.f32 %v4088_v15, %v4070_v62 }
0x2569   :  { %4263 = vrot.lane.b32.xlu0 %v4090_v17, %s6887_s29 }
0x256e   :  { %v4259_v42 = vpop.permute.xlu1 %4258 }
0x256f   :  { %v4261_v5 = vmul.f32 %v4259_v42, %v4244_v16 }
0x2571   :  { %v5291_v33 = vrot.slane %v4261_v5, 2  ;;  %4440 = vrot.lane.b32.xlu1 %v4261_v5, %s6887_s29 }
0x2573   :  { %v8105_v18 = vsel %vm5303_vm9, %v8026_v47, %v5291_v33 }
0x25db   :  { %v4264_v19 = vpop.permute.xlu0 %4263 }
0x25dc   :  { %6471 = vmatmul.mubr.msk.f32.vlgmr.msra.gmra.mxu0 %vm826_vm7, %v4264_v19  ;;  %6482 = vmatmul.mubr.msk.f32.vlgmr.msra.gmra.mxu1 %vm826_vm7, %v4264_v19 }
0x25dd   :  { %6485 = vmatpush3.msra.mxu0 %v8112_v27  ;;  %6492 = vmatprep.mubr.msk.f32.mxu0 %vm6885_vm3, %v6884_v23 }
0x25de   :  { %6486 = vmatprep.subr.mxu0 %v6884_v23  ;;  %6496 = vmatpush3.msra.mxu1 %v8037_v53 }
0x25df   :  { %6487 = vmatpush3.msra.mxu0 %v8122_v29  ;;  %6497 = vmatprep.subr.mxu1 %v6884_v23 }
0x25e0   :  { %6488 = vmatprep.subr.mxu0 %v6884_v23  ;;  %6498 = vmatpush3.msra.mxu1 %v8046_v59 }
0x25e1   :  { %6489 = vmatpush3.msra.mxu0 %v8131_v28  ;;  %6499 = vmatprep.subr.mxu1 %v6884_v23 }
0x25e2   :  { %6490 = vmatprep.subr.mxu0 %v6884_v23  ;;  %6500 = vmatpush3.msra.mxu1 %v8055_v60 }
0x25e3   :  { %6491 = vmatpush3.msra.mxu0 %v8140_v49  ;;  %v4441_v26 = vpop.permute.xlu1 %4440  ;;  %6501 = vmatprep.subr.mxu1 %v6884_v23 }
0x25e4   :  { %6493 = vmatmul.mubr.msk.f32.vlgmr.msra.gmra.mxu0 %vm826_vm7, %v4441_v26  ;;  %6506 = vmatprep.subr.mxu0 %v6884_v23 }
0x25e5   :  { %6507 = vmatpush3.msra.mxu0 %v8149_v34  ;;  %6502 = vmatpush3.msra.mxu1 %v8066_v61 }
0x25e6   :  { %6508 = vmatprep.subr.mxu0 %v6884_v23  ;;  %6503 = vmatprep.mubr.msk.f32.mxu1 %vm6885_vm3, %v6884_v23 }
0x25e7   :  { %6509 = vmatpush3.msra.mxu0 %v8159_v35  ;;  %6514 = vmatprep.mubr.msk.f32.mxu0 %vm6885_vm3, %v6884_v23 }
0x25e8   :  { %6510 = vmatprep.subr.mxu0 %v6884_v23  ;;  %6517 = vmatprep.subr.mxu1 %v6884_v23 }
0x25e9   :  { %6511 = vmatpush3.msra.mxu0 %v8169_v43 }
0x25ea   :  { %6512 = vmatprep.subr.mxu0 %v6884_v23 }
0x25eb   :  { %6513 = vmatpush3.msra.mxu0 %v8176_v38 }
0x25ec   :  { %6528 = vmatprep.subr.mxu0 %v6884_v23 }
0x269c   :  { %v4333_v50 = vpop.f32.mrf.mxu0  ;;  %v4435_v36 = vpop.f32.mrf.mxu1 }
0x269d   :  { %v4338_v47 = vrot.slane %v4333_v50, 6  ;;  %v4436_v1 = vadd.f32 %v8184_v44, %v4435_v36 }
0x269e   :  { %v6472_v45 = vpop.f32.mrf.mxu0  ;;  %v6483_v55 = vpop.f32.mrf.mxu1 }
0x269f   :  { %v4340_v63 = vadd.f32 %v4338_v47, %v7239_v10 }
0x26a1   :  { %v5562_v0 = vmul.f32 -1.442695, %v4340_v63 }
0x26a3   :  { %6801 = vpow2.f32 %v5562_v0 }
0x26a4   :  { %v4510_v46 = vpop.f32.mrf.mxu0 }
0x26a5   :  { %v4514_v54 = vadd.f32 %v4510_v46, %v4436_v1 }
0x26a6   :  { %v6494_v8 = vpop.f32.mrf.mxu0 }
0x26a7   :  { %v5565_v37 = vmul.f32 -1.442695, %v4514_v54 }
0x26a9   :  { %6803 = vpow2.f32 %v5565_v37 }
0x26aa   :  { %6805 = vtanh.f32 %v4340_v63 }
0x26b0   :  { %v6802_v39 = vpop.eup %6801 }
0x26b1   :  { %v4345_v40 = vadd.f32 1.0, %v6802_v39 }
0x26b3   :  { %6807 = vrcp.f32 %v4345_v40 }
0x26b4   :  { %6809 = vtanh.f32 %v4514_v54 }
0x26b6   :  { %v6804_v2 = vpop.eup %6803 }
0x26b7   :  { %v4519_v52 = vadd.f32 1.0, %v6804_v2  ;;  %v6806_v56 = vpop.eup %6805 }
0x26b9   :  { %6811 = vrcp.f32 %v4519_v52 }
0x26c0   :  { %v6808_v4 = vpop.eup %6807 }
0x26c1   :  { %v4348_v51 = vsel %vm7241_vm6, %v6806_v56, %v6808_v4  ;;  %v6810_v7 = vpop.eup %6809 }
0x26c2   :  { %4354 = vrot.lane.b32.xlu0 %v4348_v51, %s6886_s28  ;;  %v4352_v30 = vmul.f32 %v4350_v3, %v4348_v51 }
0x26c6   :  { %v6812_v58 = vpop.eup %6811 }
0x26c7   :  { %v4522_v62 = vsel %vm7241_vm6, %v6810_v7, %v6812_v58 }
0x26c8   :  { %4525 = vrot.lane.b32.xlu1 %v4522_v62, %s6886_s28  ;;  %v4523_v12 = vmul.f32 %v4522_v62, %v8096_v25 }
0x2734   :  { %v4355_v31 = vpop.permute.xlu0 %4354 }
0x2735   :  { %v4357_v6 = vmul.f32 %v4355_v31, %v4348_v51 }
0x2737   :  { %4359 = vrot.lane.b32.xlu0 %v4357_v6, %s6887_s29 }
0x273a   :  { %v4526_v16 = vpop.permute.xlu1 %4525 }
0x273b   :  { %v4528_v57 = vmul.f32 %v4526_v16, %v4522_v62 }
0x273d   :  { %4530 = vrot.lane.b32.xlu1 %v4528_v57, %s6887_s29 }
0x27a9   :  { %v4360_v41 = vpop.permute.xlu0 %4359 }
0x27aa   :  { %v8196_v21 = vadd.f32 %v4360_v41, %v4352_v30 }
0x27ac   :  { %6813 = vtanh.f32 %v8196_v21  ;;  %v4629_v7 = vrot.slane %v8196_v21, 6 }
0x27af   :  { %v4531_v11 = vpop.permute.xlu1 %4530 }
0x27b0   :  { %v8200_v24 = vadd.f32 %v4531_v11, %v4523_v12 }
0x27b2   :  { %6815 = vtanh.f32 %v8200_v24 }
0x27b9   :  { %v6814_v14 = vpop.eup %6813 }
0x27ba   :  { %4365 = vrot.lane.b32.xlu0 %v6814_v14, %s6886_s28 }
0x27bf   :  { %v6816_v13 = vpop.eup %6815 }
0x27c0   :  { %4536 = vrot.lane.b32.xlu1 %v6816_v13, %s6886_s28 }
0x282c   :  { %v4366_v22 = vpop.permute.xlu0 %4365 }
0x282d   :  { %v4368_v32 = vmul.f32 %v4366_v22, %v4348_v51 }
0x282f   :  { %v4541_v15 = vrot.slane %v4368_v32, 2 }
0x2831   :  { %4542 = vrot.lane.b32.xlu0 %v4541_v15, %s6887_s29 }
0x2832   :  { %v4537_v17 = vpop.permute.xlu1 %4536 }
0x2833   :  { %v8206_v42 = vmul.f32 %v4537_v17, %v4522_v62 }
0x2835   :  { %4719 = vrot.lane.b32.xlu1 %v8206_v42, %s6887_s29 }
0x28a3   :  { %v4543_v25 = vpop.permute.xlu0 %4542 }
0x28a4   :  { %6504 = vmatmul.mubr.msk.f32.vlgmr.msra.gmra.mxu1 %vm826_vm7, %v4543_v25  ;;  %6515 = vmatmul.mubr.msk.f32.vlgmr.msra.gmra.mxu0 %vm826_vm7, %v4543_v25 }
0x28a5   :  { %6518 = vmatpush3.msra.mxu1 %v8112_v27  ;;  %6525 = vmatprep.mubr.msk.f32.mxu1 %vm6885_vm3, %v6884_v23 }
0x28a6   :  { %6519 = vmatprep.subr.mxu1 %v6884_v23  ;;  %6529 = vmatpush3.msra.mxu0 %v8037_v53 }
0x28a7   :  { %6520 = vmatpush3.msra.mxu1 %v8122_v29  ;;  %6530 = vmatprep.subr.mxu0 %v6884_v23  ;;  %v4720_v5 = vpop.permute.xlu1 %4719 }
0x28a8   :  { %6521 = vmatprep.subr.mxu1 %v6884_v23  ;;  %6531 = vmatpush3.msra.mxu0 %v8046_v59 }
0x28a9   :  { %6522 = vmatpush3.msra.mxu1 %v8131_v28  ;;  %6532 = vmatprep.subr.mxu0 %v6884_v23 }
0x28aa   :  { %6523 = vmatprep.subr.mxu1 %v6884_v23  ;;  %6533 = vmatpush3.msra.mxu0 %v8055_v60 }
0x28ab   :  { %6524 = vmatpush3.msra.mxu1 %v8140_v49  ;;  %6534 = vmatprep.subr.mxu0 %v6884_v23 }
0x28ac   :  { %6526 = vmatmul.mubr.msk.f32.vlgmr.msra.gmra.mxu1 %vm826_vm7, %v4720_v5  ;;  %6539 = vmatprep.subr.mxu1 %v6884_v23 }
0x28ad   :  { %6540 = vmatpush3.msra.mxu1 %v8149_v34  ;;  %6535 = vmatpush3.msra.mxu0 %v8066_v61 }
0x28ae   :  { %6541 = vmatprep.subr.mxu1 %v6884_v23  ;;  %6536 = vmatprep.mubr.msk.f32.mxu0 %vm6885_vm3, %v6884_v23 }
0x28af   :  { %6542 = vmatpush3.msra.mxu1 %v8159_v35  ;;  %6550 = vmatprep.subr.mxu0 %v6884_v23 }
0x28b0   :  { %6543 = vmatprep.subr.mxu1 %v6884_v23  ;;  %6547 = vmatprep.mubr.msk.f32.mxu1 %vm6885_vm3, %v6884_v23 }
0x28b1   :  { %6544 = vmatpush3.msra.mxu1 %v8169_v43 }
0x28b2   :  { %6545 = vmatprep.subr.mxu1 %v6884_v23 }
0x28b3   :  { %6546 = vmatpush3.msra.mxu1 %v8176_v38 }
0x28b4   :  { %6561 = vmatprep.subr.mxu1 %v6884_v23 }
0x2964   :  { %v4612_v53 = vpop.f32.mrf.mxu1  ;;  %v4714_v59 = vpop.f32.mrf.mxu0 }
0x2965   :  { %v4617_v60 = vrot.slane %v4612_v53, 4  ;;  %v4715_v50 = vadd.f32 %v8184_v44, %v4714_v59 }
0x2966   :  { %v6505_v61 = vpop.f32.mrf.mxu1  ;;  %v6516_v33 = vpop.f32.mrf.mxu0 }
0x2967   :  { %v4619_v19 = vadd.f32 %v4617_v60, %v7239_v10 }
0x2969   :  { %v5567_v26 = vmul.f32 -1.442695, %v4619_v19 }
0x296b   :  { %6817 = vpow2.f32 %v5567_v26 }
0x296c   :  { %v4789_v36 = vpop.f32.mrf.mxu1 }
0x296d   :  { %v4793_v47 = vadd.f32 %v4789_v36, %v4715_v50 }
0x296e   :  { %v6527_v45 = vpop.f32.mrf.mxu1 }
0x296f   :  { %v5570_v55 = vmul.f32 -1.442695, %v4793_v47 }
0x2971   :  { %6819 = vpow2.f32 %v5570_v55 }
0x2972   :  { %6821 = vtanh.f32 %v4619_v19 }
0x2978   :  { %v6818_v63 = vpop.eup %6817 }
0x2979   :  { %v4624_v0 = vadd.f32 1.0, %v6818_v63 }
0x297b   :  { %6823 = vrcp.f32 %v4624_v0 }
0x297c   :  { %6825 = vtanh.f32 %v4793_v47 }
0x297e   :  { %v6820_v1 = vpop.eup %6819 }
0x297f   :  { %v4798_v46 = vadd.f32 1.0, %v6820_v1  ;;  %v6822_v54 = vpop.eup %6821 }
0x2981   :  { %6827 = vrcp.f32 %v4798_v46 }
0x2988   :  { %v6824_v8 = vpop.eup %6823 }
0x2989   :  { %v4627_v37 = vsel %vm7241_vm6, %v6822_v54, %v6824_v8  ;;  %v6826_v39 = vpop.eup %6825 }
0x298a   :  { %4633 = vrot.lane.b32.xlu0 %v4627_v37, %s6886_s28  ;;  %v4631_v58 = vmul.f32 %v4629_v7, %v4627_v37 }
0x298e   :  { %v6828_v40 = vpop.eup %6827 }
0x298f   :  { %v4801_v2 = vsel %vm7241_vm6, %v6826_v39, %v6828_v40 }
0x2990   :  { %4804 = vrot.lane.b32.xlu1 %v4801_v2, %s6886_s28  ;;  %v4802_v6 = vmul.f32 %v4801_v2, %v8200_v24 }
0x29fc   :  { %v4634_v52 = vpop.permute.xlu0 %4633 }
0x29fd   :  { %v4636_v56 = vmul.f32 %v4634_v52, %v4627_v37 }
0x29ff   :  { %4638 = vrot.lane.b32.xlu0 %v4636_v56, %s6887_s29 }
0x2a02   :  { %v4805_v4 = vpop.permute.xlu1 %4804 }
0x2a03   :  { %v4807_v51 = vmul.f32 %v4805_v4, %v4801_v2 }
0x2a05   :  { %4809 = vrot.lane.b32.xlu1 %v4807_v51, %s6887_s29 }
0x2a71   :  { %v4639_v62 = vpop.permute.xlu0 %4638 }
0x2a72   :  { %v8254_v31 = vadd.f32 %v4639_v62, %v4631_v58 }
0x2a74   :  { %6829 = vtanh.f32 %v8254_v31  ;;  %v4908_v45 = vrot.slane %v8254_v31, 6 }
0x2a77   :  { %v4810_v16 = vpop.permute.xlu1 %4809 }
0x2a78   :  { %v8258_v57 = vadd.f32 %v4810_v16, %v4802_v6 }
0x2a7a   :  { %6831 = vtanh.f32 %v8258_v57 }
0x2a81   :  { %v6830_v3 = vpop.eup %6829 }
0x2a82   :  { %4644 = vrot.lane.b32.xlu0 %v6830_v3, %s6886_s28 }
0x2a87   :  { %v6832_v30 = vpop.eup %6831 }
0x2a88   :  { %4815 = vrot.lane.b32.xlu1 %v6832_v30, %s6886_s28 }
0x2af4   :  { %v4645_v41 = vpop.permute.xlu0 %4644 }
0x2af5   :  { %v4647_v21 = vmul.f32 %v4645_v41, %v4627_v37 }
0x2af7   :  { %v4820_v12 = vrot.slane %v4647_v21, 4 }
0x2af9   :  { %4821 = vrot.lane.b32.xlu0 %v4820_v12, %s6887_s29 }
0x2afa   :  { %v4816_v11 = vpop.permute.xlu1 %4815 }
0x2afb   :  { %v8264_v14 = vmul.f32 %v4816_v11, %v4801_v2 }
0x2afd   :  { %4998 = vrot.lane.b32.xlu1 %v8264_v14, %s6887_s29  ;;  %v5293_v52 = vrot.slane %v8264_v14, 6 }
0x2aff   :  { %v5311_v7 = vsel %vm5300_vm8, %v8206_v42, %v5293_v52 }
0x2b6b   :  { %v4822_v24 = vpop.permute.xlu0 %4821 }
0x2b6c   :  { %6537 = vmatmul.mubr.msk.f32.vlgmr.msra.gmra.mxu0 %vm826_vm7, %v4822_v24  ;;  %6548 = vmatmul.mubr.msk.f32.vlgmr.msra.gmra.mxu1 %vm826_vm7, %v4822_v24 }
0x2b6d   :  { %6551 = vmatpush3.msra.mxu0 %v8112_v27  ;;  %6558 = vmatprep.mubr.msk.f32.mxu0 %vm6885_vm3, %v6884_v23 }
0x2b6e   :  { %6552 = vmatprep.subr.mxu0 %v6884_v23  ;;  %6562 = vmatpush3.msra.mxu1 %v8149_v34 }
0x2b6f   :  { %6553 = vmatpush3.msra.mxu0 %v8122_v29  ;;  %6563 = vmatprep.subr.mxu1 %v6884_v23  ;;  %v4999_v13 = vpop.permute.xlu1 %4998 }
0x2b70   :  { %6554 = vmatprep.subr.mxu0 %v6884_v23  ;;  %6564 = vmatpush3.msra.mxu1 %v8159_v35 }
0x2b71   :  { %6555 = vmatpush3.msra.mxu0 %v8131_v28  ;;  %6565 = vmatprep.subr.mxu1 %v6884_v23 }
0x2b72   :  { %6556 = vmatprep.subr.mxu0 %v6884_v23  ;;  %6566 = vmatpush3.msra.mxu1 %v8169_v43 }
0x2b73   :  { %6557 = vmatpush3.msra.mxu0 %v8140_v49  ;;  %6567 = vmatprep.subr.mxu1 %v6884_v23 }
0x2b74   :  { %6559 = vmatmul.mubr.msk.f32.vlgmr.msra.gmra.mxu0 %vm826_vm7, %v4999_v13  ;;  %6572 = vmatprep.subr.mxu0 %v6884_v23 }
0x2b75   :  { %6573 = vmatpush3.msra.mxu0 %v8112_v27  ;;  %6568 = vmatpush3.msra.mxu1 %v8176_v38 }
0x2b76   :  { %6574 = vmatprep.subr.mxu0 %v6884_v23  ;;  %6569 = vmatprep.mubr.msk.f32.mxu1 %vm6885_vm3, %v6884_v23 }
0x2b77   :  { %6575 = vmatpush3.msra.mxu0 %v8122_v29  ;;  %6580 = vmatprep.mubr.msk.f32.mxu0 %vm6885_vm3, %v6884_v23 }
0x2b78   :  { %6576 = vmatprep.subr.mxu0 %v6884_v23 }
0x2b79   :  { %6577 = vmatpush3.msra.mxu0 %v8131_v28 }
0x2b7a   :  { %6578 = vmatprep.subr.mxu0 %v6884_v23 }
0x2b7b   :  { %6579 = vmatpush3.msra.mxu0 %v8140_v49 }
0x2c2c   :  { %v4891_v27 = vpop.f32.mrf.mxu0  ;;  %v4993_v34 = vpop.f32.mrf.mxu1 }
0x2c2d   :  { %v4896_v35 = vrot.slane %v4891_v27, 2  ;;  %v4994_v29 = vadd.f32 %v8184_v44, %v4993_v34 }
0x2c2e   :  { %v6538_v43 = vpop.f32.mrf.mxu0  ;;  %v6549_v38 = vpop.f32.mrf.mxu1 }
0x2c2f   :  { %v4898_v22 = vadd.f32 %v4896_v35, %v7239_v10  ;;  %v5314_v38 = vld [vmem:[%s8377_s11] sm:$0xff] }
0x2c31   :  { %v5572_v32 = vmul.f32 -1.442695, %v4898_v22 }
0x2c33   :  { %6833 = vpow2.f32 %v5572_v32 }
0x2c34   :  { %v5068_v15 = vpop.f32.mrf.mxu0 }
0x2c35   :  { %v5072_v17 = vadd.f32 %v5068_v15, %v4994_v29 }
0x2c36   :  { %v6560_v25 = vpop.f32.mrf.mxu0 }
0x2c37   :  { %v5575_v5 = vmul.f32 -1.442695, %v5072_v17 }
0x2c39   :  { %6835 = vpow2.f32 %v5575_v5 }
0x2c3a   :  { %6837 = vtanh.f32 %v4898_v22 }
0x2c40   :  { %v6834_v28 = vpop.eup %6833 }
0x2c41   :  { %v4903_v23 = vadd.f32 1.0, %v6834_v28 }
0x2c43   :  { %6839 = vrcp.f32 %v4903_v23 }
0x2c44   :  { %6841 = vtanh.f32 %v5072_v17 }
0x2c46   :  { %v6836_v49 = vpop.eup %6835 }
0x2c47   :  { %v5077_v53 = vadd.f32 1.0, %v6836_v49  ;;  %v6838_v59 = vpop.eup %6837 }
0x2c49   :  { %6843 = vrcp.f32 %v5077_v53 }
0x2c50   :  { %v6840_v60 = vpop.eup %6839 }
0x2c51   :  { %v4906_v10 = vsel %vm7241_vm6, %v6838_v59, %v6840_v60  ;;  %v6842_v61 = vpop.eup %6841 }
0x2c52   :  { %4912 = vrot.lane.b32.xlu0 %v4906_v10, %s6886_s28  ;;  %v4910_v55 = vmul.f32 %v4908_v45, %v4906_v10 }
0x2c56   :  { %v6844_v33 = vpop.eup %6843 }
0x2c57   :  { %v5080_v19 = vsel %vm7241_vm6, %v6842_v61, %v6844_v33 }
0x2c58   :  { %5083 = vrot.lane.b32.xlu1 %v5080_v19, %s6886_s28  ;;  %v5081_v1 = vmul.f32 %v5080_v19, %v8258_v57 }
0x2cc4   :  { %v4913_v26 = vpop.permute.xlu0 %4912 }
0x2cc5   :  { %v4915_v50 = vmul.f32 %v4913_v26, %v4906_v10 }
0x2cc7   :  { %4917 = vrot.lane.b32.xlu0 %v4915_v50, %s6887_s29 }
0x2cca   :  { %v5084_v36 = vpop.permute.xlu1 %5083 }
0x2ccb   :  { %v5086_v47 = vmul.f32 %v5084_v36, %v5080_v19 }
0x2ccd   :  { %5088 = vrot.lane.b32.xlu1 %v5086_v47, %s6887_s29 }
0x2d39   :  { %v4918_v63 = vpop.permute.xlu0 %4917 }
0x2d3a   :  { %v4920_v0 = vadd.f32 %v4918_v63, %v4910_v55 }
0x2d3c   :  { %6845 = vtanh.f32 %v4920_v0 }
0x2d3f   :  { %v5089_v46 = vpop.permute.xlu1 %5088 }
0x2d40   :  { %v5091_v54 = vadd.f32 %v5089_v46, %v5081_v1 }
0x2d42   :  { %6847 = vtanh.f32 %v5091_v54 }
0x2d49   :  { %v6846_v8 = vpop.eup %6845 }
0x2d4a   :  { %4923 = vrot.lane.b32.xlu0 %v6846_v8, %s6886_s28 }
0x2d4f   :  { %v6848_v37 = vpop.eup %6847 }
0x2d50   :  { %5094 = vrot.lane.b32.xlu1 %v6848_v37, %s6886_s28 }
0x2dbc   :  { %v4924_v39 = vpop.permute.xlu0 %4923 }
0x2dbd   :  { %v4926_v40 = vmul.f32 %v4924_v39, %v4906_v10 }
0x2dbf   :  { %v5099_v2 = vrot.slane %v4926_v40, 6 }
0x2dc1   :  { %5100 = vrot.lane.b32.xlu0 %v5099_v2, %s6887_s29 }
0x2dc2   :  { %v5095_v56 = vpop.permute.xlu1 %5094 }
0x2dc3   :  { %v5097_v4 = vmul.f32 %v5095_v56, %v5080_v19 }
0x2dc5   :  { %v5295_v51 = vrot.slane %v5097_v4, 4  ;;  %5175 = vrot.lane.b32.xlu1 %v5097_v4, %s6887_s29 }
0x2dc7   :  { %v5312_v58 = vsel %vm71_vm0, %v5311_v7, %v5295_v51 }
0x2e33   :  { %v5101_v62 = vpop.permute.xlu0 %5100 }
0x2e34   :  { %6570 = vmatmul.mubr.msk.f32.vlgmr.msra.gmra.mxu1 %vm826_vm7, %v5101_v62 }
0x2e37   :  { %v5176_v31 = vpop.permute.xlu1 %5175 }
0x2e38   :  { %6581 = vmatmul.mubr.msk.f32.vlgmr.msra.gmra.mxu0 %vm826_vm7, %v5176_v31 }
0x2ef4   :  { %v5170_v6 = vpop.f32.mrf.mxu1 }
0x2ef5   :  { %v5171_v16 = vadd.f32 %v8184_v44, %v5170_v6  ;;  %v5317_v44 = vld [vmem:[%s8377_s11 + $0x18] sm:$0xff] }
0x2ef6   :  { %v6571_v57 = vpop.f32.mrf.mxu1  ;;  %6583 = vmatprep.subr.mxu1 %v5317_v44 }
0x2ef7   :  { %6584 = vmatpush3.msra.mxu1 %v5317_v44 }
0x2ef8   :  { %v5245_v3 = vpop.f32.mrf.mxu0  ;;  %6585 = vmatprep.subr.mxu1 %v5316_v20 }
0x2ef9   :  { %v5249_v30 = vadd.f32 %v5245_v3, %v5171_v16  ;;  %6586 = vmatpush3.msra.mxu1 %v5316_v20 }
0x2efa   :  { %v6582_v41 = vpop.f32.mrf.mxu0 }
0x2efb   :  { %v5578_v21 = vmul.f32 -1.442695, %v5249_v30 }
0x2efd   :  { %6849 = vpow2.f32 %v5578_v21 }
0x2efe   :  { %6851 = vtanh.f32 %v5249_v30 }
0x2f0a   :  { %v6850_v12 = vpop.eup %6849 }
0x2f0b   :  { %v5254_v11 = vadd.f32 1.0, %v6850_v12  ;;  %v6852_v42 = vpop.eup %6851 }
0x2f0d   :  { %6853 = vrcp.f32 %v5254_v11 }
0x2f1a   :  { %v6854_v14 = vpop.eup %6853 }
0x2f1b   :  { %v5257_v24 = vsel %vm7241_vm6, %v6852_v42, %v6854_v14 }
0x2f1c   :  { %5260 = vrot.lane.b32.xlu0 %v5257_v24, %s6886_s28  ;;  %v5258_v34 = vmul.f32 %v5257_v24, %v5091_v54 }
0x2f8e   :  { %v5261_v13 = vpop.permute.xlu0 %5260 }
0x2f8f   :  { %v5263_v27 = vmul.f32 %v5261_v13, %v5257_v24 }
0x2f91   :  { %5265 = vrot.lane.b32.xlu1 %v5263_v27, %s6887_s29 }
0x2f95   :  { %5329 = vrot.lane.b32.xlu1 %v7542_v9, %s6887_s29  ;;  %v5315_v9 = vld [vmem:[%s8377_s11 + $0x8] sm:$0xff] }
0x2f96   :  { %6587 = vmatprep.subr.mxu1 %v5315_v9 }
0x2f97   :  { %6588 = vmatpush3.msra.mxu1 %v5315_v9 }
0x2f98   :  { %6589 = vmatprep.subr.mxu1 %v5314_v38 }
0x2f99   :  { %5333 = vrot.lane.b32.xlu1 %v8105_v18, %s6887_s29  ;;  %6590 = vmatpush3.msra.mxu1 %v5314_v38 }
0x3003   :  { %v5266_v35 = vpop.permute.xlu1 %5265 }
0x3004   :  { %v5268_v43 = vadd.f32 %v5266_v35, %v5258_v34 }
0x3006   :  { %6855 = vtanh.f32 %v5268_v43 }
0x3007   :  { %v5330_v18 = vpop.permute.xlu1 %5329 }
0x3008   :  { %6591 = vmatprep.mubr.msk.f32.mxu1 %vm826_vm7, %v5330_v18 }
0x300b   :  { %v5334_v25 = vpop.permute.xlu1 %5333 }
0x3013   :  { %v6856_v22 = vpop.eup %6855 }
0x3014   :  { %5271 = vrot.lane.b32.xlu0 %v6856_v22, %s6886_s28 }
0x3018   :  { %5331 = vrot.lane.b32.xlu0 %v7849_v48, %s6887_s29  ;;  %v5579_v48 = vld [vmem:[%s8378_s12] ss:$0 sm:$0xff] }
0x3086   :  { %v5272_v32 = vpop.permute.xlu0 %5271 }
0x3087   :  { %v5274_v29 = vmul.f32 %v5272_v32, %v5257_v24 }
0x3089   :  { %v5298_v15 = vrot.slane %v5274_v29, 2 }
0x308a   :  { %v5332_v17 = vpop.permute.xlu0 %5331 }
0x308b   :  { %6592 = vmatmul.mubr.msk.f32.vlgmr.msra.gmra.mxu1 %vm826_vm7, %v5332_v17  ;;  %v5313_v5 = vsel %vm5303_vm9, %v5312_v58, %v5298_v15 }
0x308c   :  { %5335 = vrot.lane.b32.xlu0 %v5313_v5, %s6887_s29  ;;  %6594 = vmatprep.mubr.msk.f32.mxu1 %vm826_vm7, %v5334_v25 }
0x30fe   :  { %v5336_v28 = vpop.permute.xlu0 %5335 }
0x30ff   :  { %6595 = vmatmul.mubr.msk.f32.gmra.mxu1 %vm826_vm7, %v5336_v28 }
0x314b   :  { %v6593_v23 = vpop.f32.mrf.mxu1 }
0x314c   :  { %v5417_v49 = vadd.f32 %v6593_v23, %v5579_v48 }
0x314d   :  { %v5411_v53 = vpop.f32.mrf.mxu1 }
0x314e   :  { %5431 = vst [vmem:[%s8379_s13 + $0x8] sm:$0xff] %v5417_v49  ;;  %v5412_v59 = vadd.f32 %v5579_v48, %v5411_v53 }
0x3150   :  { %5430 = vst [vmem:[%s8379_s13] sm:$0xff] %v5412_v59 }
0x31bf   :  { %v6596_v60 = vpop.f32.mrf.mxu1 }
0x31c0   :  { %v5427_v10 = vadd.f32 %v6596_v60, %v5579_v48 }
0x31c1   :  { %v5421_v61 = vpop.f32.mrf.mxu1 }
0x31c2   :  { %5433 = vst [vmem:[%s8379_s13 + $0x18] sm:$0xff] %v5427_v10  ;;  %v5422_v33 = vadd.f32 %v5579_v48, %v5421_v61 }
0x31c4   :  { %5432 = vst [vmem:[%s8379_s13 + $0x10] sm:$0xff] %v5422_v33 }

</bundles_post_ra>
